<compile_context>
chip_gen: v7x
topology: tpu7x:2x2x1
jax: 0.10.0
libtpu: 0.0.40
codegen_flags: <defaults>
</compile_context>

<pallas_src>
import numpy as np
import jax
import jax.numpy as jnp
from jax.experimental import pallas as pl
from jax.experimental.pallas import tpu as pltpu

NUM_HEADS = 4
MODEL_DIM = 256
FFN_DIM = 1024
MAX_SEQ_LEN = 51
CLS_PAD = 128                        # pad 2-way classifier outputs to a full 128-lane store
NEG_INF = -1e9                       # finite mask sentinel (NaN-safe vs -inf)


def _tpu_tuning():
    """Generation-aware (row_tile, vmem_limit_bytes)."""
    try:
        kind = jax.devices()[0].device_kind.lower()
    except Exception:
        kind = ""
    if "v5e" in kind or "v5 lite" in kind or "v5lite" in kind:
        return 256, 48 * 1024 * 1024          # v5e: 128-wide MXU, 1 vst slot, no bf16 VPU
    if "v6" in kind:
        return 1024, 96 * 1024 * 1024         # v6e: 128 MiB VMEM, big tiles pay off
    if "7" in kind:
        return 512, 40 * 1024 * 1024          # v7x-class: 64 MiB VMEM per TC
    return 512, 48 * 1024 * 1024


_ROW_TILE, _VMEM_LIMIT_BYTES = _tpu_tuning()


def _largest_divisor(n, cap):
    d = min(n, cap)
    while d > 1 and n % d:
        d -= 1
    return max(d, 1)


# ----------------------------------------------------------------------------
# Pallas kernels (matmuls: bf16 operands, f32 accumulation)
# ----------------------------------------------------------------------------
def _linear_kernel(x_ref, w_ref, b_ref, o_ref):
    # fused QKV projection (or any bias-matmul): (rows, K) @ (K, N) + (1, N) -> o_ref.dtype
    o_ref[...] = (jnp.dot(x_ref[...].astype(jnp.bfloat16), w_ref[...],
                          preferred_element_type=jnp.float32)
                  + b_ref[...]).astype(o_ref.dtype)


def _proj_res_ln_kernel(ctx_ref, res_ref, w_ref, b_ref, g_ref, beta_ref, o_ref):
    # attention output projection + residual + LayerNorm, fused (ctx already bf16)
    y = (jnp.dot(ctx_ref[...], w_ref[...], preferred_element_type=jnp.float32) + b_ref[...])
    z = res_ref[...] + y
    mu = jnp.mean(z, axis=-1, keepdims=True)
    var = jnp.mean(jnp.square(z - mu), axis=-1, keepdims=True)
    o_ref[...] = ((z - mu) * jax.lax.rsqrt(var + 1e-5) * g_ref[...]
                  + beta_ref[...]).astype(o_ref.dtype)


def _ffn_res_ln_kernel(x_ref, w1_ref, b1_ref, w2_ref, b2_ref, g_ref, beta_ref, o_ref):
    # Conv1d(D,F,1) -> relu -> Conv1d(F,D,1) + residual + LayerNorm, fused
    xb = x_ref[...].astype(jnp.bfloat16)
    h = jnp.maximum(jnp.dot(xb, w1_ref[...], preferred_element_type=jnp.float32)
                    + b1_ref[...], 0.0)
    y = (jnp.dot(h.astype(jnp.bfloat16), w2_ref[...], preferred_element_type=jnp.float32)
         + b2_ref[...])
    z = x_ref[...] + y
    mu = jnp.mean(z, axis=-1, keepdims=True)
    var = jnp.mean(jnp.square(z - mu), axis=-1, keepdims=True)
    o_ref[...] = ((z - mu) * jax.lax.rsqrt(var + 1e-5) * g_ref[...]
                  + beta_ref[...]).astype(o_ref.dtype)


def _code_select_kernel(x_ref, w1_ref, b1_ref, w2_ref, b2_ref, o_ref):
    # code_selection: Linear(2D, D) -> tanh -> Linear(D, 2 padded to 128 lanes)
    h = jnp.tanh(jnp.dot(x_ref[...].astype(jnp.bfloat16), w1_ref[...],
                         preferred_element_type=jnp.float32) + b1_ref[...])
    o_ref[...] = (jnp.dot(h.astype(jnp.bfloat16), w2_ref[...],
                          preferred_element_type=jnp.float32) + b2_ref[...])


def _visit_embed_kernel(emb_ref, cm_ref, t_ref, pos_ref,
                        selw_ref, selb_ref, timew_ref, timeb_ref, bias_ref, o_ref):
    # sum_c(code_emb * (mask_code * p_mask)) + bias_emb + time_feature + pos_emb, fused
    # emb_ref is bf16 (halves the dominant DMA); accumulate the code-sum in f32
    C = emb_ref.shape[1]
    vis = emb_ref[:, 0, :].astype(jnp.float32) * cm_ref[:, 0:1]
    for c in range(1, C):                                   # static unroll, C is small
        vis = vis + emb_ref[:, c, :].astype(jnp.float32) * cm_ref[:, c:c + 1]
    t = t_ref[...] * (1.0 / 180.0)                          # (rows, 1)
    sel = t * selw_ref[...] + selb_ref[...]                 # (rows, 64)
    feat = 1.0 - jnp.tanh(sel * sel)
    tf = (jnp.dot(feat.astype(jnp.bfloat16), timew_ref[...],
                  preferred_element_type=jnp.float32) + timeb_ref[...])
    o_ref[...] = vis + bias_ref[...] + tf + pos_ref[...]


def _attention_kernel(q_ref, k_ref, v_ref, bias_ref, o_ref):
    # a block of G = batch*head groups per grid step; scale already folded into Wq/bq
    q = q_ref[...]                                          # (G, T, Dh) bf16
    k = k_ref[...]
    v = v_ref[...]
    s = jnp.einsum('gtd,gsd->gts', q, k, preferred_element_type=jnp.float32)
    s = s + bias_ref[...]                                   # (G, 1, T) additive key-padding bias
    m = jnp.max(s, axis=-1, keepdims=True)
    e = jnp.exp(s - m)
    p = e * pl.reciprocal(jnp.sum(e, axis=-1, keepdims=True), approx=True)
    o_ref[...] = jnp.einsum('gts,gsd->gtd', p.astype(v.dtype), v,
                            preferred_element_type=jnp.float32).astype(o_ref.dtype)


def _pool_classify_kernel(f_ref, bias_ref, ws_ref, bs_ref, wc_ref, bc_ref, sw_ref, pred_ref):
    feat = f_ref[...]                                       # (Bb, T, D) f32
    logits = jnp.sum(feat * ws_ref[...], axis=-1, keepdims=True) + bs_ref[...]
    logits = logits + bias_ref[...]                         # additive (Bb, T, 1) padding bias
    mx = jnp.max(logits, axis=1, keepdims=True)
    e = jnp.exp(logits - mx)
    sw = e * pl.reciprocal(jnp.sum(e, axis=1, keepdims=True), approx=True)
    sw_ref[...] = sw                                        # self-attention weights
    tw = sw * pl.reciprocal(jnp.sum(sw, axis=1, keepdims=True) + 1e-5, approx=True)
    avg = jnp.sum(feat * tw, axis=1)                        # (Bb, D)
    pred_ref[...] = (jnp.dot(avg.astype(jnp.bfloat16), wc_ref[...],
                             preferred_element_type=jnp.float32) + bc_ref[...])


# ----------------------------------------------------------------------------
# pallas_call wrappers
# ----------------------------------------------------------------------------
def _const_spec(shape):
    n = len(shape)
    return pl.BlockSpec(shape, lambda i, _n=n: (0,) * _n)


def _row_call(kernel, row_args, const_args, out_dim, *, out_dtype=jnp.float32,
              row_tile=None):
    """Grid over the leading (row) axis; weights use constant index_maps (VMEM-resident)."""
    M = row_args[0].shape[0]
    rt = _ROW_TILE if row_tile is None else row_tile
    tile = M if M <= rt else rt
    in_specs = []
    for a in row_args:
        in_specs.append(pl.BlockSpec((tile,) + a.shape[1:],
                                     lambda i, _n=a.ndim: (i,) + (0,) * (_n - 1)))
    for c in const_args:
        in_specs.append(_const_spec(c.shape))
    return pl.pallas_call(
        kernel,
        out_shape=jax.ShapeDtypeStruct((M, out_dim), out_dtype),
        grid=(pl.cdiv(M, tile),),
        in_specs=in_specs,
        out_specs=pl.BlockSpec((tile, out_dim), lambda i: (i, 0)),
        compiler_params=pltpu.CompilerParams(
            dimension_semantics=("parallel",),
            vmem_limit_bytes=_VMEM_LIMIT_BYTES),
    )(*row_args, *const_args)


def attention(qh, kh, vh, attn_bias):
    # qh/kh/vh: (B*H, T, Dh) bf16; attn_bias: (B*H, 1, T) f32 additive
    G_total, T, Dh = qh.shape
    G = _largest_divisor(G_total, 32)           # several batch*head groups per grid step
    qkv_spec = pl.BlockSpec((G, T, Dh), lambda i: (i, 0, 0))
    return pl.pallas_call(
        _attention_kernel,
        out_shape=jax.ShapeDtypeStruct((G_total, T, Dh), jnp.bfloat16),
        grid=(G_total // G,),
        in_specs=[qkv_spec, qkv_spec, qkv_spec,
                  pl.BlockSpec((G, 1, T), lambda i: (i, 0, 0))],
        out_specs=pl.BlockSpec((G, T, Dh), lambda i: (i, 0, 0)),
        compiler_params=pltpu.CompilerParams(
            dimension_semantics=("parallel",),
            vmem_limit_bytes=_VMEM_LIMIT_BYTES),
    )(qh, kh, vh, attn_bias)


def pool_classify(features, pool_bias, self_w, self_b, cls_w, cls_b):
    B, T, D = features.shape
    Bb = B if (B <= 8 or B % 8) else 8          # batch-blocked (pipelined DMA, megacore-splittable)
    return pl.pallas_call(
        _pool_classify_kernel,
        out_shape=(jax.ShapeDtypeStruct((B, T, 1), jnp.float32),
                   jax.ShapeDtypeStruct((B, CLS_PAD), jnp.float32)),
        grid=(B // Bb,),
        in_specs=[pl.BlockSpec((Bb, T, D), lambda i: (i, 0, 0)),
                  pl.BlockSpec((Bb, T, 1), lambda i: (i, 0, 0)),
                  _const_spec(self_w.shape), _const_spec(self_b.shape),
                  _const_spec(cls_w.shape), _const_spec(cls_b.shape)],
        out_specs=(pl.BlockSpec((Bb, T, 1), lambda i: (i, 0, 0)),
                   pl.BlockSpec((Bb, CLS_PAD), lambda i: (i, 0))),
        compiler_params=pltpu.CompilerParams(
            dimension_semantics=("parallel",),
            vmem_limit_bytes=_VMEM_LIMIT_BYTES),
    )(features, pool_bias, self_w, self_b, cls_w, cls_b)


# ----------------------------------------------------------------------------
# model pieces (glue in plain JAX, hot paths in the kernels above)
# ----------------------------------------------------------------------------
def multi_head_attention(x2d, lp, attn_bias, B, T):
    D = MODEL_DIM
    dph = D // NUM_HEADS
    # fused QKV projection straight to bf16 (attention scale folded into the Q slice at init)
    qkv = _row_call(_linear_kernel, [x2d], [lp["wqkv"], lp["bqkv"]], 3 * D,
                    out_dtype=jnp.bfloat16)
    q, k, v = jnp.split(qkv, 3, axis=-1)
    # replicate torch's raw .view(B*H, -1, dph) (flat row-major reshape per batch element)
    qh = q.reshape(B * NUM_HEADS, T, dph)
    kh = k.reshape(B * NUM_HEADS, T, dph)
    vh = v.reshape(B * NUM_HEADS, T, dph)
    ctx = attention(qh, kh, vh, attn_bias)      # (B*H, T, dph) bf16
    ctx2d = ctx.reshape(B * T, D)
    return _row_call(_proj_res_ln_kernel, [ctx2d, x2d],
                     [lp["wf"], lp["bf"], lp["ln1_g"], lp["ln1_b"]], D)


def feed_forward(x2d, lp):
    return _row_call(_ffn_res_ln_kernel, [x2d],
                     [lp["w1"], lp["b1"], lp["w2"], lp["b2"], lp["ln2_g"], lp["ln2_b"]],
                     MODEL_DIM)


def encoder_layer(x2d, lp, attn_bias, B, T):
    return feed_forward(multi_head_attention(x2d, lp, attn_bias, B, T), lp)


def positional_encoding_table(d_model, max_seq_len):
    pe = np.array([[pos / np.power(10000, 2.0 * (j // 2) / d_model)
                    for j in range(d_model)] for pos in range(max_seq_len)])
    pe[:, 0::2] = np.sin(pe[:, 0::2])
    pe[:, 1::2] = np.cos(pe[:, 1::2])
    pe = np.concatenate([np.zeros((1, d_model)), pe], axis=0)
    return jnp.asarray(pe, dtype=jnp.float32)


# ----------------------------------------------------------------------------
# deterministic parameter init
# ----------------------------------------------------------------------------
def _uniform(key, shape, bound):
    return jax.random.uniform(key, shape, jnp.float32, -bound, bound)


def init_linear(key, fan_in, fan_out):
    k1, k2 = jax.random.split(key)
    bound = 1.0 / np.sqrt(fan_in)
    return _uniform(k1, (fan_in, fan_out), bound), _uniform(k2, (1, fan_out), bound)


def init_params(key, n_diagnosis_codes, num_layers=1):
    vocab_size = n_diagnosis_codes + 1            # EncoderNew vocab_size
    V1 = vocab_size + 1                           # embedding rows
    D = MODEL_DIM
    keys = iter(jax.random.split(key, 32 + 8 * num_layers))
    p = {}
    # bf16 code-embedding table: halves the dominant DMA of the visit-embed kernel
    p["pre_embedding"] = _uniform(next(keys), (V1, D), 1.0 / np.sqrt(D)).astype(jnp.bfloat16)
    emb = _uniform(next(keys), (V1, D), 1.0 / np.sqrt(D))
    p["embedding"] = emb.at[V1 - 1].set(0.0)      # padding_idx=-1 -> last row zeroed
    p["target_embedding"] = _uniform(next(keys), (1, D), 1.0 / np.sqrt(D))
    p["bias_embedding"] = _uniform(next(keys), (1, D), 1.0 / np.sqrt(vocab_size))
    w1, b1 = init_linear(next(keys), 2 * D, D)
    p["cs_w1"], p["cs_b1"] = w1.astype(jnp.bfloat16), b1
    w2, b2 = init_linear(next(keys), D, 2)
    p["cs_w2"] = jnp.pad(w2, ((0, 0), (0, CLS_PAD - 2))).astype(jnp.bfloat16)
    p["cs_b2"] = jnp.pad(b2, ((0, 0), (0, CLS_PAD - 2)))
    p["sel_w"], p["sel_b"] = init_linear(next(keys), 1, 64)
    tw, tb = init_linear(next(keys), 64, D)
    p["time_w"], p["time_b"] = tw.astype(jnp.bfloat16), tb
    p["pos_table"] = positional_encoding_table(D, MAX_SEQ_LEN)
    p["quiry_w"], p["quiry_b"] = init_linear(next(keys), D, 64)
    w_self, b_self = init_linear(next(keys), D, 1)
    p["self_w"] = w_self[:, 0].reshape(1, 1, D)
    p["self_b"] = b_self.reshape(1, 1, 1)
    wc, bc = init_linear(next(keys), D, 2)
    p["cls_w"] = jnp.pad(wc, ((0, 0), (0, CLS_PAD - 2))).astype(jnp.bfloat16)
    p["cls_b"] = jnp.pad(bc, ((0, 0), (0, CLS_PAD - 2)))
    dph = D // NUM_HEADS
    scale = float((dph // NUM_HEADS) ** (-0.5))   # reference's (64 // 4) ** -0.5 = 0.25
    layers = []
    for _ in range(num_layers):
        lp = {}
        wq, bq = init_linear(next(keys), D, D)
        wk, bk = init_linear(next(keys), D, D)
        wv, bv = init_linear(next(keys), D, D)
        # fold the attention scale into the Q projection (one-time, host side)
        lp["wqkv"] = jnp.concatenate([wq * scale, wk, wv], axis=1).astype(jnp.bfloat16)
        lp["bqkv"] = jnp.concatenate([bq * scale, bk, bv], axis=1)
        wf, bf = init_linear(next(keys), D, D)
        lp["wf"], lp["bf"] = wf.astype(jnp.bfloat16), bf
        lp["ln1_g"] = jnp.ones((1, D), jnp.float32)
        lp["ln1_b"] = jnp.zeros((1, D), jnp.float32)
        w1_, b1_ = init_linear(next(keys), D, FFN_DIM)
        w2_, b2_ = init_linear(next(keys), FFN_DIM, D)
        lp["w1"], lp["b1"] = w1_.astype(jnp.bfloat16), b1_
        lp["w2"], lp["b2"] = w2_.astype(jnp.bfloat16), b2_
        lp["ln2_g"] = jnp.ones((1, D), jnp.float32)
        lp["ln2_b"] = jnp.zeros((1, D), jnp.float32)
        layers.append(lp)
    p["layers"] = layers
    return p


# ----------------------------------------------------------------------------
# full forward pass (TransformerTimeEmb.forward) -- fully jittable
# ----------------------------------------------------------------------------
def transformer_time_emb_forward(params, diagnosis_codes, mask, mask_final, mask_code,
                                 seq_time_step, lengths, labels, gumbel_key):
    B, T, C = diagnosis_codes.shape
    D = MODEL_DIM
    BT = B * T
    V1 = params["embedding"].shape[0]
    vocab_size = V1 - 1

    # --- PositionalEncoding.forward: pos indices via iota (no host loop / host sync) ---
    tpos = jax.lax.broadcasted_iota(jnp.int32, (B, T), 1)
    ind_pos = jnp.where(tpos < lengths.astype(jnp.int32)[:, None], tpos + 1, 0)   # (B,T)
    output_pos = params["pos_table"][ind_pos]                                     # (B,T,D)
    # key-padding mask: padding_mask(ind_pos, ind_pos) depends only on the key index
    pad_k = (ind_pos == 0).astype(jnp.float32)                                    # (B,T)
    # additive bias replicating torch mask.repeat(H,1,1) over raw-.view bmm groups:
    # group g = b*H + h uses pad_k[g % B]
    attn_bias = (jnp.tile(pad_k, (NUM_HEADS, 1)) * NEG_INF).reshape(B * NUM_HEADS, 1, T)

    # --- EncoderNew: gumbel code selection (hard one-hot forward value) ---
    cat_features = jnp.concatenate(
        [params["embedding"],
         jnp.broadcast_to(params["target_embedding"][0], (V1, D))], axis=-1)      # (V1, 2D)
    p_logits = _row_call(_code_select_kernel, [cat_features],
                         [params["cs_w1"], params["cs_b1"],
                          params["cs_w2"], params["cs_b2"]], CLS_PAD)[:, :2]
    logp = jax.nn.log_softmax(p_logits, axis=-1)
    u = jax.random.uniform(gumbel_key, (V1, 2), jnp.float32, 1e-6, 1.0 - 1e-6)
    hard_idx = jnp.argmax(logp - jnp.log(-jnp.log(u)), axis=-1)                   # hard=True
    p0 = (hard_idx == 0).astype(jnp.float32).at[vocab_size].set(0.0)              # scatter 0 at pad
    p_mask = p0[diagnosis_codes]                                                  # (B,T,C)

    # combined per-code mask (mask_code * p_mask pre-multiplied once)
    code_mask = (mask_code.astype(jnp.float32) * p_mask).reshape(BT, C)

    # --- visit embedding + time feature + bias + positional embedding (fused kernel) ---
    emb = params["pre_embedding"][diagnosis_codes].reshape(BT, C, D)              # bf16 gather
    t = seq_time_step.astype(jnp.float32).reshape(BT, 1)
    output = _row_call(_visit_embed_kernel,
                       [emb, code_mask, t, output_pos.reshape(BT, D)],
                       [params["sel_w"], params["sel_b"],
                        params["time_w"], params["time_b"],
                        params["bias_embedding"]], D)                             # (BT, D)

    # --- transformer encoder layers ---
    for lp in params["layers"]:
        output = encoder_layer(output, lp, attn_bias, B, T)
    features = output.reshape(B, T, D)

    # --- final query (computed but unused downstream, as in the reference; DCE'd under jit) ---
    mask_final_f = mask_final.astype(jnp.float32).reshape(B, T, 1)
    final_statues = jnp.sum(features * mask_final_f, axis=1)                      # (B, D)
    _quiryes = jnp.maximum(final_statues @ params["quiry_w"] + params["quiry_b"], 0.0)

    # --- self-attention pooling + classification ---
    pool_bias = ((1.0 - mask.astype(jnp.float32)) * NEG_INF).reshape(B, T, 1)     # additive
    self_weight, preds_pad = pool_classify(features, pool_bias,
                                           params["self_w"], params["self_b"],
                                           params["cls_w"], params["cls_b"])
    predictions = preds_pad[:, :2]
    return predictions, labels.astype(jnp.int32), self_weight


# ----------------------------------------------------------------------------
if __name__ == "__main__":
    key = jax.random.PRNGKey(0)
    k_param, k_codes, k_time, k_gumbel = jax.random.split(key, 4)

    n_diagnosis_codes = 10
    params = init_params(k_param, n_diagnosis_codes, num_layers=1)

    # small padded batch: B=2 patients, T=8 visits (max length == T), C=4 codes/visit
    B, T, C = 2, 8, 4
    lengths = np.array([8, 5], dtype=np.int32)
    pad_code = n_diagnosis_codes + 1                 # = vocab_size; zeroed by scatter in p_mask
    codes = np.array(jax.random.randint(k_codes, (B, T, C), 0, n_diagnosis_codes + 1),
                     dtype=np.int32)                 # np.array -> writable host copy
    seq_time = np.array(jax.random.uniform(k_time, (B, T), jnp.float32, 0.0, 365.0),
                        dtype=np.float32)
    mask = np.zeros((B, T), np.float32)
    mask_code = np.zeros((B, T, C), np.float32)
    mask_final = np.zeros((B, T), np.float32)
    for b in range(B):
        L = int(lengths[b])
        mask[b, :L] = 1.0
        mask_code[b, :L, :] = 1.0
        mask_final[b, L - 1] = 1.0
        codes[b, L:, :] = pad_code
        seq_time[b, L:] = 0.0
    labels = np.array([0, 1], dtype=np.int32)

    fwd = jax.jit(transformer_time_emb_forward)
    preds, out_labels, self_weight = fwd(
        params,
        jnp.asarray(codes), jnp.asarray(mask), jnp.asarray(mask_final),
        jnp.asarray(mask_code), jnp.asarray(seq_time), jnp.asarray(lengths),
        jnp.asarray(labels), k_gumbel)
    jax.block_until_ready((preds, out_labels, self_weight))

    assert preds.shape == (B, 2)
    assert self_weight.shape == (B, T, 1)
    assert out_labels.shape == (B,)
    assert np.all(np.isfinite(np.asarray(preds)))
    # approx-reciprocal softmax: sums are ~1 within the EUP approximation error
    assert np.allclose(np.asarray(self_weight).sum(axis=1), 1.0, atol=1e-2)
    print("KERNEL_OK")
</pallas_src>

<mosaic_0001>
module attributes {stable_mosaic.version = 11 : i64} {
  func.func @_code_select_kernel(%arg0: i32, %arg1: memref<12x512xf32, #tpu.memory_space<vmem>>, %arg2: memref<512x256xbf16, #tpu.memory_space<vmem>>, %arg3: memref<1x256xf32, #tpu.memory_space<vmem>>, %arg4: memref<256x128xbf16, #tpu.memory_space<vmem>>, %arg5: memref<1x128xf32, #tpu.memory_space<vmem>>, %arg6: memref<12x128xf32, #tpu.memory_space<vmem>>) attributes {dimension_semantics = [#tpu.dimension_semantics<parallel>], iteration_bounds = array<i64: 1>, scalar_prefetch = 0 : i64, scratch_operands = 0 : i64, tpu.core_type = #tpu.core_type<tc>, window_params = [{transform_indices = @transform_0, window_bounds = array<i64: 12, 512>}, {pipeline_mode = #tpu.pipeline_mode<synchronous>, transform_indices = @transform_1, window_bounds = array<i64: 512, 256>}, {pipeline_mode = #tpu.pipeline_mode<synchronous>, transform_indices = @transform_2, window_bounds = array<i64: 1, 256>}, {pipeline_mode = #tpu.pipeline_mode<synchronous>, transform_indices = @transform_3, window_bounds = array<i64: 256, 128>}, {pipeline_mode = #tpu.pipeline_mode<synchronous>, transform_indices = @transform_4, window_bounds = array<i64: 1, 128>}, {transform_indices = @transform_5, window_bounds = array<i64: 12, 128>}]} {
    %c0 = arith.constant 0 : index
    %c0_0 = arith.constant 0 : index
    %0 = vector.load %arg1[%c0, %c0_0] : memref<12x512xf32, #tpu.memory_space<vmem>>, vector<12x512xf32>
    %1 = arith.truncf %0 : vector<12x512xf32> to vector<12x512xbf16>
    %c0_1 = arith.constant 0 : index
    %c0_2 = arith.constant 0 : index
    %2 = vector.load %arg2[%c0_1, %c0_2] : memref<512x256xbf16, #tpu.memory_space<vmem>>, vector<512x256xbf16>
    %cst = arith.constant dense<0.000000e+00> : vector<12x256xf32>
    %3 = tpu.matmul %1, %2, %cst {dimension_numbers = #tpu.dot_dimension_numbers<[1], [0], [0], [1], [0, 0, 1, 1], [], []>} : vector<12x512xbf16>, vector<512x256xbf16>, vector<12x256xf32> -> vector<12x256xf32>
    %c0_3 = arith.constant 0 : index
    %c0_4 = arith.constant 0 : index
    %4 = vector.load %arg3[%c0_3, %c0_4] : memref<1x256xf32, #tpu.memory_space<vmem>>, vector<1x256xf32>
    %5 = vector.broadcast %4 : vector<1x256xf32> to vector<12x256xf32>
    %6 = arith.addf %3, %5 : vector<12x256xf32>
    %7 = math.tanh %6 : vector<12x256xf32>
    %8 = arith.truncf %7 : vector<12x256xf32> to vector<12x256xbf16>
    %c0_5 = arith.constant 0 : index
    %c0_6 = arith.constant 0 : index
    %9 = vector.load %arg4[%c0_5, %c0_6] : memref<256x128xbf16, #tpu.memory_space<vmem>>, vector<256x128xbf16>
    %cst_7 = arith.constant dense<0.000000e+00> : vector<12x128xf32>
    %10 = tpu.matmul %8, %9, %cst_7 {dimension_numbers = #tpu.dot_dimension_numbers<[1], [0], [0], [1], [0, 0, 1, 1], [], []>} : vector<12x256xbf16>, vector<256x128xbf16>, vector<12x128xf32> -> vector<12x128xf32>
    %c0_8 = arith.constant 0 : index
    %c0_9 = arith.constant 0 : index
    %11 = vector.load %arg5[%c0_8, %c0_9] : memref<1x128xf32, #tpu.memory_space<vmem>>, vector<1x128xf32>
    %12 = vector.broadcast %11 : vector<1x128xf32> to vector<12x128xf32>
    %13 = arith.addf %10, %12 : vector<12x128xf32>
    %c0_10 = arith.constant 0 : index
    %c0_11 = arith.constant 0 : index
    %14 = vector.load %arg6[%c0_10, %c0_11] : memref<12x128xf32, #tpu.memory_space<vmem>>, vector<12x128xf32>
    tpu.vector_store %arg6[%c0_10, %c0_11], %13 {strides = array<i32>} : memref<12x128xf32, #tpu.memory_space<vmem>>, vector<12x128xf32>,
    return
  }
  func.func @transform_0(%arg0: i32) -> (i32, i32) {
    %c0_i32 = arith.constant 0 : i32
    %c0_i32_0 = arith.constant 0 : i32
    return %arg0, %c0_i32 : i32, i32
  }
  func.func @transform_1(%arg0: i32) -> (i32, i32) {
    %c0_i32 = arith.constant 0 : i32
    %c0_i32_0 = arith.constant 0 : i32
    %c0_i32_1 = arith.constant 0 : i32
    return %c0_i32, %c0_i32_0 : i32, i32
  }
  func.func @transform_2(%arg0: i32) -> (i32, i32) {
    %c0_i32 = arith.constant 0 : i32
    %c0_i32_0 = arith.constant 0 : i32
    %c0_i32_1 = arith.constant 0 : i32
    return %c0_i32, %c0_i32_0 : i32, i32
  }
  func.func @transform_3(%arg0: i32) -> (i32, i32) {
    %c0_i32 = arith.constant 0 : i32
    %c0_i32_0 = arith.constant 0 : i32
    %c0_i32_1 = arith.constant 0 : i32
    return %c0_i32, %c0_i32_0 : i32, i32
  }
  func.func @transform_4(%arg0: i32) -> (i32, i32) {
    %c0_i32 = arith.constant 0 : i32
    %c0_i32_0 = arith.constant 0 : i32
    %c0_i32_1 = arith.constant 0 : i32
    return %c0_i32, %c0_i32_0 : i32, i32
  }
  func.func @transform_5(%arg0: i32) -> (i32, i32) {
    %c0_i32 = arith.constant 0 : i32
    %c0_i32_0 = arith.constant 0 : i32
    return %arg0, %c0_i32 : i32, i32
  }
}

module attributes {stable_mosaic.version = 11 : i64} {
  func.func @_visit_embed_kernel(%arg0: i32, %arg1: memref<16x4x256xbf16, #tpu.memory_space<vmem>>, %arg2: memref<16x4xf32, #tpu.memory_space<vmem>>, %arg3: memref<16x1xf32, #tpu.memory_space<vmem>>, %arg4: memref<16x256xf32, #tpu.memory_space<vmem>>, %arg5: memref<1x64xf32, #tpu.memory_space<vmem>>, %arg6: memref<1x64xf32, #tpu.memory_space<vmem>>, %arg7: memref<64x256xbf16, #tpu.memory_space<vmem>>, %arg8: memref<1x256xf32, #tpu.memory_space<vmem>>, %arg9: memref<1x256xf32, #tpu.memory_space<vmem>>, %arg10: memref<16x256xf32, #tpu.memory_space<vmem>>) attributes {dimension_semantics = [#tpu.dimension_semantics<parallel>], iteration_bounds = array<i64: 1>, scalar_prefetch = 0 : i64, scratch_operands = 0 : i64, tpu.core_type = #tpu.core_type<tc>, window_params = [{transform_indices = @transform_0, window_bounds = array<i64: 16, 4, 256>}, {transform_indices = @transform_1, window_bounds = array<i64: 16, 4>}, {transform_indices = @transform_2, window_bounds = array<i64: 16, 1>}, {transform_indices = @transform_3, window_bounds = array<i64: 16, 256>}, {pipeline_mode = #tpu.pipeline_mode<synchronous>, transform_indices = @transform_4, window_bounds = array<i64: 1, 64>}, {pipeline_mode = #tpu.pipeline_mode<synchronous>, transform_indices = @transform_5, window_bounds = array<i64: 1, 64>}, {pipeline_mode = #tpu.pipeline_mode<synchronous>, transform_indices = @transform_6, window_bounds = array<i64: 64, 256>}, {pipeline_mode = #tpu.pipeline_mode<synchronous>, transform_indices = @transform_7, window_bounds = array<i64: 1, 256>}, {pipeline_mode = #tpu.pipeline_mode<synchronous>, transform_indices = @transform_8, window_bounds = array<i64: 1, 256>}, {transform_indices = @transform_9, window_bounds = array<i64: 16, 256>}]} {
    %c0 = arith.constant 0 : index
    %c0_0 = arith.constant 0 : index
    %c0_1 = arith.constant 0 : index
    %0 = vector.load %arg1[%c0, %c0_0, %c0_1] : memref<16x4x256xbf16, #tpu.memory_space<vmem>>, vector<16x1x256xbf16>
    %1 = vector.shape_cast %0 : vector<16x1x256xbf16> to vector<16x256xbf16>
    %2 = arith.extf %1 : vector<16x256xbf16> to vector<16x256xf32>
    %c0_2 = arith.constant 0 : index
    %c0_3 = arith.constant 0 : index
    %3 = vector.load %arg2[%c0_2, %c0_3] : memref<16x4xf32, #tpu.memory_space<vmem>>, vector<16x1xf32>
    %4 = vector.broadcast %3 : vector<16x1xf32> to vector<16x256xf32>
    %5 = arith.mulf %2, %4 : vector<16x256xf32>
    %c0_4 = arith.constant 0 : index
    %c1 = arith.constant 1 : index
    %c0_5 = arith.constant 0 : index
    %6 = vector.load %arg1[%c0_4, %c1, %c0_5] : memref<16x4x256xbf16, #tpu.memory_space<vmem>>, vector<16x1x256xbf16>
    %7 = vector.shape_cast %6 : vector<16x1x256xbf16> to vector<16x256xbf16>
    %8 = arith.extf %7 : vector<16x256xbf16> to vector<16x256xf32>
    %c0_6 = arith.constant 0 : index
    %c1_7 = arith.constant 1 : index
    %9 = vector.load %arg2[%c0_6, %c1_7] : memref<16x4xf32, #tpu.memory_space<vmem>>, vector<16x1xf32>
    %10 = vector.broadcast %9 : vector<16x1xf32> to vector<16x256xf32>
    %11 = arith.mulf %8, %10 : vector<16x256xf32>
    %12 = arith.addf %5, %11 : vector<16x256xf32>
    %c0_8 = arith.constant 0 : index
    %c2 = arith.constant 2 : index
    %c0_9 = arith.constant 0 : index
    %13 = vector.load %arg1[%c0_8, %c2, %c0_9] : memref<16x4x256xbf16, #tpu.memory_space<vmem>>, vector<16x1x256xbf16>
    %14 = vector.shape_cast %13 : vector<16x1x256xbf16> to vector<16x256xbf16>
    %15 = arith.extf %14 : vector<16x256xbf16> to vector<16x256xf32>
    %c0_10 = arith.constant 0 : index
    %c2_11 = arith.constant 2 : index
    %16 = vector.load %arg2[%c0_10, %c2_11] : memref<16x4xf32, #tpu.memory_space<vmem>>, vector<16x1xf32>
    %17 = vector.broadcast %16 : vector<16x1xf32> to vector<16x256xf32>
    %18 = arith.mulf %15, %17 : vector<16x256xf32>
    %19 = arith.addf %12, %18 : vector<16x256xf32>
    %c0_12 = arith.constant 0 : index
    %c3 = arith.constant 3 : index
    %c0_13 = arith.constant 0 : index
    %20 = vector.load %arg1[%c0_12, %c3, %c0_13] : memref<16x4x256xbf16, #tpu.memory_space<vmem>>, vector<16x1x256xbf16>
    %21 = vector.shape_cast %20 : vector<16x1x256xbf16> to vector<16x256xbf16>
    %22 = arith.extf %21 : vector<16x256xbf16> to vector<16x256xf32>
    %c0_14 = arith.constant 0 : index
    %c3_15 = arith.constant 3 : index
    %23 = vector.load %arg2[%c0_14, %c3_15] : memref<16x4xf32, #tpu.memory_space<vmem>>, vector<16x1xf32>
    %24 = vector.broadcast %23 : vector<16x1xf32> to vector<16x256xf32>
    %25 = arith.mulf %22, %24 : vector<16x256xf32>
    %26 = arith.addf %19, %25 : vector<16x256xf32>
    %c0_16 = arith.constant 0 : index
    %c0_17 = arith.constant 0 : index
    %27 = vector.load %arg3[%c0_16, %c0_17] : memref<16x1xf32, #tpu.memory_space<vmem>>, vector<16x1xf32>
    %cst = arith.constant 0.00555555569 : f32
    %28 = vector.broadcast %cst : f32 to vector<16x1xf32>
    %29 = arith.mulf %27, %28 : vector<16x1xf32>
    %c0_18 = arith.constant 0 : index
    %c0_19 = arith.constant 0 : index
    %30 = vector.load %arg5[%c0_18, %c0_19] : memref<1x64xf32, #tpu.memory_space<vmem>>, vector<1x64xf32>
    %31 = vector.broadcast %29 : vector<16x1xf32> to vector<16x64xf32>
    %32 = vector.broadcast %30 : vector<1x64xf32> to vector<16x64xf32>
    %33 = arith.mulf %31, %32 : vector<16x64xf32>
    %c0_20 = arith.constant 0 : index
    %c0_21 = arith.constant 0 : index
    %34 = vector.load %arg6[%c0_20, %c0_21] : memref<1x64xf32, #tpu.memory_space<vmem>>, vector<1x64xf32>
    %35 = vector.broadcast %34 : vector<1x64xf32> to vector<16x64xf32>
    %36 = arith.addf %33, %35 : vector<16x64xf32>
    %37 = arith.mulf %36, %36 : vector<16x64xf32>
    %38 = math.tanh %37 : vector<16x64xf32>
    %cst_22 = arith.constant 1.000000e+00 : f32
    %39 = vector.broadcast %cst_22 : f32 to vector<16x64xf32>
    %40 = arith.subf %39, %38 : vector<16x64xf32>
    %41 = arith.truncf %40 : vector<16x64xf32> to vector<16x64xbf16>
    %c0_23 = arith.constant 0 : index
    %c0_24 = arith.constant 0 : index
    %42 = vector.load %arg7[%c0_23, %c0_24] : memref<64x256xbf16, #tpu.memory_space<vmem>>, vector<64x256xbf16>
    %cst_25 = arith.constant dense<0.000000e+00> : vector<16x256xf32>
    %43 = tpu.matmul %41, %42, %cst_25 {dimension_numbers = #tpu.dot_dimension_numbers<[1], [0], [0], [1], [0, 0, 1, 1], [], []>} : vector<16x64xbf16>, vector<64x256xbf16>, vector<16x256xf32> -> vector<16x256xf32>
    %c0_26 = arith.constant 0 : index
    %c0_27 = arith.constant 0 : index
    %44 = vector.load %arg8[%c0_26, %c0_27] : memref<1x256xf32, #tpu.memory_space<vmem>>, vector<1x256xf32>
    %45 = vector.broadcast %44 : vector<1x256xf32> to vector<16x256xf32>
    %46 = arith.addf %43, %45 : vector<16x256xf32>
    %c0_28 = arith.constant 0 : index
    %c0_29 = arith.constant 0 : index
    %47 = vector.load %arg9[%c0_28, %c0_29] : memref<1x256xf32, #tpu.memory_space<vmem>>, vector<1x256xf32>
    %48 = vector.broadcast %47 : vector<1x256xf32> to vector<16x256xf32>
    %49 = arith.addf %26, %48 : vector<16x256xf32>
    %50 = arith.addf %49, %46 : vector<16x256xf32>
    %c0_30 = arith.constant 0 : index
    %c0_31 = arith.constant 0 : index
    %51 = vector.load %arg4[%c0_30, %c0_31] : memref<16x256xf32, #tpu.memory_space<vmem>>, vector<16x256xf32>
    %52 = arith.addf %50, %51 : vector<16x256xf32>
    %c0_32 = arith.constant 0 : index
    %c0_33 = arith.constant 0 : index
    %53 = vector.load %arg10[%c0_32, %c0_33] : memref<16x256xf32, #tpu.memory_space<vmem>>, vector<16x256xf32>
    tpu.vector_store %arg10[%c0_32, %c0_33], %52 {strides = array<i32>} : memref<16x256xf32, #tpu.memory_space<vmem>>, vector<16x256xf32>,
    return
  }
  func.func @transform_0(%arg0: i32) -> (i32, i32, i32) {
    %c0_i32 = arith.constant 0 : i32
    %c0_i32_0 = arith.constant 0 : i32
    %c0_i32_1 = arith.constant 0 : i32
    return %arg0, %c0_i32, %c0_i32_0 : i32, i32, i32
  }
  func.func @transform_1(%arg0: i32) -> (i32, i32) {
    %c0_i32 = arith.constant 0 : i32
    %c0_i32_0 = arith.constant 0 : i32
    return %arg0, %c0_i32 : i32, i32
  }
  func.func @transform_2(%arg0: i32) -> (i32, i32) {
    %c0_i32 = arith.constant 0 : i32
    %c0_i32_0 = arith.constant 0 : i32
    return %arg0, %c0_i32 : i32, i32
  }
  func.func @transform_3(%arg0: i32) -> (i32, i32) {
    %c0_i32 = arith.constant 0 : i32
    %c0_i32_0 = arith.constant 0 : i32
    return %arg0, %c0_i32 : i32, i32
  }
  func.func @transform_4(%arg0: i32) -> (i32, i32) {
    %c0_i32 = arith.constant 0 : i32
    %c0_i32_0 = arith.constant 0 : i32
    %c0_i32_1 = arith.constant 0 : i32
    return %c0_i32, %c0_i32_0 : i32, i32
  }
  func.func @transform_5(%arg0: i32) -> (i32, i32) {
    %c0_i32 = arith.constant 0 : i32
    %c0_i32_0 = arith.constant 0 : i32
    %c0_i32_1 = arith.constant 0 : i32
    return %c0_i32, %c0_i32_0 : i32, i32
  }
  func.func @transform_6(%arg0: i32) -> (i32, i32) {
    %c0_i32 = arith.constant 0 : i32
    %c0_i32_0 = arith.constant 0 : i32
    %c0_i32_1 = arith.constant 0 : i32
    return %c0_i32, %c0_i32_0 : i32, i32
  }
  func.func @transform_7(%arg0: i32) -> (i32, i32) {
    %c0_i32 = arith.constant 0 : i32
    %c0_i32_0 = arith.constant 0 : i32
    %c0_i32_1 = arith.constant 0 : i32
    return %c0_i32, %c0_i32_0 : i32, i32
  }
  func.func @transform_8(%arg0: i32) -> (i32, i32) {
    %c0_i32 = arith.constant 0 : i32
    %c0_i32_0 = arith.constant 0 : i32
    %c0_i32_1 = arith.constant 0 : i32
    return %c0_i32, %c0_i32_0 : i32, i32
  }
  func.func @transform_9(%arg0: i32) -> (i32, i32) {
    %c0_i32 = arith.constant 0 : i32
    %c0_i32_0 = arith.constant 0 : i32
    return %arg0, %c0_i32 : i32, i32
  }
}

module attributes {stable_mosaic.version = 11 : i64} {
  func.func @_linear_kernel(%arg0: i32, %arg1: memref<16x256xf32, #tpu.memory_space<vmem>>, %arg2: memref<256x768xbf16, #tpu.memory_space<vmem>>, %arg3: memref<1x768xf32, #tpu.memory_space<vmem>>, %arg4: memref<16x768xbf16, #tpu.memory_space<vmem>>) attributes {dimension_semantics = [#tpu.dimension_semantics<parallel>], iteration_bounds = array<i64: 1>, scalar_prefetch = 0 : i64, scratch_operands = 0 : i64, tpu.core_type = #tpu.core_type<tc>, window_params = [{transform_indices = @transform_0, window_bounds = array<i64: 16, 256>}, {pipeline_mode = #tpu.pipeline_mode<synchronous>, transform_indices = @transform_1, window_bounds = array<i64: 256, 768>}, {pipeline_mode = #tpu.pipeline_mode<synchronous>, transform_indices = @transform_2, window_bounds = array<i64: 1, 768>}, {transform_indices = @transform_3, window_bounds = array<i64: 16, 768>}]} {
    %c0 = arith.constant 0 : index
    %c0_0 = arith.constant 0 : index
    %0 = vector.load %arg1[%c0, %c0_0] : memref<16x256xf32, #tpu.memory_space<vmem>>, vector<16x256xf32>
    %1 = arith.truncf %0 : vector<16x256xf32> to vector<16x256xbf16>
    %c0_1 = arith.constant 0 : index
    %c0_2 = arith.constant 0 : index
    %2 = vector.load %arg2[%c0_1, %c0_2] : memref<256x768xbf16, #tpu.memory_space<vmem>>, vector<256x768xbf16>
    %cst = arith.constant dense<0.000000e+00> : vector<16x768xf32>
    %3 = tpu.matmul %1, %2, %cst {dimension_numbers = #tpu.dot_dimension_numbers<[1], [0], [0], [1], [0, 0, 1, 1], [], []>} : vector<16x256xbf16>, vector<256x768xbf16>, vector<16x768xf32> -> vector<16x768xf32>
    %c0_3 = arith.constant 0 : index
    %c0_4 = arith.constant 0 : index
    %4 = vector.load %arg3[%c0_3, %c0_4] : memref<1x768xf32, #tpu.memory_space<vmem>>, vector<1x768xf32>
    %5 = vector.broadcast %4 : vector<1x768xf32> to vector<16x768xf32>
    %6 = arith.addf %3, %5 : vector<16x768xf32>
    %7 = arith.truncf %6 : vector<16x768xf32> to vector<16x768xbf16>
    %c0_5 = arith.constant 0 : index
    %c0_6 = arith.constant 0 : index
    %8 = vector.load %arg4[%c0_5, %c0_6] : memref<16x768xbf16, #tpu.memory_space<vmem>>, vector<16x768xbf16>
    tpu.vector_store %arg4[%c0_5, %c0_6], %7 {strides = array<i32>} : memref<16x768xbf16, #tpu.memory_space<vmem>>, vector<16x768xbf16>,
    return
  }
  func.func @transform_0(%arg0: i32) -> (i32, i32) {
    %c0_i32 = arith.constant 0 : i32
    %c0_i32_0 = arith.constant 0 : i32
    return %arg0, %c0_i32 : i32, i32
  }
  func.func @transform_1(%arg0: i32) -> (i32, i32) {
    %c0_i32 = arith.constant 0 : i32
    %c0_i32_0 = arith.constant 0 : i32
    %c0_i32_1 = arith.constant 0 : i32
    return %c0_i32, %c0_i32_0 : i32, i32
  }
  func.func @transform_2(%arg0: i32) -> (i32, i32) {
    %c0_i32 = arith.constant 0 : i32
    %c0_i32_0 = arith.constant 0 : i32
    %c0_i32_1 = arith.constant 0 : i32
    return %c0_i32, %c0_i32_0 : i32, i32
  }
  func.func @transform_3(%arg0: i32) -> (i32, i32) {
    %c0_i32 = arith.constant 0 : i32
    %c0_i32_0 = arith.constant 0 : i32
    return %arg0, %c0_i32 : i32, i32
  }
}

module attributes {stable_mosaic.version = 11 : i64} {
  func.func @_attention_kernel(%arg0: i32, %arg1: memref<8x8x64xbf16, #tpu.memory_space<vmem>>, %arg2: memref<8x8x64xbf16, #tpu.memory_space<vmem>>, %arg3: memref<8x8x64xbf16, #tpu.memory_space<vmem>>, %arg4: memref<8x1x8xf32, #tpu.memory_space<vmem>>, %arg5: memref<8x8x64xbf16, #tpu.memory_space<vmem>>) attributes {dimension_semantics = [#tpu.dimension_semantics<parallel>], iteration_bounds = array<i64: 1>, scalar_prefetch = 0 : i64, scratch_operands = 0 : i64, tpu.core_type = #tpu.core_type<tc>, window_params = [{transform_indices = @transform_0, window_bounds = array<i64: 8, 8, 64>}, {transform_indices = @transform_1, window_bounds = array<i64: 8, 8, 64>}, {transform_indices = @transform_2, window_bounds = array<i64: 8, 8, 64>}, {transform_indices = @transform_3, window_bounds = array<i64: 8, 1, 8>}, {transform_indices = @transform_4, window_bounds = array<i64: 8, 8, 64>}]} {
    %c0 = arith.constant 0 : index
    %c0_0 = arith.constant 0 : index
    %c0_1 = arith.constant 0 : index
    %0 = vector.load %arg1[%c0, %c0_0, %c0_1] : memref<8x8x64xbf16, #tpu.memory_space<vmem>>, vector<8x8x64xbf16>
    %c0_2 = arith.constant 0 : index
    %c0_3 = arith.constant 0 : index
    %c0_4 = arith.constant 0 : index
    %1 = vector.load %arg2[%c0_2, %c0_3, %c0_4] : memref<8x8x64xbf16, #tpu.memory_space<vmem>>, vector<8x8x64xbf16>
    %c0_5 = arith.constant 0 : index
    %c0_6 = arith.constant 0 : index
    %c0_7 = arith.constant 0 : index
    %2 = vector.load %arg3[%c0_5, %c0_6, %c0_7] : memref<8x8x64xbf16, #tpu.memory_space<vmem>>, vector<8x8x64xbf16>
    "tpu.trace_start"() <{level = 10 : i32, message = "gtd,gsd->gts"}> : () -> ()
    %cst = arith.constant dense<0.000000e+00> : vector<8x8x8xf32>
    %3 = tpu.matmul %0, %1, %cst {dimension_numbers = #tpu.dot_dimension_numbers<[2], [2], [1], [1], [0, 0, 0, 1, 1, 1], [0], [0]>} : vector<8x8x64xbf16>, vector<8x8x64xbf16>, vector<8x8x8xf32> -> vector<8x8x8xf32>
    "tpu.trace_stop"() : () -> ()
    %c0_8 = arith.constant 0 : index
    %c0_9 = arith.constant 0 : index
    %c0_10 = arith.constant 0 : index
    %4 = vector.load %arg4[%c0_8, %c0_9, %c0_10] : memref<8x1x8xf32, #tpu.memory_space<vmem>>, vector<8x1x8xf32>
    %5 = vector.broadcast %4 : vector<8x1x8xf32> to vector<8x8x8xf32>
    %6 = arith.addf %3, %5 : vector<8x8x8xf32>
    %cst_11 = arith.constant dense<0xFF800000> : vector<8x8xf32>
    %7 = vector.multi_reduction <maximumf>, %6, %cst_11 [2] : vector<8x8x8xf32> to vector<8x8xf32>
    %8 = vector.shape_cast %7 : vector<8x8xf32> to vector<8x8x1xf32>
    %9 = vector.broadcast %8 : vector<8x8x1xf32> to vector<8x8x8xf32>
    %10 = arith.subf %6, %9 : vector<8x8x8xf32>
    %11 = math.exp %10 : vector<8x8x8xf32>
    %cst_12 = arith.constant dense<0.000000e+00> : vector<8x8xf32>
    %12 = vector.multi_reduction <add>, %11, %cst_12 [2] : vector<8x8x8xf32> to vector<8x8xf32>
    %13 = vector.shape_cast %12 : vector<8x8xf32> to vector<8x8x1xf32>
    %14 = tpu.reciprocal %13 {approx = true} : vector<8x8x1xf32> -> vector<8x8x1xf32>
    %15 = vector.broadcast %14 : vector<8x8x1xf32> to vector<8x8x8xf32>
    %16 = arith.mulf %11, %15 : vector<8x8x8xf32>
    %17 = arith.truncf %16 : vector<8x8x8xf32> to vector<8x8x8xbf16>
    "tpu.trace_start"() <{level = 10 : i32, message = "gts,gsd->gtd"}> : () -> ()
    %cst_13 = arith.constant dense<0.000000e+00> : vector<8x8x64xf32>
    %18 = tpu.matmul %17, %2, %cst_13 {dimension_numbers = #tpu.dot_dimension_numbers<[2], [1], [1], [2], [0, 0, 0, 1, 1, 2], [0], [0]>} : vector<8x8x8xbf16>, vector<8x8x64xbf16>, vector<8x8x64xf32> -> vector<8x8x64xf32>
    "tpu.trace_stop"() : () -> ()
    %19 = arith.truncf %18 : vector<8x8x64xf32> to vector<8x8x64xbf16>
    %c0_14 = arith.constant 0 : index
    %c0_15 = arith.constant 0 : index
    %c0_16 = arith.constant 0 : index
    %20 = vector.load %arg5[%c0_14, %c0_15, %c0_16] : memref<8x8x64xbf16, #tpu.memory_space<vmem>>, vector<8x8x64xbf16>
    tpu.vector_store %arg5[%c0_14, %c0_15, %c0_16], %19 {strides = array<i32>} : memref<8x8x64xbf16, #tpu.memory_space<vmem>>, vector<8x8x64xbf16>,
    return
  }
  func.func @transform_0(%arg0: i32) -> (i32, i32, i32) {
    %c0_i32 = arith.constant 0 : i32
    %c0_i32_0 = arith.constant 0 : i32
    %c0_i32_1 = arith.constant 0 : i32
    return %arg0, %c0_i32, %c0_i32_0 : i32, i32, i32
  }
  func.func @transform_1(%arg0: i32) -> (i32, i32, i32) {
    %c0_i32 = arith.constant 0 : i32
    %c0_i32_0 = arith.constant 0 : i32
    %c0_i32_1 = arith.constant 0 : i32
    return %arg0, %c0_i32, %c0_i32_0 : i32, i32, i32
  }
  func.func @transform_2(%arg0: i32) -> (i32, i32, i32) {
    %c0_i32 = arith.constant 0 : i32
    %c0_i32_0 = arith.constant 0 : i32
    %c0_i32_1 = arith.constant 0 : i32
    return %arg0, %c0_i32, %c0_i32_0 : i32, i32, i32
  }
  func.func @transform_3(%arg0: i32) -> (i32, i32, i32) {
    %c0_i32 = arith.constant 0 : i32
    %c0_i32_0 = arith.constant 0 : i32
    %c0_i32_1 = arith.constant 0 : i32
    return %arg0, %c0_i32, %c0_i32_0 : i32, i32, i32
  }
  func.func @transform_4(%arg0: i32) -> (i32, i32, i32) {
    %c0_i32 = arith.constant 0 : i32
    %c0_i32_0 = arith.constant 0 : i32
    %c0_i32_1 = arith.constant 0 : i32
    return %arg0, %c0_i32, %c0_i32_0 : i32, i32, i32
  }
}

module attributes {stable_mosaic.version = 11 : i64} {
  func.func @_proj_res_ln_kernel(%arg0: i32, %arg1: memref<16x256xbf16, #tpu.memory_space<vmem>>, %arg2: memref<16x256xf32, #tpu.memory_space<vmem>>, %arg3: memref<256x256xbf16, #tpu.memory_space<vmem>>, %arg4: memref<1x256xf32, #tpu.memory_space<vmem>>, %arg5: memref<1x256xf32, #tpu.memory_space<vmem>>, %arg6: memref<1x256xf32, #tpu.memory_space<vmem>>, %arg7: memref<16x256xf32, #tpu.memory_space<vmem>>) attributes {dimension_semantics = [#tpu.dimension_semantics<parallel>], iteration_bounds = array<i64: 1>, scalar_prefetch = 0 : i64, scratch_operands = 0 : i64, tpu.core_type = #tpu.core_type<tc>, window_params = [{transform_indices = @transform_0, window_bounds = array<i64: 16, 256>}, {transform_indices = @transform_1, window_bounds = array<i64: 16, 256>}, {pipeline_mode = #tpu.pipeline_mode<synchronous>, transform_indices = @transform_2, window_bounds = array<i64: 256, 256>}, {pipeline_mode = #tpu.pipeline_mode<synchronous>, transform_indices = @transform_3, window_bounds = array<i64: 1, 256>}, {pipeline_mode = #tpu.pipeline_mode<synchronous>, transform_indices = @transform_4, window_bounds = array<i64: 1, 256>}, {pipeline_mode = #tpu.pipeline_mode<synchronous>, transform_indices = @transform_5, window_bounds = array<i64: 1, 256>}, {transform_indices = @transform_6, window_bounds = array<i64: 16, 256>}]} {
    %c0 = arith.constant 0 : index
    %c0_0 = arith.constant 0 : index
    %0 = vector.load %arg1[%c0, %c0_0] : memref<16x256xbf16, #tpu.memory_space<vmem>>, vector<16x256xbf16>
    %c0_1 = arith.constant 0 : index
    %c0_2 = arith.constant 0 : index
    %1 = vector.load %arg3[%c0_1, %c0_2] : memref<256x256xbf16, #tpu.memory_space<vmem>>, vector<256x256xbf16>
    %cst = arith.constant dense<0.000000e+00> : vector<16x256xf32>
    %2 = tpu.matmul %0, %1, %cst {dimension_numbers = #tpu.dot_dimension_numbers<[1], [0], [0], [1], [0, 0, 1, 1], [], []>} : vector<16x256xbf16>, vector<256x256xbf16>, vector<16x256xf32> -> vector<16x256xf32>
    %c0_3 = arith.constant 0 : index
    %c0_4 = arith.constant 0 : index
    %3 = vector.load %arg4[%c0_3, %c0_4] : memref<1x256xf32, #tpu.memory_space<vmem>>, vector<1x256xf32>
    %4 = vector.broadcast %3 : vector<1x256xf32> to vector<16x256xf32>
    %5 = arith.addf %2, %4 : vector<16x256xf32>
    %c0_5 = arith.constant 0 : index
    %c0_6 = arith.constant 0 : index
    %6 = vector.load %arg2[%c0_5, %c0_6] : memref<16x256xf32, #tpu.memory_space<vmem>>, vector<16x256xf32>
    %7 = arith.addf %6, %5 : vector<16x256xf32>
    %cst_7 = arith.constant dense<0.000000e+00> : vector<16xf32>
    %8 = vector.multi_reduction <add>, %7, %cst_7 [1] : vector<16x256xf32> to vector<16xf32>
    %9 = vector.shape_cast %8 : vector<16xf32> to vector<16x1xf32>
    %cst_8 = arith.constant 2.560000e+02 : f32
    %10 = vector.broadcast %cst_8 : f32 to vector<16x1xf32>
    %11 = arith.divf %9, %10 : vector<16x1xf32>
    %12 = vector.broadcast %11 : vector<16x1xf32> to vector<16x256xf32>
    %13 = arith.subf %7, %12 : vector<16x256xf32>
    %14 = arith.mulf %13, %13 : vector<16x256xf32>
    %cst_9 = arith.constant dense<0.000000e+00> : vector<16xf32>
    %15 = vector.multi_reduction <add>, %14, %cst_9 [1] : vector<16x256xf32> to vector<16xf32>
    %16 = vector.shape_cast %15 : vector<16xf32> to vector<16x1xf32>
    %cst_10 = arith.constant 2.560000e+02 : f32
    %17 = vector.broadcast %cst_10 : f32 to vector<16x1xf32>
    %18 = arith.divf %16, %17 : vector<16x1xf32>
    %19 = vector.broadcast %11 : vector<16x1xf32> to vector<16x256xf32>
    %20 = arith.subf %7, %19 : vector<16x256xf32>
    %cst_11 = arith.constant 9.99999974E-6 : f32
    %21 = vector.broadcast %cst_11 : f32 to vector<16x1xf32>
    %22 = arith.addf %18, %21 : vector<16x1xf32>
    %23 = math.rsqrt %22 : vector<16x1xf32>
    %24 = vector.broadcast %23 : vector<16x1xf32> to vector<16x256xf32>
    %25 = arith.mulf %20, %24 : vector<16x256xf32>
    %c0_12 = arith.constant 0 : index
    %c0_13 = arith.constant 0 : index
    %26 = vector.load %arg5[%c0_12, %c0_13] : memref<1x256xf32, #tpu.memory_space<vmem>>, vector<1x256xf32>
    %27 = vector.broadcast %26 : vector<1x256xf32> to vector<16x256xf32>
    %28 = arith.mulf %25, %27 : vector<16x256xf32>
    %c0_14 = arith.constant 0 : index
    %c0_15 = arith.constant 0 : index
    %29 = vector.load %arg6[%c0_14, %c0_15] : memref<1x256xf32, #tpu.memory_space<vmem>>, vector<1x256xf32>
    %30 = vector.broadcast %29 : vector<1x256xf32> to vector<16x256xf32>
    %31 = arith.addf %28, %30 : vector<16x256xf32>
    %c0_16 = arith.constant 0 : index
    %c0_17 = arith.constant 0 : index
    %32 = vector.load %arg7[%c0_16, %c0_17] : memref<16x256xf32, #tpu.memory_space<vmem>>, vector<16x256xf32>
    tpu.vector_store %arg7[%c0_16, %c0_17], %31 {strides = array<i32>} : memref<16x256xf32, #tpu.memory_space<vmem>>, vector<16x256xf32>,
    return
  }
  func.func @transform_0(%arg0: i32) -> (i32, i32) {
    %c0_i32 = arith.constant 0 : i32
    %c0_i32_0 = arith.constant 0 : i32
    return %arg0, %c0_i32 : i32, i32
  }
  func.func @transform_1(%arg0: i32) -> (i32, i32) {
    %c0_i32 = arith.constant 0 : i32
    %c0_i32_0 = arith.constant 0 : i32
    return %arg0, %c0_i32 : i32, i32
  }
  func.func @transform_2(%arg0: i32) -> (i32, i32) {
    %c0_i32 = arith.constant 0 : i32
    %c0_i32_0 = arith.constant 0 : i32
    %c0_i32_1 = arith.constant 0 : i32
    return %c0_i32, %c0_i32_0 : i32, i32
  }
  func.func @transform_3(%arg0: i32) -> (i32, i32) {
    %c0_i32 = arith.constant 0 : i32
    %c0_i32_0 = arith.constant 0 : i32
    %c0_i32_1 = arith.constant 0 : i32
    return %c0_i32, %c0_i32_0 : i32, i32
  }
  func.func @transform_4(%arg0: i32) -> (i32, i32) {
    %c0_i32 = arith.constant 0 : i32
    %c0_i32_0 = arith.constant 0 : i32
    %c0_i32_1 = arith.constant 0 : i32
    return %c0_i32, %c0_i32_0 : i32, i32
  }
  func.func @transform_5(%arg0: i32) -> (i32, i32) {
    %c0_i32 = arith.constant 0 : i32
    %c0_i32_0 = arith.constant 0 : i32
    %c0_i32_1 = arith.constant 0 : i32
    return %c0_i32, %c0_i32_0 : i32, i32
  }
  func.func @transform_6(%arg0: i32) -> (i32, i32) {
    %c0_i32 = arith.constant 0 : i32
    %c0_i32_0 = arith.constant 0 : i32
    return %arg0, %c0_i32 : i32, i32
  }
}

module attributes {stable_mosaic.version = 11 : i64} {
  func.func @_pool_classify_kernel(%arg0: i32, %arg1: memref<2x8x256xf32, #tpu.memory_space<vmem>>, %arg2: memref<2x8x1xf32, #tpu.memory_space<vmem>>, %arg3: memref<1x1x256xf32, #tpu.memory_space<vmem>>, %arg4: memref<1x1x1xf32, #tpu.memory_space<vmem>>, %arg5: memref<256x128xbf16, #tpu.memory_space<vmem>>, %arg6: memref<1x128xf32, #tpu.memory_space<vmem>>, %arg7: memref<2x8x1xf32, #tpu.memory_space<vmem>>, %arg8: memref<2x128xf32, #tpu.memory_space<vmem>>) attributes {dimension_semantics = [#tpu.dimension_semantics<parallel>], iteration_bounds = array<i64: 1>, scalar_prefetch = 0 : i64, scratch_operands = 0 : i64, tpu.core_type = #tpu.core_type<tc>, window_params = [{transform_indices = @transform_0, window_bounds = array<i64: 2, 8, 256>}, {transform_indices = @transform_1, window_bounds = array<i64: 2, 8, 1>}, {pipeline_mode = #tpu.pipeline_mode<synchronous>, transform_indices = @transform_2, window_bounds = array<i64: 1, 1, 256>}, {pipeline_mode = #tpu.pipeline_mode<synchronous>, transform_indices = @transform_3, window_bounds = array<i64: 1, 1, 1>}, {pipeline_mode = #tpu.pipeline_mode<synchronous>, transform_indices = @transform_4, window_bounds = array<i64: 256, 128>}, {pipeline_mode = #tpu.pipeline_mode<synchronous>, transform_indices = @transform_5, window_bounds = array<i64: 1, 128>}, {transform_indices = @transform_6, window_bounds = array<i64: 2, 8, 1>}, {transform_indices = @transform_7, window_bounds = array<i64: 2, 128>}]} {
    %c0 = arith.constant 0 : index
    %c0_0 = arith.constant 0 : index
    %c0_1 = arith.constant 0 : index
    %0 = vector.load %arg1[%c0, %c0_0, %c0_1] : memref<2x8x256xf32, #tpu.memory_space<vmem>>, vector<2x8x256xf32>
    %c0_2 = arith.constant 0 : index
    %c0_3 = arith.constant 0 : index
    %c0_4 = arith.constant 0 : index
    %1 = vector.load %arg3[%c0_2, %c0_3, %c0_4] : memref<1x1x256xf32, #tpu.memory_space<vmem>>, vector<1x1x256xf32>
    %2 = vector.broadcast %1 : vector<1x1x256xf32> to vector<2x8x256xf32>
    %3 = arith.mulf %0, %2 : vector<2x8x256xf32>
    %cst = arith.constant dense<0.000000e+00> : vector<2x8xf32>
    %4 = vector.multi_reduction <add>, %3, %cst [2] : vector<2x8x256xf32> to vector<2x8xf32>
    %5 = vector.shape_cast %4 : vector<2x8xf32> to vector<2x8x1xf32>
    %c0_5 = arith.constant 0 : index
    %c0_6 = arith.constant 0 : index
    %c0_7 = arith.constant 0 : index
    %6 = vector.load %arg4[%c0_5, %c0_6, %c0_7] : memref<1x1x1xf32, #tpu.memory_space<vmem>>, vector<1x1x1xf32>
    %7 = vector.broadcast %6 : vector<1x1x1xf32> to vector<2x8x1xf32>
    %8 = arith.addf %5, %7 : vector<2x8x1xf32>
    %c0_8 = arith.constant 0 : index
    %c0_9 = arith.constant 0 : index
    %c0_10 = arith.constant 0 : index
    %9 = vector.load %arg2[%c0_8, %c0_9, %c0_10] : memref<2x8x1xf32, #tpu.memory_space<vmem>>, vector<2x8x1xf32>
    %10 = arith.addf %8, %9 : vector<2x8x1xf32>
    %cst_11 = arith.constant dense<0xFF800000> : vector<2x1xf32>
    %11 = vector.multi_reduction <maximumf>, %10, %cst_11 [1] : vector<2x8x1xf32> to vector<2x1xf32>
    %12 = vector.shape_cast %11 : vector<2x1xf32> to vector<2x1x1xf32>
    %13 = vector.broadcast %12 : vector<2x1x1xf32> to vector<2x8x1xf32>
    %14 = arith.subf %10, %13 : vector<2x8x1xf32>
    %15 = math.exp %14 : vector<2x8x1xf32>
    %cst_12 = arith.constant dense<0.000000e+00> : vector<2x1xf32>
    %16 = vector.multi_reduction <add>, %15, %cst_12 [1] : vector<2x8x1xf32> to vector<2x1xf32>
    %17 = vector.shape_cast %16 : vector<2x1xf32> to vector<2x1x1xf32>
    %18 = tpu.reciprocal %17 {approx = true} : vector<2x1x1xf32> -> vector<2x1x1xf32>
    %19 = vector.broadcast %18 : vector<2x1x1xf32> to vector<2x8x1xf32>
    %20 = arith.mulf %15, %19 : vector<2x8x1xf32>
    %c0_13 = arith.constant 0 : index
    %c0_14 = arith.constant 0 : index
    %c0_15 = arith.constant 0 : index
    %21 = vector.load %arg7[%c0_13, %c0_14, %c0_15] : memref<2x8x1xf32, #tpu.memory_space<vmem>>, vector<2x8x1xf32>
    tpu.vector_store %arg7[%c0_13, %c0_14, %c0_15], %20 {strides = array<i32>} : memref<2x8x1xf32, #tpu.memory_space<vmem>>, vector<2x8x1xf32>,
    %cst_16 = arith.constant dense<0.000000e+00> : vector<2x1xf32>
    %22 = vector.multi_reduction <add>, %20, %cst_16 [1] : vector<2x8x1xf32> to vector<2x1xf32>
    %23 = vector.shape_cast %22 : vector<2x1xf32> to vector<2x1x1xf32>
    %cst_17 = arith.constant 9.99999974E-6 : f32
    %24 = vector.broadcast %cst_17 : f32 to vector<2x1x1xf32>
    %25 = arith.addf %23, %24 : vector<2x1x1xf32>
    %26 = tpu.reciprocal %25 {approx = true} : vector<2x1x1xf32> -> vector<2x1x1xf32>
    %27 = vector.broadcast %26 : vector<2x1x1xf32> to vector<2x8x1xf32>
    %28 = arith.mulf %20, %27 : vector<2x8x1xf32>
    %29 = vector.broadcast %28 : vector<2x8x1xf32> to vector<2x8x256xf32>
    %30 = arith.mulf %0, %29 : vector<2x8x256xf32>
    %cst_18 = arith.constant dense<0.000000e+00> : vector<2x256xf32>
    %31 = vector.multi_reduction <add>, %30, %cst_18 [1] : vector<2x8x256xf32> to vector<2x256xf32>
    %32 = arith.truncf %31 : vector<2x256xf32> to vector<2x256xbf16>
    %c0_19 = arith.constant 0 : index
    %c0_20 = arith.constant 0 : index
    %33 = vector.load %arg5[%c0_19, %c0_20] : memref<256x128xbf16, #tpu.memory_space<vmem>>, vector<256x128xbf16>
    %cst_21 = arith.constant dense<0.000000e+00> : vector<2x128xf32>
    %34 = tpu.matmul %32, %33, %cst_21 {dimension_numbers = #tpu.dot_dimension_numbers<[1], [0], [0], [1], [0, 0, 1, 1], [], []>} : vector<2x256xbf16>, vector<256x128xbf16>, vector<2x128xf32> -> vector<2x128xf32>
    %c0_22 = arith.constant 0 : index
    %c0_23 = arith.constant 0 : index
    %35 = vector.load %arg6[%c0_22, %c0_23] : memref<1x128xf32, #tpu.memory_space<vmem>>, vector<1x128xf32>
    %36 = vector.broadcast %35 : vector<1x128xf32> to vector<2x128xf32>
    %37 = arith.addf %34, %36 : vector<2x128xf32>
    %c0_24 = arith.constant 0 : index
    %c0_25 = arith.constant 0 : index
    %38 = vector.load %arg8[%c0_24, %c0_25] : memref<2x128xf32, #tpu.memory_space<vmem>>, vector<2x128xf32>
    tpu.vector_store %arg8[%c0_24, %c0_25], %37 {strides = array<i32>} : memref<2x128xf32, #tpu.memory_space<vmem>>, vector<2x128xf32>,
    return
  }
  func.func @transform_0(%arg0: i32) -> (i32, i32, i32) {
    %c0_i32 = arith.constant 0 : i32
    %c0_i32_0 = arith.constant 0 : i32
    %c0_i32_1 = arith.constant 0 : i32
    return %arg0, %c0_i32, %c0_i32_0 : i32, i32, i32
  }
  func.func @transform_1(%arg0: i32) -> (i32, i32, i32) {
    %c0_i32 = arith.constant 0 : i32
    %c0_i32_0 = arith.constant 0 : i32
    %c0_i32_1 = arith.constant 0 : i32
    return %arg0, %c0_i32, %c0_i32_0 : i32, i32, i32
  }
  func.func @transform_2(%arg0: i32) -> (i32, i32, i32) {
    %c0_i32 = arith.constant 0 : i32
    %c0_i32_0 = arith.constant 0 : i32
    %c0_i32_1 = arith.constant 0 : i32
    %c0_i32_2 = arith.constant 0 : i32
    return %c0_i32, %c0_i32_0, %c0_i32_1 : i32, i32, i32
  }
  func.func @transform_3(%arg0: i32) -> (i32, i32, i32) {
    %c0_i32 = arith.constant 0 : i32
    %c0_i32_0 = arith.constant 0 : i32
    %c0_i32_1 = arith.constant 0 : i32
    %c0_i32_2 = arith.constant 0 : i32
    return %c0_i32, %c0_i32_0, %c0_i32_1 : i32, i32, i32
  }
  func.func @transform_4(%arg0: i32) -> (i32, i32) {
    %c0_i32 = arith.constant 0 : i32
    %c0_i32_0 = arith.constant 0 : i32
    %c0_i32_1 = arith.constant 0 : i32
    return %c0_i32, %c0_i32_0 : i32, i32
  }
  func.func @transform_5(%arg0: i32) -> (i32, i32) {
    %c0_i32 = arith.constant 0 : i32
    %c0_i32_0 = arith.constant 0 : i32
    %c0_i32_1 = arith.constant 0 : i32
    return %c0_i32, %c0_i32_0 : i32, i32
  }
  func.func @transform_6(%arg0: i32) -> (i32, i32, i32) {
    %c0_i32 = arith.constant 0 : i32
    %c0_i32_0 = arith.constant 0 : i32
    %c0_i32_1 = arith.constant 0 : i32
    return %arg0, %c0_i32, %c0_i32_0 : i32, i32, i32
  }
  func.func @transform_7(%arg0: i32) -> (i32, i32) {
    %c0_i32 = arith.constant 0 : i32
    %c0_i32_0 = arith.constant 0 : i32
    return %arg0, %c0_i32 : i32, i32
  }
}

module attributes {stable_mosaic.version = 11 : i64} {
  func.func @_ffn_res_ln_kernel(%arg0: i32, %arg1: memref<16x256xf32, #tpu.memory_space<vmem>>, %arg2: memref<256x1024xbf16, #tpu.memory_space<vmem>>, %arg3: memref<1x1024xf32, #tpu.memory_space<vmem>>, %arg4: memref<1024x256xbf16, #tpu.memory_space<vmem>>, %arg5: memref<1x256xf32, #tpu.memory_space<vmem>>, %arg6: memref<1x256xf32, #tpu.memory_space<vmem>>, %arg7: memref<1x256xf32, #tpu.memory_space<vmem>>, %arg8: memref<16x256xf32, #tpu.memory_space<vmem>>) attributes {dimension_semantics = [#tpu.dimension_semantics<parallel>], iteration_bounds = array<i64: 1>, scalar_prefetch = 0 : i64, scratch_operands = 0 : i64, tpu.core_type = #tpu.core_type<tc>, window_params = [{transform_indices = @transform_0, window_bounds = array<i64: 16, 256>}, {pipeline_mode = #tpu.pipeline_mode<synchronous>, transform_indices = @transform_1, window_bounds = array<i64: 256, 1024>}, {pipeline_mode = #tpu.pipeline_mode<synchronous>, transform_indices = @transform_2, window_bounds = array<i64: 1, 1024>}, {pipeline_mode = #tpu.pipeline_mode<synchronous>, transform_indices = @transform_3, window_bounds = array<i64: 1024, 256>}, {pipeline_mode = #tpu.pipeline_mode<synchronous>, transform_indices = @transform_4, window_bounds = array<i64: 1, 256>}, {pipeline_mode = #tpu.pipeline_mode<synchronous>, transform_indices = @transform_5, window_bounds = array<i64: 1, 256>}, {pipeline_mode = #tpu.pipeline_mode<synchronous>, transform_indices = @transform_6, window_bounds = array<i64: 1, 256>}, {transform_indices = @transform_7, window_bounds = array<i64: 16, 256>}]} {
    %c0 = arith.constant 0 : index
    %c0_0 = arith.constant 0 : index
    %0 = vector.load %arg1[%c0, %c0_0] : memref<16x256xf32, #tpu.memory_space<vmem>>, vector<16x256xf32>
    %1 = arith.truncf %0 : vector<16x256xf32> to vector<16x256xbf16>
    %c0_1 = arith.constant 0 : index
    %c0_2 = arith.constant 0 : index
    %2 = vector.load %arg2[%c0_1, %c0_2] : memref<256x1024xbf16, #tpu.memory_space<vmem>>, vector<256x1024xbf16>
    %cst = arith.constant dense<0.000000e+00> : vector<16x1024xf32>
    %3 = tpu.matmul %1, %2, %cst {dimension_numbers = #tpu.dot_dimension_numbers<[1], [0], [0], [1], [0, 0, 1, 1], [], []>} : vector<16x256xbf16>, vector<256x1024xbf16>, vector<16x1024xf32> -> vector<16x1024xf32>
    %c0_3 = arith.constant 0 : index
    %c0_4 = arith.constant 0 : index
    %4 = vector.load %arg3[%c0_3, %c0_4] : memref<1x1024xf32, #tpu.memory_space<vmem>>, vector<1x1024xf32>
    %5 = vector.broadcast %4 : vector<1x1024xf32> to vector<16x1024xf32>
    %6 = arith.addf %3, %5 : vector<16x1024xf32>
    %cst_5 = arith.constant 0.000000e+00 : f32
    %7 = vector.broadcast %cst_5 : f32 to vector<16x1024xf32>
    %8 = arith.maximumf %6, %7 : vector<16x1024xf32>
    %9 = arith.truncf %8 : vector<16x1024xf32> to vector<16x1024xbf16>
    %c0_6 = arith.constant 0 : index
    %c0_7 = arith.constant 0 : index
    %10 = vector.load %arg4[%c0_6, %c0_7] : memref<1024x256xbf16, #tpu.memory_space<vmem>>, vector<1024x256xbf16>
    %cst_8 = arith.constant dense<0.000000e+00> : vector<16x256xf32>
    %11 = tpu.matmul %9, %10, %cst_8 {dimension_numbers = #tpu.dot_dimension_numbers<[1], [0], [0], [1], [0, 0, 1, 1], [], []>} : vector<16x1024xbf16>, vector<1024x256xbf16>, vector<16x256xf32> -> vector<16x256xf32>
    %c0_9 = arith.constant 0 : index
    %c0_10 = arith.constant 0 : index
    %12 = vector.load %arg5[%c0_9, %c0_10] : memref<1x256xf32, #tpu.memory_space<vmem>>, vector<1x256xf32>
    %13 = vector.broadcast %12 : vector<1x256xf32> to vector<16x256xf32>
    %14 = arith.addf %11, %13 : vector<16x256xf32>
    %c0_11 = arith.constant 0 : index
    %c0_12 = arith.constant 0 : index
    %15 = vector.load %arg1[%c0_11, %c0_12] : memref<16x256xf32, #tpu.memory_space<vmem>>, vector<16x256xf32>
    %16 = arith.addf %15, %14 : vector<16x256xf32>
    %cst_13 = arith.constant dense<0.000000e+00> : vector<16xf32>
    %17 = vector.multi_reduction <add>, %16, %cst_13 [1] : vector<16x256xf32> to vector<16xf32>
    %18 = vector.shape_cast %17 : vector<16xf32> to vector<16x1xf32>
    %cst_14 = arith.constant 2.560000e+02 : f32
    %19 = vector.broadcast %cst_14 : f32 to vector<16x1xf32>
    %20 = arith.divf %18, %19 : vector<16x1xf32>
    %21 = vector.broadcast %20 : vector<16x1xf32> to vector<16x256xf32>
    %22 = arith.subf %16, %21 : vector<16x256xf32>
    %23 = arith.mulf %22, %22 : vector<16x256xf32>
    %cst_15 = arith.constant dense<0.000000e+00> : vector<16xf32>
    %24 = vector.multi_reduction <add>, %23, %cst_15 [1] : vector<16x256xf32> to vector<16xf32>
    %25 = vector.shape_cast %24 : vector<16xf32> to vector<16x1xf32>
    %cst_16 = arith.constant 2.560000e+02 : f32
    %26 = vector.broadcast %cst_16 : f32 to vector<16x1xf32>
    %27 = arith.divf %25, %26 : vector<16x1xf32>
    %28 = vector.broadcast %20 : vector<16x1xf32> to vector<16x256xf32>
    %29 = arith.subf %16, %28 : vector<16x256xf32>
    %cst_17 = arith.constant 9.99999974E-6 : f32
    %30 = vector.broadcast %cst_17 : f32 to vector<16x1xf32>
    %31 = arith.addf %27, %30 : vector<16x1xf32>
    %32 = math.rsqrt %31 : vector<16x1xf32>
    %33 = vector.broadcast %32 : vector<16x1xf32> to vector<16x256xf32>
    %34 = arith.mulf %29, %33 : vector<16x256xf32>
    %c0_18 = arith.constant 0 : index
    %c0_19 = arith.constant 0 : index
    %35 = vector.load %arg6[%c0_18, %c0_19] : memref<1x256xf32, #tpu.memory_space<vmem>>, vector<1x256xf32>
    %36 = vector.broadcast %35 : vector<1x256xf32> to vector<16x256xf32>
    %37 = arith.mulf %34, %36 : vector<16x256xf32>
    %c0_20 = arith.constant 0 : index
    %c0_21 = arith.constant 0 : index
    %38 = vector.load %arg7[%c0_20, %c0_21] : memref<1x256xf32, #tpu.memory_space<vmem>>, vector<1x256xf32>
    %39 = vector.broadcast %38 : vector<1x256xf32> to vector<16x256xf32>
    %40 = arith.addf %37, %39 : vector<16x256xf32>
    %c0_22 = arith.constant 0 : index
    %c0_23 = arith.constant 0 : index
    %41 = vector.load %arg8[%c0_22, %c0_23] : memref<16x256xf32, #tpu.memory_space<vmem>>, vector<16x256xf32>
    tpu.vector_store %arg8[%c0_22, %c0_23], %40 {strides = array<i32>} : memref<16x256xf32, #tpu.memory_space<vmem>>, vector<16x256xf32>,
    return
  }
  func.func @transform_0(%arg0: i32) -> (i32, i32) {
    %c0_i32 = arith.constant 0 : i32
    %c0_i32_0 = arith.constant 0 : i32
    return %arg0, %c0_i32 : i32, i32
  }
  func.func @transform_1(%arg0: i32) -> (i32, i32) {
    %c0_i32 = arith.constant 0 : i32
    %c0_i32_0 = arith.constant 0 : i32
    %c0_i32_1 = arith.constant 0 : i32
    return %c0_i32, %c0_i32_0 : i32, i32
  }
  func.func @transform_2(%arg0: i32) -> (i32, i32) {
    %c0_i32 = arith.constant 0 : i32
    %c0_i32_0 = arith.constant 0 : i32
    %c0_i32_1 = arith.constant 0 : i32
    return %c0_i32, %c0_i32_0 : i32, i32
  }
  func.func @transform_3(%arg0: i32) -> (i32, i32) {
    %c0_i32 = arith.constant 0 : i32
    %c0_i32_0 = arith.constant 0 : i32
    %c0_i32_1 = arith.constant 0 : i32
    return %c0_i32, %c0_i32_0 : i32, i32
  }
  func.func @transform_4(%arg0: i32) -> (i32, i32) {
    %c0_i32 = arith.constant 0 : i32
    %c0_i32_0 = arith.constant 0 : i32
    %c0_i32_1 = arith.constant 0 : i32
    return %c0_i32, %c0_i32_0 : i32, i32
  }
  func.func @transform_5(%arg0: i32) -> (i32, i32) {
    %c0_i32 = arith.constant 0 : i32
    %c0_i32_0 = arith.constant 0 : i32
    %c0_i32_1 = arith.constant 0 : i32
    return %c0_i32, %c0_i32_0 : i32, i32
  }
  func.func @transform_6(%arg0: i32) -> (i32, i32) {
    %c0_i32 = arith.constant 0 : i32
    %c0_i32_0 = arith.constant 0 : i32
    %c0_i32_1 = arith.constant 0 : i32
    return %c0_i32, %c0_i32_0 : i32, i32
  }
  func.func @transform_7(%arg0: i32) -> (i32, i32) {
    %c0_i32 = arith.constant 0 : i32
    %c0_i32_0 = arith.constant 0 : i32
    return %arg0, %c0_i32 : i32, i32
  }
}

</mosaic_0001>

<bundles_post_ra>
// kernel: transformer_time_emb_forward.7
= control target key start
LH: loop header
LB: loop body
LE: loop exit
PB: predicated region body
PF: predicated region fallthrough
CT: control target
= control target key end

     0   :  { %10 = vsyncpa [#allocation3], 0  ;;  %s976_s18 = smov [#allocation2]   ;;  %s1105_s0 = inlined_call_operand.vmem [shape: f32[12,512], index: 0, kind: input, shape index: {}]   ;;  %s1106_s1 = inlined_call_operand.hbm [shape: bf16[512,256], index: 1, kind: input, shape index: {}]   ;;  %s1107_s2 = inlined_call_operand.vmem [shape: f32[1,256], index: 2, kind: input, shape index: {}]   ;;  %s1108_s3 = inlined_call_operand.vmem [shape: bf16[256,128], index: 3, kind: input, shape index: {}]   ;;  %s1109_s4 = inlined_call_operand.vmem [shape: f32[1,128], index: 4, kind: input, shape index: {}]   ;;  %s1110_s5 = inlined_call_operand.vmem [shape: f32[12,128], index: 5, kind: output, shape index: {}]  }
   0x1   :  { %s18_s19 = sshll.u32 %s976_s18, 4  ;;  %s952_s22 = scalar_lea.hbm %s1106_s1, 8192  ;;  %s19_s19 = int_to_ptr.vmem [resolvable:$true] %s18_s19 }
   0x2   :  { %p953_p0 = scmp.ne.s32.totalorder %s1106_s1, %s952_s22  ;;  %p956_p1 = scmp.lt.u32.totalorder %s952_s22, %s1106_s1 }
   0x4   :  { %p958_p2 = pnand %p956_p1, %p953_p0 }
   0x6   :  { %961 = shalt.err (!%p958_p2)
}
   0x7   :  { %s962_s27 = scalar_lea.vmem %s19_s19, 8192  ;;  %p967_p4 = scmp.lt.s32.totalorder %s19_s19, %s19_s19 }
   0x8   :  { %p963_p3 = scmp.ne.s32.totalorder %s19_s19, %s962_s27  ;;  %p968_p5 = scmp.lt.s32.totalorder %s962_s27, %s962_s27 }
   0xa   :  { %p969_p6 = por %p968_p5, %p967_p4 }
   0xc   :  { %p970_p7 = pnand %p969_p6, %p963_p3 }
   0xe   :  { %973 = shalt.err (!%p970_p7)
}
   0xf   :  { %s977_s28 = smov 128   ;;  %s978_s29 = smov 8  }
  0x10   :  { %24 = dma.hbm_to_vmem [thread:$0]  %s1106_s1, 8192, %s19_s19, [#allocation3], %s977_s28, %s977_s28, %s978_s29  }
  0x11   :  { %974 = dma.done.wait [#allocation3], 8192  }
  0x12   :  { %975 = vsyncadd [#allocation3], 4294959104  ;;  %v832_v0 = vld [vmem:[#allocation2 + $0x4] ss:$8 sps:$4 sm:$0xff]   ;;  %v836_v2 = vld [vmem:[#allocation2] ss:$8 sps:$4 sm:$0xff]  }
  0x13   :  { %v834_v1 = vld [vmem:[#allocation2 + $0x104] ss:$8 sps:$4 sm:$0xff]   ;;  %443 = vmatprep.subr.bf16.mxu1 %v832_v0  ;;  %v837_v3 = vld [vmem:[#allocation2 + $0x100] ss:$8 sps:$4 sm:$0xff]   ;;  %v838_v4 = vld [vmem:[#allocation2 + $0x14] ss:$8 sps:$4 sm:$0xff]  }
  0x14   :  { %486 = vmatprep.subr.bf16.mxu0 %v834_v1  ;;  %444 = vmatpush1.bf16.msra.mxu1 %v836_v2  ;;  %v840_v5 = vld [vmem:[#allocation2 + $0x114] ss:$8 sps:$4 sm:$0xff]   ;;  %v842_v6 = vld [vmem:[#allocation2 + $0x10] ss:$8 sps:$4 sm:$0xff]   ;;  %v844_v8 = vld [vmem:[#allocation2 + $0x24] ss:$8 sps:$4 sm:$0xff]  }
  0x15   :  { %487 = vmatpush1.bf16.msra.mxu0 %v837_v3  ;;  %445 = vmatprep.subr.bf16.mxu1 %v838_v4  ;;  %v843_v7 = vld [vmem:[#allocation2 + $0x110] ss:$8 sps:$4 sm:$0xff]   ;;  %v846_v9 = vld [vmem:[#allocation2 + $0x124] ss:$8 sps:$4 sm:$0xff]   ;;  %v848_v10 = vld [vmem:[#allocation2 + $0x20] ss:$8 sps:$4 sm:$0xff]  }
  0x16   :  { %488 = vmatprep.subr.bf16.mxu0 %v840_v5  ;;  %v849_v11 = vld [vmem:[#allocation2 + $0x120] ss:$8 sps:$4 sm:$0xff]   ;;  %v850_v12 = vld [vmem:[#allocation2 + $0x34] ss:$8 sps:$4 sm:$0xff]   ;;  %v854_v14 = vld [vmem:[#allocation2 + $0x30] ss:$8 sps:$4 sm:$0xff]  }
  0x17   :  { %v852_v13 = vld [vmem:[#allocation2 + $0x134] ss:$8 sps:$4 sm:$0xff]   ;;  %v855_v15 = vld [vmem:[#allocation2 + $0x130] ss:$8 sps:$4 sm:$0xff]   ;;  %v856_v16 = vld [vmem:[#allocation2 + $0x44] ss:$8 sps:$4 sm:$0xff]  }
  0x18   :  { %446 = vmatpush1.bf16.msra.mxu1 %v842_v6  ;;  %v858_v17 = vld [vmem:[#allocation2 + $0x144] ss:$8 sps:$4 sm:$0xff]   ;;  %v860_v18 = vld [vmem:[#allocation2 + $0x40] ss:$8 sps:$4 sm:$0xff]   ;;  %v862_v20 = vld [vmem:[#allocation2 + $0x54] ss:$8 sps:$4 sm:$0xff]  }
  0x19   :  { %489 = vmatpush1.bf16.msra.mxu0 %v843_v7  ;;  %447 = vmatprep.subr.bf16.mxu1 %v844_v8  ;;  %v861_v19 = vld [vmem:[#allocation2 + $0x140] ss:$8 sps:$4 sm:$0xff]   ;;  %v864_v21 = vld [vmem:[#allocation2 + $0x154] ss:$8 sps:$4 sm:$0xff]   ;;  %v866_v22 = vld [vmem:[#allocation2 + $0x50] ss:$8 sps:$4 sm:$0xff]  }
  0x1a   :  { %490 = vmatprep.subr.bf16.mxu0 %v846_v9  ;;  %v867_v23 = vld [vmem:[#allocation2 + $0x150] ss:$8 sps:$4 sm:$0xff]   ;;  %v868_v24 = vld [vmem:[#allocation2 + $0x64] ss:$8 sps:$4 sm:$0xff]   ;;  %v872_v26 = vld [vmem:[#allocation2 + $0x60] ss:$8 sps:$4 sm:$0xff]  }
  0x1b   :  { %v870_v25 = vld [vmem:[#allocation2 + $0x164] ss:$8 sps:$4 sm:$0xff]   ;;  %v873_v27 = vld [vmem:[#allocation2 + $0x160] ss:$8 sps:$4 sm:$0xff]   ;;  %v874_v28 = vld [vmem:[#allocation2 + $0x74] ss:$8 sps:$4 sm:$0xff]  }
  0x1c   :  { %448 = vmatpush1.bf16.msra.mxu1 %v848_v10  ;;  %v876_v29 = vld [vmem:[#allocation2 + $0x174] ss:$8 sps:$4 sm:$0xff]   ;;  %v878_v30 = vld [vmem:[#allocation2 + $0x70] ss:$8 sps:$4 sm:$0xff]   ;;  %v880_v32 = vld [vmem:[#allocation2 + $0x84] ss:$8 sps:$4 sm:$0xff]  }
  0x1d   :  { %491 = vmatpush1.bf16.msra.mxu0 %v849_v11  ;;  %449 = vmatprep.subr.bf16.mxu1 %v850_v12  ;;  %v879_v31 = vld [vmem:[#allocation2 + $0x170] ss:$8 sps:$4 sm:$0xff]   ;;  %v882_v33 = vld [vmem:[#allocation2 + $0x184] ss:$8 sps:$4 sm:$0xff]   ;;  %v884_v34 = vld [vmem:[#allocation2 + $0x80] ss:$8 sps:$4 sm:$0xff]  }
  0x1e   :  { %492 = vmatprep.subr.bf16.mxu0 %v852_v13  ;;  %v885_v35 = vld [vmem:[#allocation2 + $0x180] ss:$8 sps:$4 sm:$0xff]   ;;  %v886_v36 = vld [vmem:[#allocation2 + $0x94] ss:$8 sps:$4 sm:$0xff]   ;;  %v890_v38 = vld [vmem:[#allocation2 + $0x90] ss:$8 sps:$4 sm:$0xff]  }
  0x1f   :  { %v888_v37 = vld [vmem:[#allocation2 + $0x194] ss:$8 sps:$4 sm:$0xff]   ;;  %v891_v39 = vld [vmem:[#allocation2 + $0x190] ss:$8 sps:$4 sm:$0xff]   ;;  %v892_v40 = vld [vmem:[#allocation2 + $0xa4] ss:$8 sps:$4 sm:$0xff]  }
  0x20   :  { %450 = vmatpush1.bf16.msra.mxu1 %v854_v14  ;;  %v894_v41 = vld [vmem:[#allocation2 + $0x1a4] ss:$8 sps:$4 sm:$0xff]   ;;  %v896_v42 = vld [vmem:[#allocation2 + $0xa0] ss:$8 sps:$4 sm:$0xff]   ;;  %v898_v44 = vld [vmem:[#allocation2 + $0xb4] ss:$8 sps:$4 sm:$0xff]  }
  0x21   :  { %493 = vmatpush1.bf16.msra.mxu0 %v855_v15  ;;  %451 = vmatprep.subr.bf16.mxu1 %v856_v16  ;;  %v897_v43 = vld [vmem:[#allocation2 + $0x1a0] ss:$8 sps:$4 sm:$0xff]   ;;  %v900_v45 = vld [vmem:[#allocation2 + $0x1b4] ss:$8 sps:$4 sm:$0xff]   ;;  %v42_v49 = vld [vmem:[%s1105_s0 + $0x38] sm:$0xf] }
  0x22   :  { %494 = vmatprep.subr.bf16.mxu0 %v858_v17  ;;  %v36_v46 = vld [vmem:[%s1105_s0 + $0x8] sm:$0xff]  ;;  %v38_v48 = vld [vmem:[%s1105_s0 + $0x18] sm:$0xff]  ;;  %v35_v6 = vld [vmem:[%s1105_s0] sm:$0xff] }
  0x23   :  { %v40_v47 = vld [vmem:[%s1105_s0 + $0x28] sm:$0xf]  ;;  %v902_v50 = vld [vmem:[#allocation2 + $0xb0] ss:$8 sps:$4 sm:$0xff]   ;;  %v904_v52 = vld [vmem:[#allocation2 + $0xc4] ss:$8 sps:$4 sm:$0xff]   ;;  %v46_v54 = vpack.c.bf16 %v42_v49, %v38_v48 }
  0x24   :  { %452 = vmatpush1.bf16.msra.mxu1 %v860_v18  ;;  %v903_v51 = vld [vmem:[#allocation2 + $0x1b0] ss:$8 sps:$4 sm:$0xff]   ;;  %v44_v53 = vpack.c.bf16 %v40_v47, %v36_v46  ;;  %v906_v55 = vld [vmem:[#allocation2 + $0x1c4] ss:$8 sps:$4 sm:$0xff]   ;;  %v908_v56 = vld [vmem:[#allocation2 + $0xc0] ss:$8 sps:$4 sm:$0xff]  }
  0x25   :  { %495 = vmatpush1.bf16.msra.mxu0 %v861_v19  ;;  %453 = vmatprep.subr.bf16.mxu1 %v862_v20  ;;  %v909_v57 = vld [vmem:[#allocation2 + $0x1c0] ss:$8 sps:$4 sm:$0xff]   ;;  %v910_v58 = vld [vmem:[#allocation2 + $0xd4] ss:$8 sps:$4 sm:$0xff]   ;;  %v914_v60 = vld [vmem:[#allocation2 + $0xd0] ss:$8 sps:$4 sm:$0xff]  }
  0x26   :  { %496 = vmatprep.subr.bf16.mxu0 %v864_v21  ;;  %475 = vmatprep.mubr.bf16.mxu1 %v44_v53  ;;  %v912_v59 = vld [vmem:[#allocation2 + $0x1d4] ss:$8 sps:$4 sm:$0xff]   ;;  %v915_v61 = vld [vmem:[#allocation2 + $0x1d0] ss:$8 sps:$4 sm:$0xff]   ;;  %v916_v62 = vld [vmem:[#allocation2 + $0xe4] ss:$8 sps:$4 sm:$0xff]  }
  0x27   :  { %518 = vmatprep.mubr.bf16.mxu0 %v46_v54  ;;  %v918_v63 = vld [vmem:[#allocation2 + $0x1e4] ss:$8 sps:$4 sm:$0xff]   ;;  %v920_v0 = vld [vmem:[#allocation2 + $0xe0] ss:$8 sps:$4 sm:$0xff]   ;;  %v922_v2 = vld [vmem:[#allocation2 + $0xf4] ss:$8 sps:$4 sm:$0xff]  }
  0x28   :  { %454 = vmatpush1.bf16.msra.mxu1 %v866_v22  ;;  %v921_v1 = vld [vmem:[#allocation2 + $0x1e0] ss:$8 sps:$4 sm:$0xff]   ;;  %v924_v3 = vld [vmem:[#allocation2 + $0x1f4] ss:$8 sps:$4 sm:$0xff]   ;;  %v926_v4 = vld [vmem:[#allocation2 + $0xf0] ss:$8 sps:$4 sm:$0xff]  }
  0x29   :  { %497 = vmatpush1.bf16.msra.mxu0 %v867_v23  ;;  %455 = vmatprep.subr.bf16.mxu1 %v868_v24  ;;  %v927_v5 = vld [vmem:[#allocation2 + $0x1f0] ss:$8 sps:$4 sm:$0xff]   ;;  %v39_v7 = vld [vmem:[%s1105_s0 + $0x20] sm:$0xf]  ;;  %v930_v14 = vld [vmem:[%s1108_s3 + $0x48] sm:$0xff]  }
  0x2a   :  { %498 = vmatprep.subr.bf16.mxu0 %v870_v25  ;;  %v37_v8 = vld [vmem:[%s1105_s0 + $0x10] sm:$0xff]  ;;  %v928_v10 = vld [vmem:[%s1108_s3 + $0x40] sm:$0xff]   ;;  %v43_v11 = vpack.c.bf16 %v39_v7, %v35_v6  ;;  %v931_v15 = vld [vmem:[%s1108_s3 + $0x8] sm:$0xff]  }
  0x2b   :  { %v41_v9 = vld [vmem:[%s1105_s0 + $0x30] sm:$0xf]  ;;  %v929_v13 = vld [vmem:[%s1108_s3] sm:$0xff]   ;;  %v934_v18 = vld [vmem:[%s1108_s3 + $0x58] sm:$0xff]  }
  0x2c   :  { %456 = vmatpush1.bf16.msra.mxu1 %v872_v26  ;;  %v45_v12 = vpack.c.bf16 %v41_v9, %v37_v8  ;;  %v932_v16 = vld [vmem:[%s1108_s3 + $0x50] sm:$0xff]   ;;  %v935_v19 = vld [vmem:[%s1108_s3 + $0x18] sm:$0xff]   ;;  %v936_v20 = vld [vmem:[%s1108_s3 + $0x60] sm:$0xff]  }
  0x2d   :  { %499 = vmatpush1.bf16.msra.mxu0 %v873_v27  ;;  %457 = vmatprep.subr.bf16.mxu1 %v874_v28  ;;  %v933_v17 = vld [vmem:[%s1108_s3 + $0x10] sm:$0xff]   ;;  %v937_v21 = vld [vmem:[%s1108_s3 + $0x20] sm:$0xff]   ;;  %v938_v22 = vld [vmem:[%s1108_s3 + $0x68] sm:$0xff]   ;;  %v113_v28 = vlaneseq }
  0x2e   :  { %500 = vmatprep.subr.bf16.mxu0 %v876_v29  ;;  %v939_v23 = vld [vmem:[%s1108_s3 + $0x28] sm:$0xff]   ;;  %v940_v24 = vld [vmem:[%s1108_s3 + $0x70] sm:$0xff]   ;;  %v942_v26 = vld [vmem:[%s1108_s3 + $0x78] sm:$0xff]  }
  0x2f   :  { %v941_v25 = vld [vmem:[%s1108_s3 + $0x30] sm:$0xff]   ;;  %v943_v27 = vld [vmem:[%s1108_s3 + $0x38] sm:$0xff]   ;;  %v114_v29 = vshrl.u32 %v113_v28, 7 }
  0x30   :  { %458 = vmatpush1.bf16.msra.mxu1 %v878_v30 }
  0x31   :  { %501 = vmatpush1.bf16.msra.mxu0 %v879_v31  ;;  %459 = vmatprep.subr.bf16.mxu1 %v880_v32  ;;  %v115_v30 = vsub.s32 0, %v114_v29  ;;  %v111_v31 = vld [vmem:[%s1107_s2] sm:$0x3]  ;;  %v119_v32 = vsub.s32 1, %v114_v29 }
  0x32   :  { %502 = vmatprep.subr.bf16.mxu0 %v882_v33 }
  0x33   :  { %v116_v33 = vrot.slane %v111_v31, %v115_v30 }
  0x34   :  { %460 = vmatpush1.bf16.msra.mxu1 %v884_v34  ;;  %v120_v34 = vrot.slane %v111_v31, %v119_v32 }
  0x35   :  { %503 = vmatpush1.bf16.msra.mxu0 %v885_v35  ;;  %461 = vmatprep.subr.bf16.mxu1 %v886_v36 }
  0x36   :  { %504 = vmatprep.subr.bf16.mxu0 %v888_v37 }
  0x38   :  { %462 = vmatpush1.bf16.msra.mxu1 %v890_v38 }
  0x39   :  { %505 = vmatpush1.bf16.msra.mxu0 %v891_v39  ;;  %463 = vmatprep.subr.bf16.mxu1 %v892_v40 }
  0x3a   :  { %506 = vmatprep.subr.bf16.mxu0 %v894_v41 }
  0x3c   :  { %464 = vmatpush1.bf16.msra.mxu1 %v896_v42 }
  0x3d   :  { %507 = vmatpush1.bf16.msra.mxu0 %v897_v43  ;;  %465 = vmatprep.subr.bf16.mxu1 %v898_v44 }
  0x3e   :  { %508 = vmatprep.subr.bf16.mxu0 %v900_v45 }
  0x40   :  { %466 = vmatpush1.bf16.msra.mxu1 %v902_v50 }
  0x41   :  { %509 = vmatpush1.bf16.msra.mxu0 %v903_v51  ;;  %467 = vmatprep.subr.bf16.mxu1 %v904_v52 }
  0x42   :  { %510 = vmatprep.subr.bf16.mxu0 %v906_v55 }
  0x44   :  { %468 = vmatpush1.bf16.msra.mxu1 %v908_v56 }
  0x45   :  { %511 = vmatpush1.bf16.msra.mxu0 %v909_v57  ;;  %469 = vmatprep.subr.bf16.mxu1 %v910_v58  ;;  %v782_v58 = vld [vmem:[%s1109_s4] ss:$0 sm:$0xff] }
  0x46   :  { %512 = vmatprep.subr.bf16.mxu0 %v912_v59 }
  0x48   :  { %470 = vmatpush1.bf16.msra.mxu1 %v914_v60 }
  0x49   :  { %513 = vmatpush1.bf16.msra.mxu0 %v915_v61  ;;  %471 = vmatprep.subr.bf16.mxu1 %v916_v62 }
  0x4a   :  { %514 = vmatprep.subr.bf16.mxu0 %v918_v63 }
  0x4c   :  { %472 = vmatpush1.bf16.msra.mxu1 %v920_v0 }
  0x4d   :  { %515 = vmatpush1.bf16.msra.mxu0 %v921_v1  ;;  %473 = vmatprep.subr.bf16.mxu1 %v922_v2 }
  0x4e   :  { %516 = vmatprep.subr.bf16.mxu0 %v924_v3 }
  0x50   :  { %474 = vmatpush1.bf16.msra.mxu1 %v926_v4 }
  0x51   :  { %517 = vmatpush1.bf16.msra.mxu0 %v927_v5  ;;  %799 = vmatprep.subr.bf16.mxu1 %v928_v10 }
  0x53   :  { %476 = vmatmul.mubr.bf16.vlgmr.msra.gmra.mrb[0].mxu1 %v43_v11 }
  0x54   :  { %519 = vmatmul.mubr.bf16.vlgmr.msra.gmra.mrb[0].mxu0 %v45_v12  ;;  %800 = vmatpush3.bf16.msra.mxu1 %v929_v13 }
  0x55   :  { %801 = vmatprep.subr.bf16.mxu1 %v930_v14 }
  0x58   :  { %802 = vmatpush3.bf16.msra.mxu1 %v931_v15 }
  0x59   :  { %803 = vmatprep.subr.bf16.mxu1 %v932_v16 }
  0x5c   :  { %804 = vmatpush3.bf16.msra.mxu1 %v933_v17 }
  0x5d   :  { %805 = vmatprep.subr.bf16.mxu1 %v934_v18 }
  0x60   :  { %806 = vmatpush3.bf16.msra.mxu1 %v935_v19 }
  0x61   :  { %807 = vmatprep.subr.bf16.mxu1 %v936_v20 }
  0x64   :  { %808 = vmatpush3.bf16.msra.mxu1 %v937_v21 }
  0x65   :  { %809 = vmatprep.subr.bf16.mxu1 %v938_v22 }
  0x68   :  { %810 = vmatpush3.bf16.msra.mxu1 %v939_v23 }
  0x69   :  { %811 = vmatprep.subr.bf16.mxu1 %v940_v24 }
  0x6c   :  { %812 = vmatpush3.bf16.msra.mxu1 %v941_v25 }
  0x6d   :  { %813 = vmatprep.subr.bf16.mxu1 %v942_v26 }
  0x70   :  { %814 = vmatpush3.bf16.msra.mxu1 %v943_v27 }
 0x126   :  { %v477_v35 = vpop.f32.mrb[0].mxu1 }
 0x127   :  { %v520_v36 = vpop.f32.mrb[0].mxu0  ;;  %v478_v37 = vadd.f32 %v477_v35, %v116_v33  ;;  %v479_v38 = vpop.f32.mrb[1].mxu1 }
 0x128   :  { %v522_v39 = vpop.f32.mrb[1].mxu0  ;;  %v480_v40 = vadd.f32 %v479_v38, %v120_v34  ;;  %v481_v41 = vpop.f32.mrb[2].mxu1 }
 0x129   :  { %v524_v42 = vpop.f32.mrb[2].mxu0  ;;  %v521_v43 = vadd.f32 %v520_v36, %v478_v37  ;;  %v482_v44 = vadd.f32 %v481_v41, %v116_v33  ;;  %v483_v45 = vpop.f32.mrb[3].mxu1 }
 0x12a   :  { %v526_v46 = vpop.f32.mrb[3].mxu0  ;;  %v523_v47 = vadd.f32 %v522_v39, %v480_v40  ;;  %v484_v48 = vadd.f32 %v483_v45, %v120_v34 }
 0x12b   :  { %944 = vtanh.f32 %v521_v43  ;;  %v525_v49 = vadd.f32 %v524_v42, %v482_v44 }
 0x12c   :  { %946 = vtanh.f32 %v523_v47  ;;  %v527_v50 = vadd.f32 %v526_v46, %v484_v48 }
 0x12d   :  { %948 = vtanh.f32 %v525_v49 }
 0x12e   :  { %950 = vtanh.f32 %v527_v50 }
 0x135   :  { %v945_v51 = vpop.eup %944 }
 0x136   :  { %v947_v52 = vpop.eup %946 }
 0x137   :  { %v949_v53 = vpop.eup %948 }
 0x138   :  { %v951_v54 = vpop.eup %950  ;;  %v533_v55 = vpack.c.bf16 %v949_v53, %v945_v51 }
 0x139   :  { %v534_v56 = vpack.c.bf16 %v951_v54, %v947_v52 }
 0x13b   :  { %702 = vmatprep.mubr.bf16.mxu1 %v534_v56 }
 0x13c   :  { %703 = vmatmul.mubr.bf16.vlgmr.msra.gmra.mrb[4].mxu1 %v533_v55 }
 0x20f   :  { %v815_v57 = vpop.f32.mrb[4].mxu1 }
 0x210   :  { %v816_v59 = vpop.f32.mrb[5].mxu1 }
 0x211   :  { %v817_v60 = vadd.f32 %v816_v59, %v815_v57  ;;  %v818_v61 = vpop.f32.mrb[6].mxu1 }
 0x212   :  { %v819_v62 = vpop.f32.mrb[7].mxu1 }
 0x213   :  { %v705_v63 = vadd.f32 %v817_v60, %v782_v58  ;;  %v820_v0 = vadd.f32 %v819_v62, %v818_v61 }
 0x215   :  { %711 = vst [vmem:[%s1110_s5] sm:$0xff] %v705_v63  ;;  %v708_v1 = vadd.f32 %v820_v0, %v782_v58 }
 0x217   :  { %712 = vst [vmem:[%s1110_s5 + $0x8] sm:$0xf] %v708_v1 }
 0x218   :  { %717 = vsyncpa [#allocation3], 1 }

// kernel: transformer_time_emb_forward.8
= control target key start
LH: loop header
LB: loop body
LE: loop exit
PB: predicated region body
PF: predicated region fallthrough
CT: control target
= control target key end

     0   :  { %v1235_v0 = vmov 1   ;;  %v1236_v2 = vmov 0   ;;  %v1237_v8 = vmov 2   ;;  %v1238_v10 = vmov 3   ;;  %s2004_s1 = inlined_call_operand.vmem [shape: f32[16,4], index: 1, kind: input, shape index: {}]   ;;  %s2005_s2 = inlined_call_operand.vmem [shape: f32[16,1], index: 2, kind: input, shape index: {}]   ;;  %s2006_s6 = inlined_call_operand.vmem [shape: bf16[64,256], index: 6, kind: input, shape index: {}]   ;;  %s2007_s4 = inlined_call_operand.vmem [shape: f32[1,64], index: 4, kind: input, shape index: {}]   ;;  %s2008_s5 = inlined_call_operand.vmem [shape: f32[1,64], index: 5, kind: input, shape index: {}]   ;;  %s2009_s3 = inlined_call_operand.vmem [shape: f32[16,256], index: 3, kind: input, shape index: {}]   ;;  %s2010_s0 = inlined_call_operand.vmem [shape: bf16[16,4,256], index: 0, kind: input, shape index: {}]   ;;  %s2011_s8 = inlined_call_operand.vmem [shape: f32[1,256], index: 8, kind: input, shape index: {}]   ;;  %s2012_s7 = inlined_call_operand.vmem [shape: f32[1,256], index: 7, kind: input, shape index: {}]   ;;  %s2013_s9 = inlined_call_operand.vmem [shape: f32[16,256], index: 9, kind: output, shape index: {}]  }
   0x1   :  { %1206 = vset.pattern.permute.xlu1 %v1235_v0  ;;  %v65_v1 = vld [vmem:[%s2004_s1] sm:$0xff]  ;;  %1205 = vset.pattern.permute.xlu0 %v1236_v2  ;;  %v654_v4 = vld [vmem:[%s2005_s2 + $0x8] sm:$0xff]  ;;  %v1216_v12 = vld [vmem:[%s2006_s6 + $0x14] ss:$8 sps:$4 sm:$0xff]   ;;  %vm752_vm0 = vcmask 523264   ;;  %v78_v35 = vlaneseq  ;;  %vm1093_vm1 = vcmask 1041409  }
   0x2   :  { %v653_v3 = vld [vmem:[%s2005_s2] sm:$0xff]  ;;  %148 = vperm.xlu1 %1206, %v65_v1   ;;  %788 = vmatprep.mubr.bf16.mxu0 %v1236_v2  ;;  %v66_v6 = vld [vmem:[%s2004_s1 + $0x8] sm:$0xff]  ;;  %v656_v7 = vmul.f32 0.0055555557, %v654_v4  ;;  %v1218_v13 = vld [vmem:[%s2006_s6 + $0x10] ss:$8 sps:$4 sm:$0xff]  }
   0x3   :  { %v655_v5 = vmul.f32 0.0055555557, %v653_v3  ;;  %v1213_v9 = vld [vmem:[%s2006_s6 + $0x4] ss:$8 sps:$4 sm:$0xff]   ;;  %v1215_v11 = vld [vmem:[%s2006_s6] ss:$8 sps:$4 sm:$0xff]  }
   0x4   :  { %756 = vmatprep.subr.bf16.mxu0 %v1213_v9  ;;  %v1219_v14 = vld [vmem:[%s2006_s6 + $0x24] ss:$8 sps:$4 sm:$0xff]   ;;  %v1221_v15 = vld [vmem:[%s2006_s6 + $0x20] ss:$8 sps:$4 sm:$0xff]   ;;  %v1222_v16 = vld [vmem:[%s2006_s6 + $0x34] ss:$8 sps:$4 sm:$0xff]  }
   0x5   :  { %660 = vperm.xlu0 %1205, %v655_v5   ;;  %757 = vmatpush1.bf16.msra.mxu0 %v1215_v11  ;;  %v1224_v17 = vld [vmem:[%s2006_s6 + $0x30] ss:$8 sps:$4 sm:$0xff]   ;;  %v1188_v18 = vld [vmem:[%s2007_s4] ss:$0 sm:$0xff]  ;;  %v1239_v33 = vmov 839922192  }
   0x6   :  { %151 = vperm.xlu1 %1206, %v66_v6   ;;  %758 = vmatprep.subr.bf16.mxu0 %v1216_v12  ;;  %v1189_v20 = vld [vmem:[%s2008_s5] ss:$0 sm:$0xff]  ;;  %v76_v34 = vunpack.c.l.s4 %v1239_v33  ;;  %v1240_v36 = vmov 1985246804   ;;  %v1333_v39 = vshrl.u32 %v78_v35, 7  ;;  %vm1095_vm2 = vcmask 1042434  }
   0x7   :  { %v83_v37 = vunpack.c.l.s4 %v1240_v36  ;;  %v1338_v41 = vld [vmem:[%s2010_s0] sm:$0x5]  ;;  %v1343_v42 = vld [vmem:[%s2010_s0 + $0x10] sm:$0x5]  ;;  %v1348_v43 = vld [vmem:[%s2010_s0 + $0x4] sm:$0x5] }
   0x8   :  { %v77_v38 = vunpack.c.0.s8 %v76_v34  ;;  %2051 = vst [vmem:[#allocation2_spill] sm:$0xff] %v1333_v39  ;;  %v1353_v44 = vld [vmem:[%s2010_s0 + $0x8] sm:$0x5]  ;;  %v1358_v45 = vld [vmem:[%s2010_s0 + $0xc] sm:$0x5]  ;;  %v1376_v49 = vsub.s32 0, %v1333_v39  ;;  %v2015_v58 = vunpack.c.l.bf16 %v1338_v41  ;;  %v2020_v59 = vunpack.c.l.bf16 %v1348_v43 }
   0x9   :  { %665 = vperm.xlu0 %1205, %v656_v7   ;;  %759 = vmatpush1.bf16.msra.mxu0 %v1218_v13  ;;  %v84_v40 = vunpack.c.0.s8 %v83_v37  ;;  %v1363_v46 = vld [vmem:[%s2010_s0 + $0x14] sm:$0x5]  ;;  %v1368_v47 = vld [vmem:[%s2010_s0 + $0x18] sm:$0x5]  ;;  %v1373_v48 = vld [vmem:[%s2010_s0 + $0x1c] sm:$0x5]  ;;  %v2016_v60 = vunpack.c.l.bf16 %v1353_v44  ;;  %v2017_v61 = vunpack.c.l.bf16 %v1343_v42 }
   0xa   :  { %1207 = vset.pattern.permute.xlu1 %v1236_v2  ;;  %760 = vmatprep.subr.bf16.mxu0 %v1219_v14  ;;  %2052 = vst [vmem:[#allocation3_spill] sm:$0xff] %v1376_v49  ;;  %v1379_v50 = vsub.s32 4, %v1333_v39  ;;  %v1384_v51 = vld [vmem:[%s2010_s0 + $0x8] sm:$0xa]  ;;  %v2014_v52 = vsub.s32 1, %v1333_v39  ;;  %v1388_v53 = vsub.s32 %v77_v38, %v1333_v39  ;;  %v2022_v3 = vunpack.c.l.bf16 %v1368_v47 }
   0xb   :  { %73 = vperm.xlu1 %1207, %v66_v6   ;;  %v1391_v54 = vsub.s32 %v84_v40, %v1333_v39  ;;  %v1396_v55 = vld [vmem:[%s2010_s0] sm:$0xa]  ;;  %v1401_v56 = vld [vmem:[%s2010_s0 + $0x18] sm:$0xa]  ;;  %v1413_v62 = vld [vmem:[%s2010_s0 + $0x20] sm:$0x5]  ;;  %v2028_v4 = vunpack.c.l.bf16 %v1373_v48 }
   0xc   :  { %2053 = vst [vmem:[#allocation4_spill] sm:$0xff] %v1379_v50  ;;  %v799_v57 = vld [vmem:[%s2011_s8] sm:$0x3]  ;;  %v1418_v63 = vld [vmem:[%s2010_s0 + $0x4] sm:$0xa]  ;;  %vm1097_vm3 = vcmask 1043459  }
   0xd   :  { %69 = vperm.xlu0 %1205, %v65_v1   ;;  %761 = vmatpush1.bf16.msra.mxu0 %v1221_v15  ;;  %v1423_v0 = vld [vmem:[%s2010_s0 + $0x10] sm:$0xa]  ;;  %v1432_v5 = vld [vmem:[%s2010_s0 + $0x24] sm:$0x5]  ;;  %v1442_v7 = vld [vmem:[%s2010_s0 + $0x2c] sm:$0x5]  ;;  %v804_v13 = vrot.slane %v799_v57, %v1376_v49  ;;  %v808_v14 = vrot.slane %v799_v57, %v2014_v52 }
   0xe   :  { %762 = vmatprep.subr.bf16.mxu0 %v1222_v16  ;;  %v1452_v9 = vld [vmem:[%s2010_s0 + $0x34] sm:$0x5]  ;;  %v1467_v16 = vld [vmem:[%s2010_s0 + $0x3c] sm:$0x5]  ;;  %v1509_v34 = vld [vmem:[%s2010_s0 + $0x28] sm:$0xa] }
   0xf   :  { %1209 = vset.pattern.permute.xlu1 %v1237_v8  ;;  %2057 = vst [vmem:[#allocation8_spill] sm:$0xff] %v1509_v34  ;;  %v1514_v35 = vld [vmem:[%s2010_s0 + $0x30] sm:$0xa]  ;;  %v1519_v36 = vld [vmem:[%s2010_s0 + $0x34] sm:$0xa]  ;;  %v1528_v57 = vcombine.low %v804_v13, %v808_v14  ;;  %v2079_v34 = vunpack.c.l.bf16 %v1343_v42  ;;  %vm1099_vm4 = vcmask 1044484  }
  0x10   :  { %341 = vperm.xlu1 %1209, %v66_v6   ;;  %2058 = vst [vmem:[#allocation9_spill] sm:$0xff] %v1514_v35  ;;  %2059 = vst [vmem:[#allocation10_spill] sm:$0xff] %v1519_v36  ;;  %v1526_v40 = vld [vmem:[%s2010_s0 + $0x38] sm:$0xa]  ;;  %v1539_v38 = vld [vmem:[%s2010_s0 + $0x2c] sm:$0xa] }
  0x11   :  { %1208 = vset.pattern.permute.xlu0 %v1237_v8  ;;  %763 = vmatpush1.bf16.msra.mxu0 %v1224_v17  ;;  %v1447_v8 = vld [vmem:[%s2010_s0 + $0x30] sm:$0x5]  ;;  %2060 = vst [vmem:[#allocation11_spill] sm:$0xff] %v1526_v40  ;;  %2061 = vst [vmem:[#allocation12_spill] sm:$0xff] %v1528_v57  ;;  %v2075_v40 = vunpack.c.l.bf16 %v1338_v41  ;;  %v2080_v41 = vunpack.c.l.bf16 %v1363_v46  ;;  %vm1101_vm5 = vcmask 1045509   ;;  %vm1103_vm6 = vcmask 1046534  }
  0x12   :  { %338 = vperm.xlu0 %1208, %v65_v1   ;;  %2063 = vst [vmem:[#allocation14_spill] sm:$0xff] %v1539_v38  ;;  %vm1105_vm7 = vcmask 1047559  }
  0x14   :  { %1210 = vset.pattern.permute.xlu1 %v1238_v10 }
  0x15   :  { %496 = vperm.xlu1 %1210, %v65_v1   ;;  %v2018_v1 = vunpack.c.l.bf16 %v1358_v45 }
  0x16   :  { %1211 = vset.pattern.permute.xlu0 %v1238_v10  ;;  %v1457_v10 = vld [vmem:[%s2010_s0 + $0x38] sm:$0x5] }
  0x17   :  { %499 = vperm.xlu0 %1211, %v66_v6   ;;  %v1437_v6 = vld [vmem:[%s2010_s0 + $0x28] sm:$0x5] }
  0x1b   :  { %1212 = vset.pattern.permute.xlu0 %v1236_v2  ;;  %v2019_v2 = vunpack.c.l.bf16 %v1363_v46 }
  0x81   :  { %v149_v15 = vpop.permute.xlu1 %148 }
  0x84   :  { %v661_v19 = vpop.permute.xlu0 %660 }
  0x85   :  { %v674_v21 = vmul.f32 %v1188_v18, %v661_v19  ;;  %v152_v52 = vpop.permute.xlu1 %151 }
  0x87   :  { %v683_v22 = vadd.f32 %v1189_v20, %v674_v21 }
  0x88   :  { %v666_v23 = vpop.permute.xlu0 %665 }
  0x89   :  { %v675_v24 = vmul.f32 %v1188_v18, %v666_v23  ;;  %v685_v25 = vmul.f32 %v683_v22, %v683_v22  ;;  %v1473_v18 = vld [vmem:[%s2010_s0 + $0x14] sm:$0xa]  ;;  %v1481_v22 = vld [vmem:[%s2010_s0 + $0xc] sm:$0xa]  ;;  %v159_v23 = vrot.slane %v149_v15, %v1388_v53 }
  0x8a   :  { %2054 = vst [vmem:[#allocation5_spill] sm:$0xff] %v1481_v22 }
  0x8b   :  { %v684_v26 = vadd.f32 %v1189_v20, %v675_v24  ;;  %1231 = vtanh.f32 %v685_v25  ;;  %v181_v12 = vrot.slane %v159_v23, 7  ;;  %v182_v20 = vrot.slane %v159_v23, 1  ;;  %v1559_v24 = vld [vmem:[%s2012_s7] sm:$0x3] }
  0x8c   :  { %v183_v21 = vrot.slane %v159_v23, 2  ;;  %2065 = vst [vmem:[#allocation16_spill] sm:$0xff] %v1559_v24  ;;  %v1568_v37 = vmul.f32 %v159_v23, %v2020_v59 }
  0x8d   :  { %v686_v27 = vmul.f32 %v684_v26, %v684_v26  ;;  %v180_v26 = vrot.slane %v152_v52, %v1391_v54  ;;  %v1573_v11 = vmul.f32 %v182_v20, %v2016_v60  ;;  %v1590_v20 = vrot.slane %v1559_v24, %v1376_v49 }
  0x8e   :  { %v1577_v25 = vmul.f32 %v183_v21, %v2018_v1 }
  0x8f   :  { %1233 = vtanh.f32 %v686_v27  ;;  %v1490_v27 = vld [vmem:[%s2010_s0 + $0x20] sm:$0xa]  ;;  %2066 = vst [vmem:[#allocation17_spill] sm:$0xff] %v1590_v20  ;;  %v190_v1 = vrot.slane %v180_v26, 7  ;;  %v1142_v50 = vrot.slane %v1573_v11, 9  ;;  %v192_v20 = vrot.slane %v180_v26, 2 }
  0x90   :  { %v1143_v60 = vrot.slane %v1577_v25, 9  ;;  %v2069_v11 = vunpack.c.l.bf16 %v1437_v6  ;;  %v2070_v25 = vunpack.c.l.bf16 %v1442_v7 }
  0x95   :  { %v1232_v28 = vpop.eup %1231 }
  0x96   :  { %v689_v31 = vsub.f32 1.0, %v1232_v28  ;;  %v1495_v28 = vld [vmem:[%s2010_s0 + $0x24] sm:$0xa] }
  0x97   :  { %2055 = vst [vmem:[#allocation6_spill] sm:$0xff] %v1495_v28 }
  0x99   :  { %v1234_v29 = vpop.eup %1233 }
  0x9a   :  { %v690_v30 = vsub.f32 1.0, %v1234_v29  ;;  %v1500_v29 = vld [vmem:[%s2010_s0 + $0x1c] sm:$0xa] }
  0x9b   :  { %2056 = vst [vmem:[#allocation7_spill] sm:$0xff] %v1500_v29 }
  0x9c   :  { %v691_v32 = vpack.c.bf16 %v690_v30, %v689_v31  ;;  %v166_v30 = vrot.slane %v149_v15, %v1391_v54  ;;  %v1530_v15 = vcombine.high %v804_v13, %v808_v14  ;;  %v1547_v14 = vld [vmem:[%s2010_s0 + $0x3c] sm:$0xa]  ;;  %v1564_v31 = vmul.f32 %v181_v12, %v2015_v58  ;;  %v70_v12 = vpop.permute.xlu0 %69 }
  0x9d   :  { %2064 = vst [vmem:[#allocation15_spill] sm:$0xff] %v1547_v14  ;;  %v81_v59 = vrot.slane %v70_v12, %v1388_v53 }
  0x9e   :  { %1198 = vmatmul.mubr.msk.bf16.vlgmr.msra.gmra.mrb[0].mxu0 %vm752_vm0, %v691_v32  ;;  %2062 = vst [vmem:[#allocation13_spill] sm:$0xff] %v1530_v15  ;;  %v184_v19 = vrot.slane %v166_v30, 7  ;;  %v173_v32 = vrot.slane %v152_v52, %v1388_v53  ;;  %v185_v13 = vrot.slane %v166_v30, 1  ;;  %v186_v17 = vrot.slane %v166_v30, 2 }
  0x9f   :  { %v1586_v23 = vmul.f32 %v166_v30, %v2019_v2  ;;  %v1140_v30 = vrot.slane %v1564_v31, 9  ;;  %v1141_v2 = vrot.slane %v1568_v37, 9  ;;  %v2067_v15 = vunpack.c.l.bf16 %v1413_v62 }
  0xa0   :  { %v1581_v33 = vmul.f32 %v184_v19, %v2017_v61  ;;  %v187_v52 = vrot.slane %v173_v32, 7  ;;  %v1595_v21 = vmul.f32 %v185_v13, %v2022_v3  ;;  %v188_v19 = vrot.slane %v173_v32, 1 }
  0xa1   :  { %v189_v61 = vrot.slane %v173_v32, 2  ;;  %v1599_v58 = vmul.f32 %v186_v17, %v2028_v4  ;;  %v191_v3 = vrot.slane %v180_v26, 1  ;;  %v1145_v49 = vrot.slane %v1586_v23, 9 }
  0xa2   :  { %v1144_v13 = vrot.slane %v1581_v33, 9  ;;  %v1610_v17 = vmul.f32 %v187_v52, %v2067_v15  ;;  %v88_v31 = vrot.slane %v70_v12, %v1391_v54  ;;  %v2068_v37 = vunpack.c.l.bf16 %v1432_v5  ;;  %v74_v15 = vpop.permute.xlu1 %73 }
  0xa3   :  { %v1619_v24 = vmul.f32 %v188_v19, %v2069_v11  ;;  %v1623_v33 = vmul.f32 %v189_v61, %v2070_v25  ;;  %v2071_v23 = vunpack.c.l.bf16 %v1447_v8  ;;  %v1146_v52 = vrot.slane %v1595_v21, 9 }
  0xa4   :  { %v1615_v4 = vmul.f32 %v173_v32, %v2068_v37  ;;  %v1147_v12 = vrot.slane %v1599_v58, 9  ;;  %v103_v57 = vrot.slane %v81_v59, 1  ;;  %v95_v32 = vrot.slane %v74_v15, %v1388_v53 }
  0xa5   :  { %v1627_v39 = vmul.f32 %v190_v1, %v2071_v23  ;;  %v2072_v37 = vunpack.c.l.bf16 %v1452_v9  ;;  %v2073_v11 = vunpack.c.l.bf16 %v1457_v10  ;;  %v104_v25 = vrot.slane %v81_v59, 2 }
  0xa6   :  { %v105_v14 = vrot.slane %v81_v59, 3  ;;  %v2074_v1 = vunpack.c.l.bf16 %v1467_v16  ;;  %v1148_v21 = vrot.slane %v1610_v17, 9  ;;  %v106_v58 = vrot.slane %v88_v31, 1 }
  0xa7   :  { %v1634_v19 = vmul.f32 %v180_v26, %v2072_v37  ;;  %v1638_v61 = vmul.f32 %v191_v3, %v2073_v11  ;;  %v102_v38 = vrot.slane %v74_v15, %v1391_v54  ;;  %v1149_v29 = vrot.slane %v1615_v4, 9 }
  0xa8   :  { %v1642_v23 = vmul.f32 %v192_v20, %v2074_v1  ;;  %v1150_v26 = vrot.slane %v1619_v24, 9  ;;  %v1151_v37 = vrot.slane %v1623_v33, 9  ;;  %v1152_v3 = vrot.slane %v1627_v39, 9 }
  0xa9   :  { %v107_v11 = vrot.slane %v88_v31, 2  ;;  %v108_v22 = vrot.slane %v88_v31, 3  ;;  %v131_v36 = vmul.f32 %v81_v59, %v2075_v40  ;;  %v2076_v20 = vunpack.c.l.bf16 %v1348_v43  ;;  %v339_v40 = vpop.permute.xlu0 %338 }
  0xaa   :  { %v1153_v17 = vrot.slane %v1634_v19, 9  ;;  %v1154_v15 = vrot.slane %v1638_v61, 9  ;;  %v2077_v4 = vunpack.c.l.bf16 %v1353_v44  ;;  %v2078_v24 = vunpack.c.l.bf16 %v1358_v45 }
  0xab   :  { %v132_v1 = vmul.f32 %v103_v57, %v2076_v20  ;;  %v1155_v39 = vrot.slane %v1642_v23, 9  ;;  %v135_v28 = vmul.f32 %v88_v31, %v2079_v34  ;;  %v136_v59 = vmul.f32 %v106_v58, %v2080_v41 }
  0xac   :  { %v133_v35 = vmul.f32 %v104_v25, %v2077_v4  ;;  %v134_v33 = vmul.f32 %v105_v14, %v2078_v24  ;;  %v109_v43 = vrot.slane %v95_v32, 1  ;;  %v110_v57 = vrot.slane %v95_v32, 2 }
  0xad   :  { %v111_v19 = vrot.slane %v95_v32, 3  ;;  %v112_v20 = vrot.slane %v102_v38, 1  ;;  %v113_v61 = vrot.slane %v102_v38, 2  ;;  %v2081_v44 = vunpack.c.l.bf16 %v1368_v47 }
  0xae   :  { %v2082_v45 = vunpack.c.l.bf16 %v1373_v48  ;;  %v1669_v4 = vadd.f32 %v1140_v30, %v131_v36  ;;  %v1671_v23 = vadd.f32 %v1141_v2, %v132_v1  ;;  %v291_v42 = vadd.f32 %v1142_v50, %v133_v35 }
  0xaf   :  { %v137_v25 = vmul.f32 %v107_v11, %v2081_v44  ;;  %v1673_v34 = vadd.f32 %v1143_v60, %v134_v33  ;;  %v114_v46 = vrot.slane %v102_v38, 3  ;;  %v349_v31 = vrot.slane %v339_v40, %v1388_v53 }
  0xb0   :  { %v138_v14 = vmul.f32 %v108_v22, %v2082_v45  ;;  %v1676_v58 = vadd.f32 %v1144_v13, %v135_v28  ;;  %v1678_v24 = vadd.f32 %v1145_v49, %v136_v59  ;;  %v2083_v47 = vunpack.c.l.bf16 %v1413_v62  ;;  %v342_v22 = vpop.permute.xlu1 %341 }
  0xb1   :  { %v356_v48 = vrot.slane %v339_v40, %v1391_v54  ;;  %v2084_v36 = vunpack.c.l.bf16 %v1432_v5  ;;  %v2085_v50 = vunpack.c.l.bf16 %v1437_v6  ;;  %v2086_v35 = vunpack.c.l.bf16 %v1442_v7 }
  0xb2   :  { %v139_v11 = vmul.f32 %v95_v32, %v2083_v47  ;;  %v2087_v28 = vunpack.c.l.bf16 %v1447_v8  ;;  %v295_v49 = vadd.f32 %v1146_v52, %v137_v25  ;;  %v1691_v1 = vadd.f32 %v1147_v12, %v138_v14 }
  0xb3   :  { %v140_v2 = vmul.f32 %v109_v43, %v2084_v36  ;;  %v141_v60 = vmul.f32 %v110_v57, %v2085_v50  ;;  %v142_v30 = vmul.f32 %v111_v19, %v2086_v35  ;;  %v2088_v62 = vunpack.c.l.bf16 %v1452_v9 }
  0xb4   :  { %v143_v13 = vmul.f32 %v102_v38, %v2087_v28  ;;  %v1696_v33 = vrot.slane %v342_v22, %v1388_v53  ;;  %v2089_v5 = vunpack.c.l.bf16 %v1457_v10  ;;  %v2090_v6 = vunpack.c.l.bf16 %v1467_v16  ;;  %v497_v25 = vpop.permute.xlu1 %496 }
  0xb5   :  { %v144_v32 = vmul.f32 %v112_v20, %v2088_v62  ;;  %v371_v7 = vrot.slane %v349_v31, 6  ;;  %v372_v43 = vrot.slane %v349_v31, 7  ;;  %v297_v40 = vadd.f32 %v1148_v21, %v139_v11 }
  0xb6   :  { %v145_v41 = vmul.f32 %v113_v61, %v2089_v5  ;;  %v146_v59 = vmul.f32 %v114_v46, %v2090_v6  ;;  %v374_v8 = vrot.slane %v356_v48, 6  ;;  %v375_v38 = vrot.slane %v356_v48, 7 }
  0xb7   :  { %v1703_v52 = vrot.slane %v342_v22, %v1391_v54  ;;  %v298_v12 = vadd.f32 %v1149_v29, %v140_v2  ;;  %v299_v9 = vadd.f32 %v1150_v26, %v141_v60  ;;  %v1705_v57 = vadd.f32 %v1151_v37, %v142_v30 }
  0xb8   :  { %v301_v19 = vadd.f32 %v1152_v3, %v143_v13  ;;  %v2091_v20 = vunpack.c.l.bf16 %v1384_v51  ;;  %v2092_v61 = vunpack.c.l.bf16 %v1401_v56  ;;  %v377_v44 = vrot.slane %v1696_v33, 6 }
  0xb9   :  { %v378_v21 = vrot.slane %v1696_v33, 7  ;;  %v302_v45 = vadd.f32 %v1153_v17, %v144_v32  ;;  %v2093_v14 = vunpack.c.l.bf16 %v1396_v55  ;;  %v2094_v29 = vunpack.c.l.bf16 %v1418_v63 }
  0xba   :  { %v401_v10 = vmul.f32 %v349_v31, %v2091_v20  ;;  %v405_v16 = vmul.f32 %v356_v48, %v2092_v61  ;;  %v380_v37 = vrot.slane %v1703_v52, 6  ;;  %v303_v3 = vadd.f32 %v1154_v15, %v145_v41  ;;  %v2098_v15 = vld [vmem:[#allocation6_spill] sm:$0xff] }
  0xbb   :  { %v399_v46 = vmul.f32 %v371_v7, %v2093_v14  ;;  %v400_v26 = vmul.f32 %v372_v43, %v2094_v29  ;;  %v2095_v47 = vunpack.c.l.bf16 %v1423_v0  ;;  %v2096_v22 = vunpack.c.l.bf16 %v1473_v18  ;;  %v2100_v7 = vld [vmem:[#allocation8_spill] sm:$0xff]  ;;  %v2104_v20 = vld [vmem:[#allocation10_spill] sm:$0xff] }
  0xbc   :  { %v381_v2 = vrot.slane %v1703_v52, 7  ;;  %v1723_v50 = vadd.f32 %v1155_v39, %v146_v59  ;;  %v373_v17 = vrot.slane %v349_v31, 1  ;;  %v376_v60 = vrot.slane %v356_v48, 1  ;;  %v2102_v39 = vld [vmem:[#allocation9_spill] sm:$0xff] }
  0xbd   :  { %v403_v11 = vmul.f32 %v374_v8, %v2095_v47  ;;  %v404_v36 = vmul.f32 %v375_v38, %v2096_v22  ;;  %v507_v35 = vrot.slane %v497_v25, %v1388_v53  ;;  %v1158_v30 = vrot.slane %v401_v10, 10  ;;  %v2110_v47 = vld [vmem:[#allocation7_spill] sm:$0xff] }
  0xbe   :  { %v1162_v28 = vrot.slane %v405_v16, 10  ;;  %v2097_v13 = vunpack.c.l.bf16 %v1490_v27  ;;  %v2099_v32 = vunpack.c.l.bf16 %v2098_v15  ;;  %v1156_v41 = vrot.slane %v399_v46, 10  ;;  %v2106_v16 = vld [vmem:[#allocation11_spill] sm:$0xff]  ;;  %v2108_v46 = vld [vmem:[#allocation5_spill] sm:$0xff] }
  0xbf   :  { %v1157_v6 = vrot.slane %v400_v26, 10  ;;  %v2101_v43 = vunpack.c.l.bf16 %v2100_v7  ;;  %v2103_v59 = vunpack.c.l.bf16 %v2102_v39  ;;  %v1160_v48 = vrot.slane %v403_v11, 10 }
  0xc0   :  { %v407_v62 = vmul.f32 %v377_v44, %v2097_v13  ;;  %v408_v5 = vmul.f32 %v378_v21, %v2099_v32  ;;  %v1161_v38 = vrot.slane %v404_v36, 10  ;;  %v2105_v10 = vunpack.c.l.bf16 %v2104_v20 }
  0xc1   :  { %v409_v8 = vmul.f32 %v1696_v33, %v2101_v43  ;;  %v411_v31 = vmul.f32 %v380_v37, %v2103_v59  ;;  %v2107_v14 = vunpack.c.l.bf16 %v2106_v16  ;;  %v379_v21 = vrot.slane %v1696_v33, 1 }
  0xc2   :  { %v412_v61 = vmul.f32 %v381_v2, %v2105_v10  ;;  %v2109_v29 = vunpack.c.l.bf16 %v2108_v46  ;;  %v2111_v22 = vunpack.c.l.bf16 %v2110_v47  ;;  %v514_v32 = vrot.slane %v497_v25, %v1391_v54 }
  0xc3   :  { %v413_v44 = vmul.f32 %v1703_v52, %v2107_v14  ;;  %v1746_v37 = vadd.f32 %v1158_v30, %v291_v42  ;;  %v1748_v11 = vadd.f32 %v1162_v28, %v295_v49  ;;  %v1164_v36 = vrot.slane %v407_v62, 10  ;;  %v500_v62 = vpop.permute.xlu0 %499 }
  0xc4   :  { %v402_v26 = vmul.f32 %v373_v17, %v2109_v29  ;;  %v406_v13 = vmul.f32 %v376_v60, %v2111_v22  ;;  %v1165_v2 = vrot.slane %v408_v5, 10  ;;  %v479_v43 = vadd.f32 %v1156_v41, %v1669_v4 }
  0xc5   :  { %v480_v59 = vadd.f32 %v1157_v6, %v1671_v23  ;;  %v1166_v10 = vrot.slane %v409_v8, 10  ;;  %v1168_v33 = vrot.slane %v411_v31, 10  ;;  %v1753_v14 = vadd.f32 %v1160_v48, %v1676_v58 }
  0xc6   :  { %v1756_v17 = vadd.f32 %v1161_v38, %v1678_v24  ;;  %v1169_v60 = vrot.slane %v412_v61, 10  ;;  %v1170_v25 = vrot.slane %v413_v44, 10  ;;  %v382_v42 = vrot.slane %v1703_v52, 1 }
  0xc7   :  { %v1159_v49 = vrot.slane %v402_v26, 10  ;;  %v1163_v30 = vrot.slane %v406_v13, 10  ;;  %v529_v28 = vrot.slane %v507_v35, 5  ;;  %v1759_v5 = vadd.f32 %v1164_v36, %v297_v40 }
  0xc8   :  { %v1761_v4 = vadd.f32 %v1165_v2, %v298_v12  ;;  %v530_v23 = vrot.slane %v507_v35, 6  ;;  %v531_v41 = vrot.slane %v507_v35, 7  ;;  %v1763_v6 = vadd.f32 %v1166_v10, %v299_v9  ;;  %v2119_v2 = vld [vmem:[#allocation14_spill] sm:$0xff] }
  0xc9   :  { %v1765_v58 = vadd.f32 %v1168_v33, %v301_v19  ;;  %v532_v24 = vrot.slane %v514_v32, 5  ;;  %v533_v8 = vrot.slane %v514_v32, 6  ;;  %v1767_v31 = vadd.f32 %v1169_v60, %v302_v45 }
  0xca   :  { %v1769_v48 = vadd.f32 %v1170_v25, %v303_v3  ;;  %v534_v52 = vrot.slane %v514_v32, 7  ;;  %v521_v38 = vrot.slane %v500_v62, %v1388_v53  ;;  %v482_v40 = vadd.f32 %v1159_v49, %v1673_v34  ;;  %v2122_v49 = vld [vmem:[#allocation15_spill] sm:$0xff] }
  0xcb   :  { %v486_v12 = vadd.f32 %v1163_v30, %v1691_v1  ;;  %v2112_v61 = vunpack.c.l.bf16 %v1396_v55  ;;  %v528_v9 = vrot.slane %v500_v62, %v1391_v54  ;;  %v2113_v19 = vunpack.c.l.bf16 %v1418_v63 }
  0xcc   :  { %v2114_v45 = vunpack.c.l.bf16 %v1384_v51  ;;  %v2115_v3 = vunpack.c.l.bf16 %v2108_v46  ;;  %v2116_v53 = vunpack.c.l.bf16 %v2110_v47  ;;  %v2117_v34 = vunpack.c.l.bf16 %v1423_v0 }
  0xcd   :  { %v557_v44 = vmul.f32 %v529_v28, %v2112_v61  ;;  %v558_v29 = vmul.f32 %v530_v23, %v2113_v19  ;;  %v2118_v55 = vunpack.c.l.bf16 %v1473_v18  ;;  %v2120_v54 = vunpack.c.l.bf16 %v2119_v2 }
  0xce   :  { %v559_v26 = vmul.f32 %v531_v41, %v2114_v45  ;;  %v560_v22 = vmul.f32 %v507_v35, %v2115_v3  ;;  %v564_v13 = vmul.f32 %v514_v32, %v2116_v53  ;;  %v561_v1 = vmul.f32 %v532_v24, %v2117_v34 }
  0xcf   :  { %v562_v36 = vmul.f32 %v533_v8, %v2118_v55  ;;  %v410_v10 = vmul.f32 %v379_v21, %v2120_v54  ;;  %v535_v63 = vrot.slane %v521_v38, 5  ;;  %v2121_v33 = vunpack.c.l.bf16 %v1401_v56 }
  0xd0   :  { %v536_v60 = vrot.slane %v521_v38, 6  ;;  %v537_v25 = vrot.slane %v521_v38, 7  ;;  %v538_v46 = vrot.slane %v528_v9, 5  ;;  %v1172_v35 = vrot.slane %v557_v44, 11 }
  0xd1   :  { %v563_v51 = vmul.f32 %v534_v52, %v2121_v33  ;;  %v2123_v47 = vunpack.c.l.bf16 %v2122_v49  ;;  %v539_v30 = vrot.slane %v528_v9, 6  ;;  %v540_v0 = vrot.slane %v528_v9, 7 }
  0xd2   :  { %v1173_v28 = vrot.slane %v558_v29, 11  ;;  %v1174_v62 = vrot.slane %v559_v26, 11  ;;  %v1175_v18 = vrot.slane %v560_v22, 11  ;;  %v1179_v23 = vrot.slane %v564_v13, 11 }
  0xd3   :  { %v414_v32 = vmul.f32 %v382_v42, %v2123_v47  ;;  %v1176_v41 = vrot.slane %v561_v1, 11  ;;  %v1177_v24 = vrot.slane %v562_v36, 11  ;;  %v1167_v21 = vrot.slane %v410_v10, 10 }
  0xd4   :  { %v2124_v8 = vunpack.c.l.bf16 %v1490_v27  ;;  %v2125_v52 = vunpack.c.l.bf16 %v2098_v15  ;;  %v2126_v44 = vunpack.c.l.bf16 %v2100_v7  ;;  %v2127_v42 = vmov %v2120_v54 }
  0xd5   :  { %v568_v45 = vmul.f32 %v521_v38, %v2127_v42  ;;  %v2128_v29 = vunpack.c.l.bf16 %v2102_v39  ;;  %v1171_v3 = vrot.slane %v414_v32, 10  ;;  %v2129_v22 = vunpack.c.l.bf16 %v2104_v20 }
  0xd6   :  { %v565_v56 = vmul.f32 %v535_v63, %v2124_v8  ;;  %v566_v61 = vmul.f32 %v536_v60, %v2125_v52  ;;  %v567_v19 = vmul.f32 %v537_v25, %v2126_v44  ;;  %v2130_v13 = vunpack.c.l.bf16 %v2106_v16 }
  0xd7   :  { %v569_v26 = vmul.f32 %v538_v46, %v2128_v29  ;;  %v570_v53 = vmul.f32 %v539_v30, %v2129_v22  ;;  %v2131_v34 = vmov %v2123_v47  ;;  %v1178_v1 = vrot.slane %v563_v51, 11  ;;  %v2143_v29 = vld [vmem:[#allocation17_spill] sm:$0xff] }
  0xd8   :  { %v571_v27 = vmul.f32 %v540_v0, %v2130_v13  ;;  %v572_v15 = vmul.f32 %v528_v9, %v2131_v34  ;;  %v637_v55 = vadd.f32 %v1172_v35, %v479_v43  ;;  %v638_v7 = vadd.f32 %v1173_v28, %v480_v59 }
  0xd9   :  { %v640_v36 = vadd.f32 %v1175_v18, %v482_v40  ;;  %v639_v2 = vadd.f32 %v1174_v62, %v1746_v37  ;;  %v644_v38 = vadd.f32 %v1179_v23, %v486_v12  ;;  %v490_v39 = vadd.f32 %v1167_v21, %v1705_v57  ;;  %v2132_v37 = vld [vmem:[#allocation12_spill] sm:$0xff]  ;;  %v1821_v57 = vld [vmem:[%s2009_s3] ss:$8 sps:$4 sm:$0xff]   ;;  %v2139_v21 = vld [vmem:[#allocation13_spill] sm:$0xff] }
  0xda   :  { %v1180_v54 = vrot.slane %v565_v56, 11  ;;  %v1181_v10 = vrot.slane %v566_v61, 11  ;;  %v1182_v63 = vrot.slane %v567_v19, 11  ;;  %v1183_v20 = vrot.slane %v568_v45, 11  ;;  %v2136_v18 = vld [vmem:[#allocation2_spill] sm:$0xff] }
  0xdb   :  { %v1184_v33 = vrot.slane %v569_v26, 11  ;;  %v494_v16 = vadd.f32 %v1171_v3, %v1723_v50  ;;  %v1185_v60 = vrot.slane %v570_v53, 11  ;;  %v1186_v25 = vrot.slane %v571_v27, 11  ;;  %v1859_v45 = vld [vmem:[%s2009_s3 + $0x10] ss:$8 sps:$4 sm:$0xff]  }
  0xdc   :  { %v1187_v46 = vrot.slane %v572_v15, 11  ;;  %v641_v9 = vadd.f32 %v1176_v41, %v1753_v14  ;;  %v642_v43 = vadd.f32 %v1177_v24, %v1756_v17  ;;  %v643_v59 = vadd.f32 %v1178_v1, %v1748_v11  ;;  %v1833_v11 = vld [vmem:[%s2009_s3 + $0x4] ss:$8 sps:$4 sm:$0xff]   ;;  %v2138_v41 = vld [vmem:[#allocation16_spill] sm:$0xff] }
  0xdd   :  { %v825_v40 = vadd.f32 %v2132_v37, %v637_v55  ;;  %v645_v12 = vadd.f32 %v1180_v54, %v1759_v5  ;;  %v2133_v50 = vrot.slane %v2132_v37, 1  ;;  %v2134_v35 = vrot.slane %v2132_v37, 2  ;;  %v1870_v27 = vld [vmem:[%s2009_s3 + $0x14] ss:$8 sps:$4 sm:$0xff]  }
  0xde   :  { %v2135_v14 = vrot.slane %v2132_v37, 3  ;;  %v646_v47 = vadd.f32 %v1181_v10, %v1761_v4  ;;  %v647_v32 = vadd.f32 %v1182_v63, %v1763_v6  ;;  %v648_v30 = vadd.f32 %v1183_v20, %v490_v39 }
  0xdf   :  { %v826_v51 = vadd.f32 %v2133_v50, %v638_v7  ;;  %v827_v49 = vadd.f32 %v2134_v35, %v639_v2  ;;  %v649_v5 = vadd.f32 %v1184_v33, %v1765_v58  ;;  %v650_v0 = vadd.f32 %v1185_v60, %v1767_v31 }
  0xe0   :  { %v828_v17 = vadd.f32 %v2135_v14, %v640_v36  ;;  %v651_v28 = vadd.f32 %v1186_v25, %v1769_v48  ;;  %v652_v62 = vadd.f32 %v1187_v46, %v494_v16  ;;  %v2137_v23 = vsub.s32 1, %v2136_v18 }
  0xe1   :  { %v829_v8 = vadd.f32 %v2139_v21, %v641_v9  ;;  %v2140_v56 = vrot.slane %v2139_v21, 1  ;;  %v2141_v6 = vrot.slane %v2139_v21, 2  ;;  %v905_v58 = vrot.slane %v1821_v57, 1 }
  0xe2   :  { %v1843_v24 = vrot.slane %v2138_v41, %v2137_v23  ;;  %v2142_v31 = vrot.slane %v2139_v21, 3  ;;  %v906_v44 = vrot.slane %v1821_v57, 2  ;;  %v907_v19 = vrot.slane %v1821_v57, 3 }
  0xe3   :  { %v830_v4 = vadd.f32 %v2140_v56, %v642_v43  ;;  %v831_v52 = vadd.f32 %v2141_v6, %v643_v59  ;;  %v908_v42 = vrot.slane %v1833_v11, 1  ;;  %v909_v22 = vrot.slane %v1833_v11, 2 }
  0xe4   :  { %v832_v48 = vadd.f32 %v2142_v31, %v644_v38  ;;  %v910_v53 = vrot.slane %v1833_v11, 3  ;;  %v1865_v13 = vadd.f32 %v2132_v37, %v645_v12  ;;  %v2144_v1 = vmov %v2133_v50 }
  0xe5   :  { %v1875_v55 = vadd.f32 %v2144_v1, %v646_v47  ;;  %v2145_v7 = vmov %v2134_v35  ;;  %v2146_v2 = vmov %v2135_v14  ;;  %v1886_v54 = vadd.f32 %v2139_v21, %v649_v5 }
  0xe6   :  { %v1879_v36 = vadd.f32 %v2145_v7, %v647_v32  ;;  %v1883_v38 = vadd.f32 %v2146_v2, %v648_v30  ;;  %v2147_v10 = vmov %v2140_v56  ;;  %v2148_v20 = vmov %v2141_v6 }
  0xe7   :  { %v1890_v63 = vadd.f32 %v2147_v10, %v650_v0  ;;  %v1894_v33 = vadd.f32 %v2148_v20, %v651_v28  ;;  %v2149_v16 = vmov %v2142_v31  ;;  %v911_v9 = vrot.slane %v1859_v45, 1 }
  0xe8   :  { %v1898_v60 = vadd.f32 %v2149_v16, %v652_v62  ;;  %v912_v43 = vrot.slane %v1859_v45, 2  ;;  %v913_v59 = vrot.slane %v1859_v45, 3  ;;  %v914_v37 = vrot.slane %v1870_v27, 1 }
  0xe9   :  { %v915_v12 = vrot.slane %v1870_v27, 2  ;;  %v916_v50 = vrot.slane %v1870_v27, 3 }
 0x171   :  { %v790_v61 = vpop.f32.mrb[0].mxu0 }
 0x172   :  { %v791_v26 = vadd.f32 %v790_v61, %v2143_v29  ;;  %v792_v3 = vpop.f32.mrb[1].mxu0 }
 0x173   :  { %v793_v34 = vadd.f32 %v792_v3, %v1843_v24  ;;  %v794_v15 = vpop.f32.mrb[2].mxu0 }
 0x174   :  { %v796_v39 = vpop.f32.mrb[3].mxu0 }
 0x175   :  { %v845_v25 = vcombine.low %v791_v26, %v793_v34  ;;  %v846_v46 = vcombine.high %v791_v26, %v793_v34 }
 0x177   :  { %v849_v35 = vrot.slane %v845_v25, 1  ;;  %v850_v14 = vrot.slane %v845_v25, 2  ;;  %v851_v47 = vrot.slane %v845_v25, 3  ;;  %v852_v32 = vrot.slane %v846_v46, 1 }
 0x178   :  { %v853_v30 = vrot.slane %v846_v46, 2  ;;  %v854_v5 = vrot.slane %v846_v46, 3  ;;  %v877_v0 = vadd.f32 %v845_v25, %v825_v40  ;;  %v881_v28 = vadd.f32 %v846_v46, %v829_v8 }
 0x179   :  { %v878_v62 = vadd.f32 %v849_v35, %v826_v51  ;;  %v879_v18 = vadd.f32 %v850_v14, %v827_v49  ;;  %v880_v23 = vadd.f32 %v851_v47, %v828_v17  ;;  %v882_v41 = vadd.f32 %v852_v32, %v830_v4  ;;  %v2150_v17 = vld [vmem:[#allocation3_spill] sm:$0xff] }
 0x17a   :  { %v883_v21 = vadd.f32 %v853_v30, %v831_v52  ;;  %v884_v56 = vadd.f32 %v854_v5, %v832_v48  ;;  %v933_v6 = vadd.f32 %v1821_v57, %v877_v0  ;;  %v937_v61 = vadd.f32 %v1833_v11, %v881_v28  ;;  %v2151_v52 = vld [vmem:[#allocation4_spill] sm:$0xff] }
 0x17b   :  { %v934_v31 = vadd.f32 %v905_v58, %v878_v62  ;;  %v935_v26 = vadd.f32 %v906_v44, %v879_v18  ;;  %v936_v3 = vadd.f32 %v907_v19, %v880_v23  ;;  %v938_v34 = vadd.f32 %v908_v42, %v882_v41 }
 0x17c   :  { %v939_v40 = vadd.f32 %v909_v22, %v883_v21  ;;  %v940_v8 = vadd.f32 %v910_v53, %v884_v56  ;;  %v795_v51 = vadd.f32 %v794_v15, %v2143_v29  ;;  %v797_v49 = vadd.f32 %v796_v39, %v1843_v24 }
 0x17d   :  { %v976_v4 = vrot.slane %v934_v31, %v2150_v17  ;;  %v980_v48 = vrot.slane %v934_v31, %v2151_v52  ;;  %v984_v57 = vrot.slane %v935_v26, %v2150_v17  ;;  %v988_v11 = vrot.slane %v935_v26, %v2151_v52 }
 0x17e   :  { %v968_v58 = vrot.slane %v933_v6, %v2150_v17  ;;  %v972_v44 = vrot.slane %v933_v6, %v2151_v52  ;;  %v992_v19 = vrot.slane %v936_v3, %v2150_v17  ;;  %v996_v42 = vrot.slane %v936_v3, %v2151_v52 }
 0x17f   :  { %v1000_v29 = vrot.slane %v937_v61, %v2150_v17  ;;  %v1004_v24 = vrot.slane %v937_v61, %v2151_v52  ;;  %v1008_v22 = vrot.slane %v938_v34, %v2150_v17  ;;  %v1012_v53 = vrot.slane %v938_v34, %v2151_v52 }
 0x180   :  { %v1016_v15 = vrot.slane %v939_v40, %v2150_v17  ;;  %v1020_v1 = vrot.slane %v939_v40, %v2151_v52  ;;  %v1094_v7 = vsel %vm1093_vm1, %v976_v4, %v968_v58  ;;  %v1107_v2 = vsel %vm1093_vm1, %v980_v48, %v972_v44 }
 0x181   :  { %v1096_v39 = vsel %vm1095_vm2, %v984_v57, %v1094_v7  ;;  %v1108_v10 = vsel %vm1095_vm2, %v988_v11, %v1107_v2  ;;  %v847_v20 = vcombine.low %v795_v51, %v797_v49  ;;  %v848_v16 = vcombine.high %v795_v51, %v797_v49 }
 0x182   :  { %v1024_v25 = vrot.slane %v940_v8, %v2150_v17  ;;  %v1028_v46 = vrot.slane %v940_v8, %v2151_v52  ;;  %v1098_v35 = vsel %vm1097_vm3, %v992_v19, %v1096_v39  ;;  %v1109_v14 = vsel %vm1097_vm3, %v996_v42, %v1108_v10 }
 0x183   :  { %v1100_v47 = vsel %vm1099_vm4, %v1000_v29, %v1098_v35  ;;  %v1110_v32 = vsel %vm1099_vm4, %v1004_v24, %v1109_v14  ;;  %v855_v30 = vrot.slane %v847_v20, 1  ;;  %v856_v5 = vrot.slane %v847_v20, 2 }
 0x184   :  { %v1102_v0 = vsel %vm1101_vm5, %v1008_v22, %v1100_v47  ;;  %v1111_v28 = vsel %vm1101_vm5, %v1012_v53, %v1110_v32  ;;  %v857_v62 = vrot.slane %v847_v20, 3  ;;  %v858_v18 = vrot.slane %v848_v16, 1 }
 0x185   :  { %v1104_v23 = vsel %vm1103_vm6, %v1016_v15, %v1102_v0  ;;  %v1112_v41 = vsel %vm1103_vm6, %v1020_v1, %v1111_v28  ;;  %v859_v21 = vrot.slane %v848_v16, 2  ;;  %v860_v56 = vrot.slane %v848_v16, 3 }
 0x186   :  { %v1106_v6 = vsel %vm1105_vm7, %v1024_v25, %v1104_v23  ;;  %v1113_v61 = vsel %vm1105_vm7, %v1028_v46, %v1112_v41  ;;  %v885_v31 = vadd.f32 %v847_v20, %v1865_v13  ;;  %v886_v26 = vadd.f32 %v855_v30, %v1875_v55 }
 0x187   :  { %1132 = vst [vmem:[%s2013_s9] sm:$0xff] %v1106_v6  ;;  %1133 = vst [vmem:[%s2013_s9 + $0x8] sm:$0xff] %v1113_v61  ;;  %v887_v3 = vadd.f32 %v856_v5, %v1879_v36  ;;  %v888_v34 = vadd.f32 %v857_v62, %v1883_v38  ;;  %v889_v40 = vadd.f32 %v848_v16, %v1886_v54 }
 0x188   :  { %v890_v8 = vadd.f32 %v858_v18, %v1890_v63  ;;  %v891_v13 = vadd.f32 %v859_v21, %v1894_v33  ;;  %v892_v55 = vadd.f32 %v860_v56, %v1898_v60  ;;  %v941_v51 = vadd.f32 %v1859_v45, %v885_v31 }
 0x189   :  { %v942_v49 = vadd.f32 %v911_v9, %v886_v26  ;;  %v943_v4 = vadd.f32 %v912_v43, %v887_v3  ;;  %v944_v36 = vadd.f32 %v913_v59, %v888_v34  ;;  %v945_v38 = vadd.f32 %v1870_v27, %v889_v40 }
 0x18a   :  { %v946_v54 = vadd.f32 %v914_v37, %v890_v8  ;;  %v947_v63 = vadd.f32 %v915_v12, %v891_v13  ;;  %v948_v33 = vadd.f32 %v916_v50, %v892_v55  ;;  %v1032_v59 = vrot.slane %v941_v51, %v2150_v17 }
 0x18b   :  { %v1040_v60 = vrot.slane %v942_v49, %v2150_v17  ;;  %v1044_v9 = vrot.slane %v942_v49, %v2151_v52  ;;  %v1048_v43 = vrot.slane %v943_v4, %v2150_v17  ;;  %v1052_v45 = vrot.slane %v943_v4, %v2151_v52 }
 0x18c   :  { %v1036_v48 = vrot.slane %v941_v51, %v2151_v52  ;;  %v1056_v37 = vrot.slane %v944_v36, %v2150_v17  ;;  %v1060_v57 = vrot.slane %v944_v36, %v2151_v52  ;;  %v1064_v50 = vrot.slane %v945_v38, %v2150_v17 }
 0x18d   :  { %v1114_v12 = vsel %vm1093_vm1, %v1040_v60, %v1032_v59  ;;  %v1068_v11 = vrot.slane %v945_v38, %v2151_v52  ;;  %v1072_v19 = vrot.slane %v946_v54, %v2150_v17  ;;  %v1076_v42 = vrot.slane %v946_v54, %v2151_v52 }
 0x18e   :  { %v1121_v27 = vsel %vm1093_vm1, %v1044_v9, %v1036_v48  ;;  %v1115_v58 = vsel %vm1095_vm2, %v1048_v43, %v1114_v12  ;;  %v1080_v22 = vrot.slane %v947_v63, %v2150_v17  ;;  %v1084_v53 = vrot.slane %v947_v63, %v2151_v52 }
 0x18f   :  { %v1122_v44 = vsel %vm1095_vm2, %v1052_v45, %v1121_v27  ;;  %v1116_v29 = vsel %vm1097_vm3, %v1056_v37, %v1115_v58  ;;  %v1088_v7 = vrot.slane %v948_v33, %v2150_v17  ;;  %v1092_v2 = vrot.slane %v948_v33, %v2151_v52 }
 0x190   :  { %v1123_v24 = vsel %vm1097_vm3, %v1060_v57, %v1122_v44  ;;  %v1117_v15 = vsel %vm1099_vm4, %v1064_v50, %v1116_v29 }
 0x191   :  { %v1124_v1 = vsel %vm1099_vm4, %v1068_v11, %v1123_v24  ;;  %v1118_v39 = vsel %vm1101_vm5, %v1072_v19, %v1117_v15 }
 0x192   :  { %v1125_v10 = vsel %vm1101_vm5, %v1076_v42, %v1124_v1  ;;  %v1119_v20 = vsel %vm1103_vm6, %v1080_v22, %v1118_v39 }
 0x193   :  { %v1126_v16 = vsel %vm1103_vm6, %v1084_v53, %v1125_v10  ;;  %v1120_v25 = vsel %vm1105_vm7, %v1088_v7, %v1119_v20 }
 0x194   :  { %v1127_v46 = vsel %vm1105_vm7, %v1092_v2, %v1126_v16  ;;  %1134 = vst [vmem:[%s2013_s9 + $0x10] sm:$0xff] %v1120_v25 }
 0x195   :  { %1135 = vst [vmem:[%s2013_s9 + $0x18] sm:$0xff] %v1127_v46 }

// kernel: transformer_time_emb_forward.9
= control target key start
LH: loop header
LB: loop body
LE: loop exit
PB: predicated region body
PF: predicated region fallthrough
CT: control target
= control target key end

     0   :  { %s1406_s1 = inlined_call_operand.vmem [shape: bf16[256,768], index: 1, kind: input, shape index: {}]   ;;  %s1407_s0 = inlined_call_operand.vmem [shape: f32[16,256], index: 0, kind: input, shape index: {}]   ;;  %s1408_s2 = inlined_call_operand.vmem [shape: f32[1,768], index: 2, kind: input, shape index: {}]   ;;  %s1409_s3 = inlined_call_operand.vmem [shape: bf16[16,768], index: 3, kind: output, shape index: {}]  }
   0x1   :  { %v911_v0 = vld [vmem:[%s1406_s1 + $0x4] ss:$24 sps:$4 sm:$0xff]   ;;  %v913_v1 = vld [vmem:[%s1406_s1] ss:$24 sps:$4 sm:$0xff]   ;;  %v914_v2 = vld [vmem:[%s1406_s1 + $0x34] ss:$24 sps:$4 sm:$0xff]  }
   0x2   :  { %628 = vmatprep.subr.bf16.mxu0 %v911_v0  ;;  %v916_v3 = vld [vmem:[%s1406_s1 + $0x30] ss:$24 sps:$4 sm:$0xff]   ;;  %v917_v4 = vld [vmem:[%s1406_s1 + $0x64] ss:$24 sps:$4 sm:$0xff]   ;;  %v919_v5 = vld [vmem:[%s1406_s1 + $0x60] ss:$24 sps:$4 sm:$0xff]  }
   0x3   :  { %629 = vmatpush1.bf16.msra.mxu0 %v913_v1  ;;  %v920_v6 = vld [vmem:[%s1406_s1 + $0x94] ss:$24 sps:$4 sm:$0xff]   ;;  %v922_v7 = vld [vmem:[%s1406_s1 + $0x90] ss:$24 sps:$4 sm:$0xff]   ;;  %v923_v8 = vld [vmem:[%s1406_s1 + $0xc4] ss:$24 sps:$4 sm:$0xff]  }
   0x4   :  { %630 = vmatprep.subr.bf16.mxu0 %v914_v2  ;;  %v925_v9 = vld [vmem:[%s1406_s1 + $0xc0] ss:$24 sps:$4 sm:$0xff]   ;;  %v926_v10 = vld [vmem:[%s1406_s1 + $0xf4] ss:$24 sps:$4 sm:$0xff]   ;;  %v928_v11 = vld [vmem:[%s1406_s1 + $0xf0] ss:$24 sps:$4 sm:$0xff]  }
   0x5   :  { %v929_v12 = vld [vmem:[%s1406_s1 + $0x124] ss:$24 sps:$4 sm:$0xff]   ;;  %v961_v14 = vld [vmem:[%s1406_s1 + $0x8] ss:$24 sps:$4 sm:$0xff]   ;;  %v932_v18 = vld [vmem:[%s1406_s1 + $0x154] ss:$24 sps:$4 sm:$0xff]  }
   0x6   :  { %v959_v13 = vld [vmem:[%s1406_s1 + $0xc] ss:$24 sps:$4 sm:$0xff]   ;;  %v931_v16 = vld [vmem:[%s1406_s1 + $0x120] ss:$24 sps:$4 sm:$0xff]   ;;  %v965_v20 = vld [vmem:[%s1406_s1 + $0x3c] ss:$24 sps:$4 sm:$0xff]  }
   0x7   :  { %631 = vmatpush1.bf16.msra.mxu0 %v916_v3  ;;  %v15_v15 = vld [vmem:[%s1407_s0 + $0x8] sm:$0xff]  ;;  %v17_v17 = vld [vmem:[%s1407_s0 + $0x18] sm:$0xff]  ;;  %671 = vmatprep.subr.bf16.mxu1 %v959_v13  ;;  %v14_v56 = vld [vmem:[%s1407_s0] sm:$0xff] }
   0x8   :  { %632 = vmatprep.subr.bf16.mxu0 %v917_v4  ;;  %v1132_v19 = vpack.c.bf16 %v17_v17, %v15_v15  ;;  %672 = vmatpush1.bf16.msra.mxu1 %v961_v14  ;;  %v967_v21 = vld [vmem:[%s1406_s1 + $0x38] ss:$24 sps:$4 sm:$0xff]   ;;  %v935_v23 = vld [vmem:[%s1406_s1 + $0x184] ss:$24 sps:$4 sm:$0xff]   ;;  %v973_v25 = vld [vmem:[%s1406_s1 + $0x68] ss:$24 sps:$4 sm:$0xff]  }
   0x9   :  { %v934_v22 = vld [vmem:[%s1406_s1 + $0x150] ss:$24 sps:$4 sm:$0xff]   ;;  %673 = vmatprep.subr.bf16.mxu1 %v965_v20  ;;  %v971_v24 = vld [vmem:[%s1406_s1 + $0x6c] ss:$24 sps:$4 sm:$0xff]   ;;  %v937_v26 = vld [vmem:[%s1406_s1 + $0x180] ss:$24 sps:$4 sm:$0xff]  }
   0xa   :  { %660 = vmatprep.mubr.bf16.mxu0 %v1132_v19  ;;  %703 = vmatprep.mubr.bf16.mxu1 %v1132_v19  ;;  %v977_v27 = vld [vmem:[%s1406_s1 + $0x9c] ss:$24 sps:$4 sm:$0xff]   ;;  %v979_v29 = vld [vmem:[%s1406_s1 + $0x98] ss:$24 sps:$4 sm:$0xff]   ;;  %v983_v30 = vld [vmem:[%s1406_s1 + $0xcc] ss:$24 sps:$4 sm:$0xff]  }
   0xb   :  { %633 = vmatpush1.bf16.msra.mxu0 %v919_v5  ;;  %v938_v28 = vld [vmem:[%s1406_s1 + $0x1b4] ss:$24 sps:$4 sm:$0xff]   ;;  %v940_v31 = vld [vmem:[%s1406_s1 + $0x1b0] ss:$24 sps:$4 sm:$0xff]   ;;  %v941_v32 = vld [vmem:[%s1406_s1 + $0x1e4] ss:$24 sps:$4 sm:$0xff]  }
   0xc   :  { %634 = vmatprep.subr.bf16.mxu0 %v920_v6  ;;  %674 = vmatpush1.bf16.msra.mxu1 %v967_v21  ;;  %v985_v33 = vld [vmem:[%s1406_s1 + $0xc8] ss:$24 sps:$4 sm:$0xff]   ;;  %v989_v34 = vld [vmem:[%s1406_s1 + $0xfc] ss:$24 sps:$4 sm:$0xff]   ;;  %v991_v37 = vld [vmem:[%s1406_s1 + $0xf8] ss:$24 sps:$4 sm:$0xff]  }
   0xd   :  { %675 = vmatprep.subr.bf16.mxu1 %v971_v24  ;;  %v943_v35 = vld [vmem:[%s1406_s1 + $0x1e0] ss:$24 sps:$4 sm:$0xff]   ;;  %v944_v36 = vld [vmem:[%s1406_s1 + $0x214] ss:$24 sps:$4 sm:$0xff]   ;;  %v946_v39 = vld [vmem:[%s1406_s1 + $0x210] ss:$24 sps:$4 sm:$0xff]  }
   0xe   :  { %v995_v38 = vld [vmem:[%s1406_s1 + $0x12c] ss:$24 sps:$4 sm:$0xff]   ;;  %v997_v41 = vld [vmem:[%s1406_s1 + $0x128] ss:$24 sps:$4 sm:$0xff]   ;;  %v1001_v42 = vld [vmem:[%s1406_s1 + $0x15c] ss:$24 sps:$4 sm:$0xff]  }
   0xf   :  { %635 = vmatpush1.bf16.msra.mxu0 %v922_v7  ;;  %v947_v40 = vld [vmem:[%s1406_s1 + $0x244] ss:$24 sps:$4 sm:$0xff]   ;;  %v949_v43 = vld [vmem:[%s1406_s1 + $0x240] ss:$24 sps:$4 sm:$0xff]   ;;  %v950_v44 = vld [vmem:[%s1406_s1 + $0x274] ss:$24 sps:$4 sm:$0xff]  }
  0x10   :  { %636 = vmatprep.subr.bf16.mxu0 %v923_v8  ;;  %676 = vmatpush1.bf16.msra.mxu1 %v973_v25  ;;  %v1003_v45 = vld [vmem:[%s1406_s1 + $0x158] ss:$24 sps:$4 sm:$0xff]   ;;  %v1007_v46 = vld [vmem:[%s1406_s1 + $0x18c] ss:$24 sps:$4 sm:$0xff]   ;;  %v1009_v49 = vld [vmem:[%s1406_s1 + $0x188] ss:$24 sps:$4 sm:$0xff]  }
  0x11   :  { %677 = vmatprep.subr.bf16.mxu1 %v977_v27  ;;  %v952_v47 = vld [vmem:[%s1406_s1 + $0x270] ss:$24 sps:$4 sm:$0xff]   ;;  %v953_v48 = vld [vmem:[%s1406_s1 + $0x2a4] ss:$24 sps:$4 sm:$0xff]   ;;  %v955_v51 = vld [vmem:[%s1406_s1 + $0x2a0] ss:$24 sps:$4 sm:$0xff]  }
  0x12   :  { %v1013_v50 = vld [vmem:[%s1406_s1 + $0x1bc] ss:$24 sps:$4 sm:$0xff]   ;;  %v1015_v53 = vld [vmem:[%s1406_s1 + $0x1b8] ss:$24 sps:$4 sm:$0xff]   ;;  %v1019_v55 = vld [vmem:[%s1406_s1 + $0x1ec] ss:$24 sps:$4 sm:$0xff]  }
  0x13   :  { %637 = vmatpush1.bf16.msra.mxu0 %v925_v9  ;;  %v956_v52 = vld [vmem:[%s1406_s1 + $0x2d4] ss:$24 sps:$4 sm:$0xff]   ;;  %v958_v54 = vld [vmem:[%s1406_s1 + $0x2d0] ss:$24 sps:$4 sm:$0xff]   ;;  %v970_v63 = vld [vmem:[%s1406_s1 + $0x44] ss:$24 sps:$4 sm:$0xff]  }
  0x14   :  { %638 = vmatprep.subr.bf16.mxu0 %v926_v10  ;;  %678 = vmatpush1.bf16.msra.mxu1 %v979_v29  ;;  %v16_v57 = vld [vmem:[%s1407_s0 + $0x10] sm:$0xff]  ;;  %v1021_v59 = vld [vmem:[%s1406_s1 + $0x1e8] ss:$24 sps:$4 sm:$0xff]   ;;  %v1031_v1 = vld [vmem:[%s1406_s1 + $0x24c] ss:$24 sps:$4 sm:$0xff]  }
  0x15   :  { %679 = vmatprep.subr.bf16.mxu1 %v983_v30  ;;  %v964_v58 = vld [vmem:[%s1406_s1 + $0x14] ss:$24 sps:$4 sm:$0xff]   ;;  %v1256_v60 = vpack.c.bf16 %v16_v57, %v14_v56  ;;  %v962_v62 = vld [vmem:[%s1406_s1 + $0x10] ss:$24 sps:$4 sm:$0xff]   ;;  %v968_v2 = vld [vmem:[%s1406_s1 + $0x40] ss:$24 sps:$4 sm:$0xff]  }
  0x16   :  { %v1025_v61 = vld [vmem:[%s1406_s1 + $0x21c] ss:$24 sps:$4 sm:$0xff]   ;;  %v1027_v0 = vld [vmem:[%s1406_s1 + $0x218] ss:$24 sps:$4 sm:$0xff]   ;;  %v1033_v4 = vld [vmem:[%s1406_s1 + $0x248] ss:$24 sps:$4 sm:$0xff]  }
  0x17   :  { %639 = vmatpush1.bf16.msra.mxu0 %v928_v11  ;;  %v976_v3 = vld [vmem:[%s1406_s1 + $0x74] ss:$24 sps:$4 sm:$0xff]   ;;  %v974_v6 = vld [vmem:[%s1406_s1 + $0x70] ss:$24 sps:$4 sm:$0xff]   ;;  %v982_v7 = vld [vmem:[%s1406_s1 + $0xa4] ss:$24 sps:$4 sm:$0xff]  }
  0x18   :  { %640 = vmatprep.subr.bf16.mxu0 %v929_v12  ;;  %680 = vmatpush1.bf16.msra.mxu1 %v985_v33  ;;  %v1037_v5 = vld [vmem:[%s1406_s1 + $0x27c] ss:$24 sps:$4 sm:$0xff]   ;;  %v1039_v8 = vld [vmem:[%s1406_s1 + $0x278] ss:$24 sps:$4 sm:$0xff]   ;;  %v1043_v9 = vld [vmem:[%s1406_s1 + $0x2ac] ss:$24 sps:$4 sm:$0xff]  }
  0x19   :  { %681 = vmatprep.subr.bf16.mxu1 %v989_v34  ;;  %v980_v10 = vld [vmem:[%s1406_s1 + $0xa0] ss:$24 sps:$4 sm:$0xff]   ;;  %v988_v11 = vld [vmem:[%s1406_s1 + $0xd4] ss:$24 sps:$4 sm:$0xff]   ;;  %v986_v14 = vld [vmem:[%s1406_s1 + $0xd0] ss:$24 sps:$4 sm:$0xff]  }
  0x1a   :  { %v1045_v12 = vld [vmem:[%s1406_s1 + $0x2a8] ss:$24 sps:$4 sm:$0xff]   ;;  %v1049_v13 = vld [vmem:[%s1406_s1 + $0x2dc] ss:$24 sps:$4 sm:$0xff]  }
  0x1b   :  { %641 = vmatpush1.bf16.msra.mxu0 %v931_v16  ;;  %v994_v15 = vld [vmem:[%s1406_s1 + $0x104] ss:$24 sps:$4 sm:$0xff]   ;;  %v1051_v16 = vld [vmem:[%s1406_s1 + $0x2d8] ss:$24 sps:$4 sm:$0xff]   ;;  %v1036_v30 = vld [vmem:[%s1406_s1 + $0x254] ss:$24 sps:$4 sm:$0xff]  }
  0x1c   :  { %642 = vmatprep.subr.bf16.mxu0 %v932_v18  ;;  %682 = vmatpush1.bf16.msra.mxu1 %v991_v37  ;;  %v992_v17 = vld [vmem:[%s1406_s1 + $0x100] ss:$24 sps:$4 sm:$0xff]   ;;  %v1000_v18 = vld [vmem:[%s1406_s1 + $0x134] ss:$24 sps:$4 sm:$0xff]   ;;  %v1006_v20 = vld [vmem:[%s1406_s1 + $0x164] ss:$24 sps:$4 sm:$0xff]  }
  0x1d   :  { %683 = vmatprep.subr.bf16.mxu1 %v995_v38  ;;  %v1004_v21 = vld [vmem:[%s1406_s1 + $0x160] ss:$24 sps:$4 sm:$0xff]   ;;  %v1018_v24 = vld [vmem:[%s1406_s1 + $0x1c4] ss:$24 sps:$4 sm:$0xff]   ;;  %v1022_v27 = vld [vmem:[%s1406_s1 + $0x1f0] ss:$24 sps:$4 sm:$0xff]   ;;  %v118_v38 = vlaneseq }
  0x1e   :  { %v1016_v25 = vld [vmem:[%s1406_s1 + $0x1c0] ss:$24 sps:$4 sm:$0xff]   ;;  %v1048_v34 = vld [vmem:[%s1406_s1 + $0x2b4] ss:$24 sps:$4 sm:$0xff]  }
  0x1f   :  { %643 = vmatpush1.bf16.msra.mxu0 %v934_v22  ;;  %v1012_v22 = vld [vmem:[%s1406_s1 + $0x194] ss:$24 sps:$4 sm:$0xff]   ;;  %v1028_v29 = vld [vmem:[%s1406_s1 + $0x220] ss:$24 sps:$4 sm:$0xff]  }
  0x20   :  { %644 = vmatprep.subr.bf16.mxu0 %v935_v23  ;;  %684 = vmatpush1.bf16.msra.mxu1 %v997_v41  ;;  %v1010_v23 = vld [vmem:[%s1406_s1 + $0x190] ss:$24 sps:$4 sm:$0xff]   ;;  %v1040_v33 = vld [vmem:[%s1406_s1 + $0x280] ss:$24 sps:$4 sm:$0xff]  }
  0x21   :  { %685 = vmatprep.subr.bf16.mxu1 %v1001_v42  ;;  %v1052_v37 = vld [vmem:[%s1406_s1 + $0x2e0] ss:$24 sps:$4 sm:$0xff]  }
  0x22   :  { %v116_v41 = vld [vmem:[%s1408_s2] sm:$0x3f] }
  0x23   :  { %645 = vmatpush1.bf16.msra.mxu0 %v937_v26  ;;  %v1024_v26 = vld [vmem:[%s1406_s1 + $0x1f4] ss:$24 sps:$4 sm:$0xff]  }
  0x24   :  { %646 = vmatprep.subr.bf16.mxu0 %v938_v28  ;;  %686 = vmatpush1.bf16.msra.mxu1 %v1003_v45  ;;  %v1030_v28 = vld [vmem:[%s1406_s1 + $0x224] ss:$24 sps:$4 sm:$0xff]  }
  0x25   :  { %687 = vmatprep.subr.bf16.mxu1 %v1007_v46 }
  0x27   :  { %647 = vmatpush1.bf16.msra.mxu0 %v940_v31  ;;  %v1034_v31 = vld [vmem:[%s1406_s1 + $0x250] ss:$24 sps:$4 sm:$0xff]  }
  0x28   :  { %648 = vmatprep.subr.bf16.mxu0 %v941_v32  ;;  %688 = vmatpush1.bf16.msra.mxu1 %v1009_v49  ;;  %v1042_v32 = vld [vmem:[%s1406_s1 + $0x284] ss:$24 sps:$4 sm:$0xff]  }
  0x29   :  { %689 = vmatprep.subr.bf16.mxu1 %v1013_v50 }
  0x2b   :  { %649 = vmatpush1.bf16.msra.mxu0 %v943_v35  ;;  %v1046_v35 = vld [vmem:[%s1406_s1 + $0x2b0] ss:$24 sps:$4 sm:$0xff]  }
  0x2c   :  { %650 = vmatprep.subr.bf16.mxu0 %v944_v36  ;;  %690 = vmatpush1.bf16.msra.mxu1 %v1015_v53  ;;  %v1054_v36 = vld [vmem:[%s1406_s1 + $0x2e4] ss:$24 sps:$4 sm:$0xff]  }
  0x2d   :  { %691 = vmatprep.subr.bf16.mxu1 %v1019_v55 }
  0x2f   :  { %651 = vmatpush1.bf16.msra.mxu0 %v946_v39  ;;  %v119_v39 = vshrl.u32 %v118_v38, 7 }
  0x30   :  { %652 = vmatprep.subr.bf16.mxu0 %v947_v40  ;;  %692 = vmatpush1.bf16.msra.mxu1 %v1021_v59 }
  0x31   :  { %693 = vmatprep.subr.bf16.mxu1 %v1025_v61  ;;  %v136_v40 = vsub.s32 4, %v119_v39  ;;  %v120_v45 = vsub.s32 0, %v119_v39  ;;  %v124_v46 = vsub.s32 1, %v119_v39  ;;  %v128_v59 = vsub.s32 2, %v119_v39 }
  0x33   :  { %653 = vmatpush1.bf16.msra.mxu0 %v949_v43  ;;  %v137_v42 = vrot.slane %v116_v41, %v136_v40  ;;  %v140_v43 = vsub.s32 5, %v119_v39  ;;  %v129_v61 = vrot.slane %v116_v41, %v128_v59 }
  0x34   :  { %654 = vmatprep.subr.bf16.mxu0 %v950_v44  ;;  %694 = vmatpush1.bf16.msra.mxu1 %v1027_v0 }
  0x35   :  { %695 = vmatprep.subr.bf16.mxu1 %v1031_v1  ;;  %v141_v44 = vrot.slane %v116_v41, %v140_v43 }
  0x37   :  { %655 = vmatpush1.bf16.msra.mxu0 %v952_v47  ;;  %v121_v47 = vrot.slane %v116_v41, %v120_v45 }
  0x38   :  { %656 = vmatprep.subr.bf16.mxu0 %v953_v48  ;;  %696 = vmatpush1.bf16.msra.mxu1 %v1033_v4  ;;  %v125_v48 = vrot.slane %v116_v41, %v124_v46 }
  0x39   :  { %697 = vmatprep.subr.bf16.mxu1 %v1037_v5 }
  0x3b   :  { %657 = vmatpush1.bf16.msra.mxu0 %v955_v51 }
  0x3c   :  { %658 = vmatprep.subr.bf16.mxu0 %v956_v52  ;;  %698 = vmatpush1.bf16.msra.mxu1 %v1039_v8 }
  0x3d   :  { %699 = vmatprep.subr.bf16.mxu1 %v1043_v9 }
  0x3f   :  { %659 = vmatpush1.bf16.msra.mxu0 %v958_v54 }
  0x40   :  { %714 = vmatprep.subr.bf16.mxu0 %v964_v58  ;;  %700 = vmatpush1.bf16.msra.mxu1 %v1045_v12 }
  0x41   :  { %701 = vmatprep.subr.bf16.mxu1 %v1049_v13 }
  0x42   :  { %661 = vmatmul.mubr.bf16.vlgmr.msra.gmra.mrb[0].mxu0 %v1256_v60 }
  0x43   :  { %715 = vmatpush1.bf16.msra.mxu0 %v962_v62  ;;  %746 = vmatprep.mubr.bf16.mxu0 %v1132_v19  ;;  %v998_v19 = vld [vmem:[%s1406_s1 + $0x130] ss:$24 sps:$4 sm:$0xff]  }
  0x44   :  { %716 = vmatprep.subr.bf16.mxu0 %v970_v63  ;;  %702 = vmatpush1.bf16.msra.mxu1 %v1051_v16 }
  0x47   :  { %717 = vmatpush1.bf16.msra.mxu0 %v968_v2  ;;  %704 = vmatmul.mubr.bf16.vlgmr.msra.gmra.mrb[0].mxu1 %v1256_v60 }
  0x48   :  { %718 = vmatprep.subr.bf16.mxu0 %v976_v3 }
  0x4b   :  { %719 = vmatpush1.bf16.msra.mxu0 %v974_v6 }
  0x4c   :  { %720 = vmatprep.subr.bf16.mxu0 %v982_v7 }
  0x4f   :  { %721 = vmatpush1.bf16.msra.mxu0 %v980_v10 }
  0x50   :  { %722 = vmatprep.subr.bf16.mxu0 %v988_v11 }
  0x53   :  { %723 = vmatpush1.bf16.msra.mxu0 %v986_v14 }
  0x54   :  { %724 = vmatprep.subr.bf16.mxu0 %v994_v15 }
  0x57   :  { %725 = vmatpush1.bf16.msra.mxu0 %v992_v17 }
  0x58   :  { %726 = vmatprep.subr.bf16.mxu0 %v1000_v18 }
  0x5b   :  { %727 = vmatpush1.bf16.msra.mxu0 %v998_v19 }
  0x5c   :  { %728 = vmatprep.subr.bf16.mxu0 %v1006_v20 }
  0x5f   :  { %729 = vmatpush1.bf16.msra.mxu0 %v1004_v21 }
  0x60   :  { %730 = vmatprep.subr.bf16.mxu0 %v1012_v22 }
  0x63   :  { %731 = vmatpush1.bf16.msra.mxu0 %v1010_v23 }
  0x64   :  { %732 = vmatprep.subr.bf16.mxu0 %v1018_v24 }
  0x67   :  { %733 = vmatpush1.bf16.msra.mxu0 %v1016_v25 }
  0x68   :  { %734 = vmatprep.subr.bf16.mxu0 %v1024_v26 }
  0x6b   :  { %735 = vmatpush1.bf16.msra.mxu0 %v1022_v27 }
  0x6c   :  { %736 = vmatprep.subr.bf16.mxu0 %v1030_v28 }
  0x6f   :  { %737 = vmatpush1.bf16.msra.mxu0 %v1028_v29 }
  0x70   :  { %738 = vmatprep.subr.bf16.mxu0 %v1036_v30 }
  0x73   :  { %739 = vmatpush1.bf16.msra.mxu0 %v1034_v31 }
  0x74   :  { %740 = vmatprep.subr.bf16.mxu0 %v1042_v32 }
  0x77   :  { %741 = vmatpush1.bf16.msra.mxu0 %v1040_v33 }
  0x78   :  { %742 = vmatprep.subr.bf16.mxu0 %v1048_v34 }
  0x7b   :  { %743 = vmatpush1.bf16.msra.mxu0 %v1046_v35 }
  0x7c   :  { %744 = vmatprep.subr.bf16.mxu0 %v1054_v36 }
  0x7f   :  { %745 = vmatpush1.bf16.msra.mxu0 %v1052_v37 }
  0x82   :  { %747 = vmatmul.mubr.bf16.vlgmr.msra.gmra.mrb[4].mxu0 %v1256_v60  ;;  %v132_v60 = vsub.s32 3, %v119_v39 }
  0x84   :  { %v133_v62 = vrot.slane %v116_v41, %v132_v60 }
 0x115   :  { %v662_v49 = vpop.f32.mrb[0].mxu0 }
 0x116   :  { %v663_v50 = vadd.f32 %v662_v49, %v121_v47  ;;  %v664_v51 = vpop.f32.mrb[1].mxu0 }
 0x117   :  { %v665_v52 = vadd.f32 %v664_v51, %v125_v48  ;;  %v666_v53 = vpop.f32.mrb[2].mxu0 }
 0x118   :  { %v667_v54 = vadd.f32 %v666_v53, %v121_v47  ;;  %v668_v55 = vpop.f32.mrb[3].mxu0 }
 0x119   :  { %v905_v56 = vpack.c.bf16 %v665_v52, %v663_v50  ;;  %v669_v57 = vadd.f32 %v668_v55, %v125_v48 }
 0x11a   :  { %v705_v63 = vpop.f32.mrb[0].mxu1 }
 0x11b   :  { %793 = vst [vmem:[%s1409_s3] sm:$0xff] %v905_v56  ;;  %v908_v58 = vpack.c.bf16 %v669_v57, %v667_v54  ;;  %v706_v0 = vadd.f32 %v705_v63, %v129_v61  ;;  %v707_v1 = vpop.f32.mrb[1].mxu1 }
 0x11c   :  { %v708_v2 = vadd.f32 %v707_v1, %v133_v62  ;;  %v709_v3 = vpop.f32.mrb[2].mxu1 }
 0x11d   :  { %796 = vst [vmem:[%s1409_s3 + $0x18] sm:$0xff] %v908_v58  ;;  %v710_v4 = vadd.f32 %v709_v3, %v129_v61  ;;  %v711_v5 = vpop.f32.mrb[3].mxu1 }
 0x11e   :  { %v906_v6 = vpack.c.bf16 %v708_v2, %v706_v0  ;;  %v712_v7 = vadd.f32 %v711_v5, %v133_v62 }
 0x120   :  { %794 = vst [vmem:[%s1409_s3 + $0x8] sm:$0xff] %v906_v6  ;;  %v909_v8 = vpack.c.bf16 %v712_v7, %v710_v4 }
 0x122   :  { %797 = vst [vmem:[%s1409_s3 + $0x20] sm:$0xff] %v909_v8 }
 0x155   :  { %v748_v9 = vpop.f32.mrb[4].mxu0 }
 0x156   :  { %v749_v10 = vadd.f32 %v748_v9, %v137_v42  ;;  %v750_v11 = vpop.f32.mrb[5].mxu0 }
 0x157   :  { %v751_v12 = vadd.f32 %v750_v11, %v141_v44  ;;  %v752_v13 = vpop.f32.mrb[6].mxu0 }
 0x158   :  { %v753_v14 = vadd.f32 %v752_v13, %v137_v42  ;;  %v754_v15 = vpop.f32.mrb[7].mxu0 }
 0x159   :  { %v907_v16 = vpack.c.bf16 %v751_v12, %v749_v10  ;;  %v755_v17 = vadd.f32 %v754_v15, %v141_v44 }
 0x15b   :  { %795 = vst [vmem:[%s1409_s3 + $0x10] sm:$0xff] %v907_v16  ;;  %v910_v18 = vpack.c.bf16 %v755_v17, %v753_v14 }
 0x15d   :  { %798 = vst [vmem:[%s1409_s3 + $0x28] sm:$0xff] %v910_v18 }

// kernel: transformer_time_emb_forward.10
= control target key start
LH: loop header
LB: loop body
LE: loop exit
PB: predicated region body
PF: predicated region fallthrough
CT: control target
= control target key end

     0   :  { %vm98_vm0 = vcmask 523264   ;;  %v1140_v0 = vmov 0.0   ;;  %vm1141_vm1 = vmmov 0   ;;  %vm467_vm2 = vcmask 64512   ;;  %s1427_s1 = inlined_call_operand.vmem [shape: bf16[8,8,64], index: 1, kind: input, shape index: {}]   ;;  %s1428_s0 = inlined_call_operand.vmem [shape: bf16[8,8,64], index: 0, kind: input, shape index: {}]   ;;  %s1429_s3 = inlined_call_operand.vmem [shape: f32[8,1,8], index: 3, kind: input, shape index: {}]   ;;  %s1430_s2 = inlined_call_operand.vmem [shape: bf16[8,8,64], index: 2, kind: input, shape index: {}]   ;;  %s1431_s4 = inlined_call_operand.vmem [shape: bf16[8,8,64], index: 4, kind: output, shape index: {}]  }
   0x1   :  { %1010 = vmatprep.subr.bf16.mxu0 %v1140_v0  ;;  %1016 = vmatprep.subr.bf16.mxu1 %v1140_v0  ;;  %v26_v1 = vld [vmem:[%s1427_s1] sm:$0xf]  ;;  %v27_v2 = vld [vmem:[%s1427_s1 + $0x4] sm:$0xf]  ;;  %v28_v5 = vld [vmem:[%s1427_s1 + $0x8] sm:$0xf] }
   0x2   :  { %v103_v3 = vsel %vm98_vm0, %v26_v1, 0  ;;  %v149_v4 = vsel %vm98_vm0, %v27_v2, 0  ;;  %1012 = vmatprep.mubr.msk.bf16.mxu0 %vm1141_vm1, %v1140_v0  ;;  %1018 = vmatprep.mubr.msk.bf16.mxu1 %vm1141_vm1, %v1140_v0  ;;  %v29_v6 = vld [vmem:[%s1427_s1 + $0xc] sm:$0xf]  ;;  %v18_v7 = vld [vmem:[%s1428_s0] sm:$0xf] }
   0x3   :  { %1011 = vmatpush3.bf16.xpose.msra.mxu0 %v103_v3  ;;  %1017 = vmatpush3.bf16.xpose.msra.mxu1 %v149_v4  ;;  %v19_v8 = vld [vmem:[%s1428_s0 + $0x4] sm:$0xf]  ;;  %v195_v9 = vsel %vm98_vm0, %v28_v5, 0  ;;  %v241_v10 = vsel %vm98_vm0, %v29_v6, 0  ;;  %v30_v11 = vld [vmem:[%s1427_s1 + $0x10] sm:$0xf] }
   0x4   :  { %1022 = vmatprep.subr.bf16.mxu0 %v1140_v0  ;;  %1028 = vmatprep.subr.bf16.mxu1 %v1140_v0  ;;  %v31_v12 = vld [vmem:[%s1427_s1 + $0x14] sm:$0xf]  ;;  %v20_v13 = vld [vmem:[%s1428_s0 + $0x8] sm:$0xf]  ;;  %v21_v14 = vld [vmem:[%s1428_s0 + $0xc] sm:$0xf] }
   0x5   :  { %v287_v15 = vsel %vm98_vm0, %v30_v11, 0  ;;  %v333_v16 = vsel %vm98_vm0, %v31_v12, 0  ;;  %v32_v17 = vld [vmem:[%s1427_s1 + $0x18] sm:$0xf]  ;;  %v33_v18 = vld [vmem:[%s1427_s1 + $0x1c] sm:$0xf] }
   0x6   :  { %v22_v19 = vld [vmem:[%s1428_s0 + $0x10] sm:$0xf]  ;;  %v23_v20 = vld [vmem:[%s1428_s0 + $0x14] sm:$0xf]  ;;  %v379_v21 = vsel %vm98_vm0, %v32_v17, 0  ;;  %v425_v22 = vsel %vm98_vm0, %v33_v18, 0 }
   0x7   :  { %v24_v23 = vld [vmem:[%s1428_s0 + $0x18] sm:$0xf]  ;;  %v25_v24 = vld [vmem:[%s1428_s0 + $0x1c] sm:$0xf]  ;;  %v954_v25 = vld [vmem:[%s1429_s3] ss:$0 sm:$0xff] }
   0x8   :  { %v955_v26 = vld [vmem:[%s1429_s3 + $0x1] ss:$0 sm:$0xff]  ;;  %v956_v39 = vld [vmem:[%s1429_s3 + $0x2] ss:$0 sm:$0xff]  ;;  %v957_v40 = vld [vmem:[%s1429_s3 + $0x3] ss:$0 sm:$0xff] }
   0x9   :  { %v959_v53 = vld [vmem:[%s1429_s3 + $0x5] ss:$0 sm:$0xff]  ;;  %v958_v54 = vld [vmem:[%s1429_s3 + $0x4] ss:$0 sm:$0xff]  ;;  %v960_v4 = vld [vmem:[%s1429_s3 + $0x6] ss:$0 sm:$0xff] }
   0xa   :  { %1013 = vmatmul.mubr.msk.bf16.vlgmr.msra.gmra.mrb[0].mxu0 %vm98_vm0, %v18_v7  ;;  %1019 = vmatmul.mubr.msk.bf16.vlgmr.msra.gmra.mrb[0].mxu1 %vm98_vm0, %v19_v8  ;;  %v961_v5 = vld [vmem:[%s1429_s3 + $0x7] ss:$0 sm:$0xff]  ;;  %vm567_vm3 = vcmask 1043456   ;;  %vm941_vm4 = vcmask 519168  }
   0xb   :  { %1023 = vmatpush3.bf16.xpose.msra.mxu0 %v195_v9  ;;  %1029 = vmatpush3.bf16.xpose.msra.mxu1 %v241_v10 }
   0xc   :  { %1024 = vmatprep.mubr.msk.bf16.mxu0 %vm1141_vm1, %v1140_v0  ;;  %1030 = vmatprep.mubr.msk.bf16.mxu1 %vm1141_vm1, %v1140_v0 }
   0xd   :  { %1034 = vmatprep.subr.bf16.mxu0 %v1140_v0  ;;  %1040 = vmatprep.subr.bf16.mxu1 %v1140_v0 }
  0x12   :  { %1025 = vmatmul.mubr.msk.bf16.vlgmr.msra.gmra.mrb[4].mxu0 %vm98_vm0, %v20_v13  ;;  %1031 = vmatmul.mubr.msk.bf16.vlgmr.msra.gmra.mrb[4].mxu1 %vm98_vm0, %v21_v14 }
  0x13   :  { %1035 = vmatpush3.bf16.xpose.msra.mxu0 %v287_v15  ;;  %1041 = vmatpush3.bf16.xpose.msra.mxu1 %v333_v16 }
  0x14   :  { %1036 = vmatprep.mubr.msk.bf16.mxu0 %vm1141_vm1, %v1140_v0  ;;  %1042 = vmatprep.mubr.msk.bf16.mxu1 %vm1141_vm1, %v1140_v0 }
  0x15   :  { %1046 = vmatprep.subr.bf16.mxu0 %v1140_v0  ;;  %1052 = vmatprep.subr.bf16.mxu1 %v1140_v0 }
  0x1a   :  { %1037 = vmatmul.mubr.msk.bf16.vlgmr.msra.gmra.mrb[8].mxu0 %vm98_vm0, %v22_v19  ;;  %1043 = vmatmul.mubr.msk.bf16.vlgmr.msra.gmra.mrb[8].mxu1 %vm98_vm0, %v23_v20 }
  0x1b   :  { %1047 = vmatpush3.bf16.xpose.msra.mxu0 %v379_v21  ;;  %1053 = vmatpush3.bf16.xpose.msra.mxu1 %v425_v22 }
  0x1c   :  { %1048 = vmatprep.mubr.msk.bf16.mxu0 %vm1141_vm1, %v1140_v0  ;;  %1054 = vmatprep.mubr.msk.bf16.mxu1 %vm1141_vm1, %v1140_v0 }
  0x1d   :  { %1058 = vmatprep.subr.bf16.mxu0 %v1140_v0  ;;  %1064 = vmatprep.subr.bf16.mxu1 %v1140_v0 }
  0x22   :  { %1049 = vmatmul.mubr.msk.bf16.vlgmr.msra.gmra.mrb[12].mxu0 %vm98_vm0, %v24_v23  ;;  %1055 = vmatmul.mubr.msk.bf16.vlgmr.msra.gmra.mrb[12].mxu1 %vm98_vm0, %v25_v24 }
  0x23   :  { %1060 = vmatprep.mubr.msk.bf16.mxu0 %vm1141_vm1, %v1140_v0  ;;  %1066 = vmatprep.mubr.msk.bf16.mxu1 %vm1141_vm1, %v1140_v0 }
  0xdd   :  { %v139_v27 = vpop.f32.mrb[0].mxu0  ;;  %v185_v28 = vpop.f32.mrb[0].mxu1 }
  0xde   :  { %v140_v29 = vadd.f32 %v954_v25, %v139_v27  ;;  %v1014_v30 = vpop.f32.mrb[1].mxu0  ;;  %v1267_v31 = vadd.f32 %v955_v26, %v185_v28  ;;  %v1020_v32 = vpop.f32.mrb[1].mxu1 }
  0xdf   :  { %v142_v33 = vpop.f32.mrb[2].mxu0  ;;  %v188_v34 = vpop.f32.mrb[2].mxu1 }
  0xe0   :  { %v1015_v35 = vpop.f32.mrb[3].mxu0  ;;  %v468_v36 = vsel %vm467_vm2, %v140_v29, -inf  ;;  %v1021_v37 = vpop.f32.mrb[3].mxu1  ;;  %v471_v38 = vsel %vm467_vm2, %v1267_v31, -inf }
  0xe1   :  { %469 = vmax.xlane.f32.xlu0 %v468_v36 }
  0xe5   :  { %472 = vmax.xlane.f32.xlu0 %v471_v38  ;;  %v231_v41 = vpop.f32.mrb[4].mxu0  ;;  %v277_v42 = vpop.f32.mrb[4].mxu1 }
  0xe6   :  { %v232_v43 = vadd.f32 %v956_v39, %v231_v41  ;;  %v1026_v44 = vpop.f32.mrb[5].mxu0  ;;  %v278_v45 = vadd.f32 %v957_v40, %v277_v42  ;;  %v1032_v46 = vpop.f32.mrb[5].mxu1 }
  0xe7   :  { %v234_v47 = vpop.f32.mrb[6].mxu0  ;;  %v280_v48 = vpop.f32.mrb[6].mxu1 }
  0xe8   :  { %v1027_v49 = vpop.f32.mrb[7].mxu0  ;;  %v474_v50 = vsel %vm467_vm2, %v232_v43, -inf  ;;  %v1033_v51 = vpop.f32.mrb[7].mxu1  ;;  %v477_v52 = vsel %vm467_vm2, %v278_v45, -inf }
  0xe9   :  { %475 = vmax.xlane.f32.xlu1 %v474_v50 }
  0xed   :  { %v369_v55 = vpop.f32.mrb[8].mxu1  ;;  %478 = vmax.xlane.f32.xlu1 %v477_v52  ;;  %v323_v56 = vpop.f32.mrb[8].mxu0 }
  0xee   :  { %v370_v57 = vadd.f32 %v959_v53, %v369_v55  ;;  %v324_v58 = vadd.f32 %v958_v54, %v323_v56  ;;  %v1038_v59 = vpop.f32.mrb[9].mxu0  ;;  %v1044_v60 = vpop.f32.mrb[9].mxu1 }
  0xef   :  { %v372_v61 = vpop.f32.mrb[10].mxu1  ;;  %v326_v62 = vpop.f32.mrb[10].mxu0  ;;  %v35_v60 = vld [vmem:[%s1430_s2 + $0x4] sm:$0xf] }
  0xf0   :  { %v483_v63 = vsel %vm467_vm2, %v370_v57, -inf  ;;  %v480_v1 = vsel %vm467_vm2, %v324_v58, -inf  ;;  %v1039_v2 = vpop.f32.mrb[11].mxu0  ;;  %v1045_v3 = vpop.f32.mrb[11].mxu1  ;;  %v615_v61 = vsel %vm567_vm3, %v35_v60, 0 }
  0xf1   :  { %484 = vmax.xlane.f32.xlu1 %v483_v63  ;;  %481 = vmax.xlane.f32.xlu0 %v480_v1  ;;  %v36_v62 = vld [vmem:[%s1430_s2 + $0x8] sm:$0xf]  ;;  %v37_v1 = vld [vmem:[%s1430_s2 + $0xc] sm:$0xf]  ;;  %v38_v3 = vld [vmem:[%s1430_s2 + $0x10] sm:$0xf] }
  0xf2   :  { %1065 = vmatpush3.bf16.msra.mxu1 %v615_v61  ;;  %v661_v63 = vsel %vm567_vm3, %v36_v62, 0  ;;  %v707_v2 = vsel %vm567_vm3, %v37_v1, 0 }
  0xf3   :  { %1076 = vmatprep.subr.bf16.mxu1 %v1140_v0 }
  0xf5   :  { %v415_v6 = vpop.f32.mrb[12].mxu0  ;;  %v461_v7 = vpop.f32.mrb[12].mxu1 }
  0xf6   :  { %v416_v8 = vadd.f32 %v960_v4, %v415_v6  ;;  %v462_v9 = vadd.f32 %v961_v5, %v461_v7  ;;  %v1050_v10 = vpop.f32.mrb[13].mxu0  ;;  %v1056_v11 = vpop.f32.mrb[13].mxu1  ;;  %v753_v4 = vsel %vm567_vm3, %v38_v3, 0  ;;  %v39_v5 = vld [vmem:[%s1430_s2 + $0x14] sm:$0xf] }
  0xf7   :  { %v464_v12 = vpop.f32.mrb[14].mxu1  ;;  %v418_v13 = vpop.f32.mrb[14].mxu0  ;;  %v799_v6 = vsel %vm567_vm3, %v39_v5, 0  ;;  %v40_v7 = vld [vmem:[%s1430_s2 + $0x18] sm:$0xf] }
  0xf8   :  { %v489_v14 = vsel %vm467_vm2, %v462_v9, -inf  ;;  %v486_v15 = vsel %vm467_vm2, %v416_v8, -inf  ;;  %v1051_v16 = vpop.f32.mrb[15].mxu0  ;;  %v1057_v17 = vpop.f32.mrb[15].mxu1 }
  0xf9   :  { %490 = vmax.xlane.f32.xlu1 %v489_v14  ;;  %487 = vmax.xlane.f32.xlu0 %v486_v15 }
 0x16e   :  { %v470_v18 = vpop.xlane.xlu0 %469 }
 0x16f   :  { %v492_v19 = vsub.f32 %v140_v29, %v470_v18 }
 0x171   :  { %v500_v20 = vmul.f32 1.442695, %v492_v19 }
 0x172   :  { %v473_v21 = vpop.xlane.xlu0 %472 }
 0x173   :  { %1108 = vpow2.f32 %v500_v20  ;;  %v493_v22 = vsub.f32 %v1267_v31, %v473_v21 }
 0x175   :  { %v502_v23 = vmul.f32 1.442695, %v493_v22 }
 0x176   :  { %v476_v24 = vpop.xlane.xlu1 %475 }
 0x177   :  { %1110 = vpow2.f32 %v502_v23  ;;  %v494_v25 = vsub.f32 %v232_v43, %v476_v24 }
 0x179   :  { %v504_v26 = vmul.f32 1.442695, %v494_v25 }
 0x17a   :  { %v479_v27 = vpop.xlane.xlu1 %478 }
 0x17b   :  { %1112 = vpow2.f32 %v504_v26  ;;  %v495_v28 = vsub.f32 %v278_v45, %v479_v27 }
 0x17d   :  { %v1297_v30 = vpop.eup %1108  ;;  %v506_v32 = vmul.f32 1.442695, %v495_v28 }
 0x17e   :  { %v485_v33 = vpop.xlane.xlu1 %484  ;;  %v482_v34 = vpop.xlane.xlu0 %481  ;;  %v516_v29 = vsel %vm467_vm2, %v1297_v30, 0.0 }
 0x17f   :  { %1114 = vpow2.f32 %v506_v32  ;;  %v497_v35 = vsub.f32 %v370_v57, %v485_v33  ;;  %v496_v36 = vsub.f32 %v324_v58, %v482_v34  ;;  %517 = vadd.xlane.f32.xlu0 %v516_v29  ;;  %v34_v58 = vld [vmem:[%s1430_s2] sm:$0xf] }
 0x180   :  { %v569_v59 = vsel %vm567_vm3, %v34_v58, 0 }
 0x181   :  { %v1301_v31 = vpop.eup %1110  ;;  %v510_v37 = vmul.f32 1.442695, %v497_v35  ;;  %v508_v38 = vmul.f32 1.442695, %v496_v36  ;;  %1059 = vmatpush3.bf16.msra.mxu0 %v569_v59 }
 0x182   :  { %v519_v39 = vsel %vm467_vm2, %v1301_v31, 0.0  ;;  %1070 = vmatprep.subr.bf16.mxu0 %v1140_v0 }
 0x183   :  { %1116 = vpow2.f32 %v510_v37  ;;  %520 = vadd.xlane.f32.xlu1 %v519_v39 }
 0x184   :  { %1118 = vpow2.f32 %v508_v38 }
 0x185   :  { %v1305_v40 = vpop.eup %1112 }
 0x186   :  { %v491_v41 = vpop.xlane.xlu1 %490  ;;  %v488_v42 = vpop.xlane.xlu0 %487  ;;  %v522_v43 = vsel %vm467_vm2, %v1305_v40, 0.0 }
 0x187   :  { %v499_v44 = vsub.f32 %v462_v9, %v491_v41  ;;  %v498_v45 = vsub.f32 %v416_v8, %v488_v42  ;;  %523 = vadd.xlane.f32.xlu0 %v522_v43  ;;  %v845_v8 = vsel %vm567_vm3, %v40_v7, 0  ;;  %v41_v9 = vld [vmem:[%s1430_s2 + $0x1c] sm:$0xf] }
 0x188   :  { %v891_v10 = vsel %vm567_vm3, %v41_v9, 0 }
 0x189   :  { %v1309_v46 = vpop.eup %1114  ;;  %v514_v47 = vmul.f32 1.442695, %v499_v44  ;;  %v512_v48 = vmul.f32 1.442695, %v498_v45 }
 0x18a   :  { %v525_v49 = vsel %vm467_vm2, %v1309_v46, 0.0 }
 0x18b   :  { %1120 = vpow2.f32 %v514_v47  ;;  %526 = vadd.xlane.f32.xlu1 %v525_v49 }
 0x18c   :  { %1122 = vpow2.f32 %v512_v48 }
 0x18d   :  { %v1313_v50 = vpop.eup %1116 }
 0x18e   :  { %v1315_v51 = vpop.eup %1118  ;;  %v531_v52 = vsel %vm467_vm2, %v1313_v50, 0.0 }
 0x18f   :  { %532 = vadd.xlane.f32.xlu1 %v531_v52  ;;  %v528_v53 = vsel %vm467_vm2, %v1315_v51, 0.0 }
 0x190   :  { %529 = vadd.xlane.f32.xlu0 %v528_v53 }
 0x195   :  { %v1321_v54 = vpop.eup %1120 }
 0x196   :  { %v1323_v55 = vpop.eup %1122  ;;  %v537_v56 = vsel %vm467_vm2, %v1321_v54, 0.0 }
 0x197   :  { %538 = vadd.xlane.f32.xlu1 %v537_v56  ;;  %v534_v57 = vsel %vm467_vm2, %v1323_v55, 0.0 }
 0x198   :  { %535 = vadd.xlane.f32.xlu0 %v534_v57 }
 0x20c   :  { %v518_v11 = vpop.xlane.xlu0 %517 }
 0x20d   :  { %1124 = vrcp.f32 %v518_v11 }
 0x210   :  { %v521_v12 = vpop.xlane.xlu1 %520 }
 0x211   :  { %1126 = vrcp.f32 %v521_v12 }
 0x214   :  { %v524_v13 = vpop.xlane.xlu0 %523 }
 0x215   :  { %1128 = vrcp.f32 %v524_v13 }
 0x217   :  { %v1125_v14 = vpop.eup %1124 }
 0x218   :  { %v548_v15 = vmul.f32 %v1125_v14, %v1297_v30  ;;  %v527_v16 = vpop.xlane.xlu1 %526 }
 0x219   :  { %1130 = vrcp.f32 %v527_v16 }
 0x21a   :  { %v556_v17 = vpack.c.bf16 %v548_v15, %v548_v15 }
 0x21b   :  { %v1127_v18 = vpop.eup %1126 }
 0x21c   :  { %v549_v19 = vmul.f32 %v1127_v18, %v1301_v31  ;;  %v533_v20 = vpop.xlane.xlu1 %532  ;;  %1061 = vmatmul.mubr.msk.bf16.vlgmr.msra.gmra.mrb[16].mxu0 %vm467_vm2, %v556_v17 }
 0x21d   :  { %1132 = vrcp.f32 %v533_v20  ;;  %v530_v21 = vpop.xlane.xlu0 %529  ;;  %1071 = vmatpush3.bf16.msra.mxu0 %v661_v63  ;;  %1072 = vmatprep.mubr.msk.bf16.mxu0 %vm1141_vm1, %v1140_v0 }
 0x21e   :  { %1134 = vrcp.f32 %v530_v21  ;;  %v557_v22 = vpack.c.bf16 %v549_v19, %v549_v19  ;;  %1082 = vmatprep.subr.bf16.mxu0 %v1140_v0 }
 0x21f   :  { %v1129_v23 = vpop.eup %1128 }
 0x220   :  { %v550_v24 = vmul.f32 %v1129_v23, %v1305_v40  ;;  %1067 = vmatmul.mubr.msk.bf16.vlgmr.msra.gmra.mrb[16].mxu1 %vm467_vm2, %v557_v22 }
 0x221   :  { %1077 = vmatpush3.bf16.msra.mxu1 %v707_v2  ;;  %1078 = vmatprep.mubr.msk.bf16.mxu1 %vm1141_vm1, %v1140_v0 }
 0x222   :  { %v558_v25 = vpack.c.bf16 %v550_v24, %v550_v24  ;;  %1088 = vmatprep.subr.bf16.mxu1 %v1140_v0 }
 0x223   :  { %v1131_v26 = vpop.eup %1130 }
 0x224   :  { %v551_v27 = vmul.f32 %v1131_v26, %v1309_v46  ;;  %v539_v28 = vpop.xlane.xlu1 %538  ;;  %1073 = vmatmul.mubr.msk.bf16.vlgmr.msra.gmra.mrb[20].mxu0 %vm467_vm2, %v558_v25 }
 0x225   :  { %1136 = vrcp.f32 %v539_v28  ;;  %v536_v30 = vpop.xlane.xlu0 %535  ;;  %1083 = vmatpush3.bf16.msra.mxu0 %v753_v4  ;;  %1084 = vmatprep.mubr.msk.bf16.mxu0 %vm1141_vm1, %v1140_v0 }
 0x226   :  { %1138 = vrcp.f32 %v536_v30  ;;  %v559_v32 = vpack.c.bf16 %v551_v27, %v551_v27  ;;  %1094 = vmatprep.subr.bf16.mxu0 %v1140_v0 }
 0x227   :  { %v1133_v33 = vpop.eup %1132 }
 0x228   :  { %v1135_v34 = vpop.eup %1134  ;;  %1079 = vmatmul.mubr.msk.bf16.vlgmr.msra.gmra.mrb[20].mxu1 %vm467_vm2, %v559_v32  ;;  %v553_v35 = vmul.f32 %v1133_v33, %v1313_v50 }
 0x229   :  { %v552_v29 = vmul.f32 %v1135_v34, %v1315_v51  ;;  %1089 = vmatpush3.bf16.msra.mxu1 %v799_v6  ;;  %1090 = vmatprep.mubr.msk.bf16.mxu1 %vm1141_vm1, %v1140_v0 }
 0x22a   :  { %1100 = vmatprep.subr.bf16.mxu1 %v1140_v0  ;;  %v561_v31 = vpack.c.bf16 %v553_v35, %v553_v35 }
 0x22b   :  { %v560_v36 = vpack.c.bf16 %v552_v29, %v552_v29 }
 0x22d   :  { %1085 = vmatmul.mubr.msk.bf16.vlgmr.msra.gmra.mrb[24].mxu0 %vm467_vm2, %v560_v36 }
 0x22e   :  { %1095 = vmatpush3.bf16.msra.mxu0 %v845_v8  ;;  %1096 = vmatprep.mubr.msk.bf16.mxu0 %vm1141_vm1, %v1140_v0 }
 0x22f   :  { %v1137_v37 = vpop.eup %1136 }
 0x230   :  { %v1139_v38 = vpop.eup %1138  ;;  %1091 = vmatmul.mubr.msk.bf16.vlgmr.msra.gmra.mrb[24].mxu1 %vm467_vm2, %v561_v31  ;;  %v555_v40 = vmul.f32 %v1137_v37, %v1321_v54 }
 0x231   :  { %v554_v39 = vmul.f32 %v1139_v38, %v1323_v55  ;;  %1101 = vmatpush3.bf16.msra.mxu1 %v891_v10  ;;  %1102 = vmatprep.mubr.msk.bf16.mxu1 %vm1141_vm1, %v1140_v0 }
 0x232   :  { %v563_v42 = vpack.c.bf16 %v555_v40, %v555_v40 }
 0x233   :  { %v562_v41 = vpack.c.bf16 %v554_v39, %v554_v39 }
 0x235   :  { %1097 = vmatmul.mubr.msk.bf16.vlgmr.msra.gmra.mrb[28].mxu0 %vm467_vm2, %v562_v41 }
 0x238   :  { %1103 = vmatmul.mubr.msk.bf16.vlgmr.msra.gmra.mrb[28].mxu1 %vm467_vm2, %v563_v42 }
 0x2ef   :  { %v605_v43 = vpop.f32.mrb[16].mxu0 }
 0x2f0   :  { %v933_v44 = vpack.c.bf16 %v605_v43, %v605_v43  ;;  %v1062_v45 = vpop.f32.mrb[17].mxu0 }
 0x2f1   :  { %v608_v46 = vpop.f32.mrb[18].mxu0 }
 0x2f2   :  { %942 = vst.msk [vmem:[%s1431_s4] sm:$0xf] %vm941_vm4, %v933_v44  ;;  %v1063_v47 = vpop.f32.mrb[19].mxu0 }
 0x2f3   :  { %v651_v0 = vpop.f32.mrb[16].mxu1 }
 0x2f4   :  { %v934_v48 = vpack.c.bf16 %v651_v0, %v651_v0  ;;  %v1068_v49 = vpop.f32.mrb[17].mxu1 }
 0x2f5   :  { %v654_v50 = vpop.f32.mrb[18].mxu1 }
 0x2f6   :  { %943 = vst.msk [vmem:[%s1431_s4 + $0x4] sm:$0xf] %vm941_vm4, %v934_v48  ;;  %v1069_v51 = vpop.f32.mrb[19].mxu1 }
 0x2f7   :  { %v697_v52 = vpop.f32.mrb[20].mxu0 }
 0x2f8   :  { %v935_v53 = vpack.c.bf16 %v697_v52, %v697_v52  ;;  %v1074_v54 = vpop.f32.mrb[21].mxu0 }
 0x2f9   :  { %v700_v55 = vpop.f32.mrb[22].mxu0 }
 0x2fa   :  { %944 = vst.msk [vmem:[%s1431_s4 + $0x8] sm:$0xf] %vm941_vm4, %v935_v53  ;;  %v1075_v56 = vpop.f32.mrb[23].mxu0 }
 0x2fb   :  { %v743_v57 = vpop.f32.mrb[20].mxu1 }
 0x2fc   :  { %v936_v58 = vpack.c.bf16 %v743_v57, %v743_v57  ;;  %v1080_v59 = vpop.f32.mrb[21].mxu1 }
 0x2fd   :  { %v746_v60 = vpop.f32.mrb[22].mxu1 }
 0x2fe   :  { %945 = vst.msk [vmem:[%s1431_s4 + $0xc] sm:$0xf] %vm941_vm4, %v936_v58  ;;  %v1081_v61 = vpop.f32.mrb[23].mxu1 }
 0x300   :  { %v789_v62 = vpop.f32.mrb[24].mxu0 }
 0x301   :  { %v937_v63 = vpack.c.bf16 %v789_v62, %v789_v62  ;;  %v1086_v1 = vpop.f32.mrb[25].mxu0 }
 0x302   :  { %v792_v2 = vpop.f32.mrb[26].mxu0 }
 0x303   :  { %946 = vst.msk [vmem:[%s1431_s4 + $0x10] sm:$0xf] %vm941_vm4, %v937_v63  ;;  %v1087_v3 = vpop.f32.mrb[27].mxu0  ;;  %v835_v4 = vpop.f32.mrb[24].mxu1 }
 0x304   :  { %v938_v5 = vpack.c.bf16 %v835_v4, %v835_v4  ;;  %v1092_v6 = vpop.f32.mrb[25].mxu1 }
 0x305   :  { %v838_v7 = vpop.f32.mrb[26].mxu1 }
 0x306   :  { %947 = vst.msk [vmem:[%s1431_s4 + $0x14] sm:$0xf] %vm941_vm4, %v938_v5  ;;  %v1093_v8 = vpop.f32.mrb[27].mxu1 }
 0x308   :  { %v881_v9 = vpop.f32.mrb[28].mxu0 }
 0x309   :  { %v939_v10 = vpack.c.bf16 %v881_v9, %v881_v9  ;;  %v1098_v11 = vpop.f32.mrb[29].mxu0 }
 0x30a   :  { %v884_v12 = vpop.f32.mrb[30].mxu0 }
 0x30b   :  { %948 = vst.msk [vmem:[%s1431_s4 + $0x18] sm:$0xf] %vm941_vm4, %v939_v10  ;;  %v1099_v13 = vpop.f32.mrb[31].mxu0  ;;  %v927_v14 = vpop.f32.mrb[28].mxu1 }
 0x30c   :  { %v940_v15 = vpack.c.bf16 %v927_v14, %v927_v14  ;;  %v1104_v16 = vpop.f32.mrb[29].mxu1 }
 0x30d   :  { %v930_v17 = vpop.f32.mrb[30].mxu1 }
 0x30e   :  { %949 = vst.msk [vmem:[%s1431_s4 + $0x1c] sm:$0xf] %vm941_vm4, %v940_v15  ;;  %v1105_v18 = vpop.f32.mrb[31].mxu1 }

// kernel: transformer_time_emb_forward.11
= control target key start
LH: loop header
LB: loop body
LE: loop exit
PB: predicated region body
PF: predicated region fallthrough
CT: control target
= control target key end

     0   :  { %v59_v34 = vlaneseq  ;;  %s622_s2 = inlined_call_operand.vmem [shape: bf16[256,256], index: 2, kind: input, shape index: {}]   ;;  %s623_s0 = inlined_call_operand.vmem [shape: bf16[16,256], index: 0, kind: input, shape index: {}]   ;;  %s624_s3 = inlined_call_operand.vmem [shape: f32[1,256], index: 3, kind: input, shape index: {}]   ;;  %s625_s1 = inlined_call_operand.vmem [shape: f32[16,256], index: 1, kind: input, shape index: {}]   ;;  %s626_s4 = inlined_call_operand.vmem [shape: f32[1,256], index: 4, kind: input, shape index: {}]   ;;  %s627_s5 = inlined_call_operand.vmem [shape: f32[1,256], index: 5, kind: input, shape index: {}]   ;;  %s628_s6 = inlined_call_operand.vmem [shape: f32[16,256], index: 6, kind: output, shape index: {}]  }
   0x1   :  { %v397_v0 = vld [vmem:[%s622_s2 + $0x4] ss:$8 sps:$4 sm:$0xff]   ;;  %v399_v1 = vld [vmem:[%s622_s2] ss:$8 sps:$4 sm:$0xff]   ;;  %v400_v2 = vld [vmem:[%s622_s2 + $0x14] ss:$8 sps:$4 sm:$0xff]  }
   0x2   :  { %239 = vmatprep.subr.bf16.mxu0 %v397_v0  ;;  %v402_v3 = vld [vmem:[%s622_s2 + $0x10] ss:$8 sps:$4 sm:$0xff]   ;;  %v403_v4 = vld [vmem:[%s622_s2 + $0x24] ss:$8 sps:$4 sm:$0xff]   ;;  %v405_v5 = vld [vmem:[%s622_s2 + $0x20] ss:$8 sps:$4 sm:$0xff]  }
   0x3   :  { %240 = vmatpush1.bf16.msra.mxu0 %v399_v1  ;;  %v406_v6 = vld [vmem:[%s622_s2 + $0x34] ss:$8 sps:$4 sm:$0xff]   ;;  %v408_v7 = vld [vmem:[%s622_s2 + $0x30] ss:$8 sps:$4 sm:$0xff]   ;;  %v409_v8 = vld [vmem:[%s622_s2 + $0x44] ss:$8 sps:$4 sm:$0xff]  }
   0x4   :  { %241 = vmatprep.subr.bf16.mxu0 %v400_v2  ;;  %v411_v9 = vld [vmem:[%s622_s2 + $0x40] ss:$8 sps:$4 sm:$0xff]   ;;  %v412_v10 = vld [vmem:[%s622_s2 + $0x54] ss:$8 sps:$4 sm:$0xff]   ;;  %v414_v11 = vld [vmem:[%s622_s2 + $0x50] ss:$8 sps:$4 sm:$0xff]  }
   0x5   :  { %v415_v12 = vld [vmem:[%s622_s2 + $0x64] ss:$8 sps:$4 sm:$0xff]   ;;  %v417_v14 = vld [vmem:[%s622_s2 + $0x60] ss:$8 sps:$4 sm:$0xff]   ;;  %v418_v15 = vld [vmem:[%s622_s2 + $0x74] ss:$8 sps:$4 sm:$0xff]  }
   0x6   :  { %v447_v13 = vld [vmem:[%s623_s0 + $0x4] ss:$8 sps:$4 sm:$0xff]   ;;  %v420_v16 = vld [vmem:[%s622_s2 + $0x70] ss:$8 sps:$4 sm:$0xff]   ;;  %v423_v18 = vld [vmem:[%s622_s2 + $0x80] ss:$8 sps:$4 sm:$0xff]  }
   0x7   :  { %242 = vmatpush1.bf16.msra.mxu0 %v402_v3  ;;  %271 = vmatprep.mubr.bf16.mxu0 %v447_v13  ;;  %v421_v17 = vld [vmem:[%s622_s2 + $0x84] ss:$8 sps:$4 sm:$0xff]   ;;  %v424_v19 = vld [vmem:[%s622_s2 + $0x94] ss:$8 sps:$4 sm:$0xff]   ;;  %v426_v20 = vld [vmem:[%s622_s2 + $0x90] ss:$8 sps:$4 sm:$0xff]  }
   0x8   :  { %243 = vmatprep.subr.bf16.mxu0 %v403_v4  ;;  %v427_v21 = vld [vmem:[%s622_s2 + $0xa4] ss:$8 sps:$4 sm:$0xff]   ;;  %v429_v22 = vld [vmem:[%s622_s2 + $0xa0] ss:$8 sps:$4 sm:$0xff]   ;;  %v430_v23 = vld [vmem:[%s622_s2 + $0xb4] ss:$8 sps:$4 sm:$0xff]  }
   0x9   :  { %v432_v24 = vld [vmem:[%s622_s2 + $0xb0] ss:$8 sps:$4 sm:$0xff]   ;;  %v433_v25 = vld [vmem:[%s622_s2 + $0xc4] ss:$8 sps:$4 sm:$0xff]   ;;  %v435_v26 = vld [vmem:[%s622_s2 + $0xc0] ss:$8 sps:$4 sm:$0xff]  }
   0xa   :  { %v436_v27 = vld [vmem:[%s622_s2 + $0xd4] ss:$8 sps:$4 sm:$0xff]   ;;  %v438_v28 = vld [vmem:[%s622_s2 + $0xd0] ss:$8 sps:$4 sm:$0xff]   ;;  %v439_v29 = vld [vmem:[%s622_s2 + $0xe4] ss:$8 sps:$4 sm:$0xff]  }
   0xb   :  { %244 = vmatpush1.bf16.msra.mxu0 %v405_v5  ;;  %v441_v30 = vld [vmem:[%s622_s2 + $0xe0] ss:$8 sps:$4 sm:$0xff]   ;;  %v442_v31 = vld [vmem:[%s622_s2 + $0xf4] ss:$8 sps:$4 sm:$0xff]   ;;  %v444_v32 = vld [vmem:[%s622_s2 + $0xf0] ss:$8 sps:$4 sm:$0xff]  }
   0xc   :  { %245 = vmatprep.subr.bf16.mxu0 %v406_v6  ;;  %v445_v33 = vld [vmem:[%s623_s0] ss:$8 sps:$4 sm:$0xff]   ;;  %v60_v35 = vshrl.u32 %v59_v34, 7  ;;  %v284_v49 = vld [vmem:[%s625_s1 + $0x10] sm:$0xff]  ;;  %v285_v51 = vld [vmem:[%s625_s1 + $0x18] sm:$0xff] }
   0xd   :  { %v57_v37 = vld [vmem:[%s624_s3] sm:$0x3]  ;;  %v283_v45 = vld [vmem:[%s625_s1 + $0x8] sm:$0xff] }
   0xe   :  { %v61_v36 = vsub.s32 0, %v60_v35  ;;  %v65_v38 = vsub.s32 1, %v60_v35  ;;  %v282_v42 = vld [vmem:[%s625_s1] sm:$0xff] }
   0xf   :  { %246 = vmatpush1.bf16.msra.mxu0 %v408_v7 }
  0x10   :  { %247 = vmatprep.subr.bf16.mxu0 %v409_v8  ;;  %v62_v39 = vrot.slane %v57_v37, %v61_v36  ;;  %v66_v40 = vrot.slane %v57_v37, %v65_v38 }
  0x13   :  { %248 = vmatpush1.bf16.msra.mxu0 %v411_v9 }
  0x14   :  { %249 = vmatprep.subr.bf16.mxu0 %v412_v10 }
  0x17   :  { %250 = vmatpush1.bf16.msra.mxu0 %v414_v11 }
  0x18   :  { %251 = vmatprep.subr.bf16.mxu0 %v415_v12 }
  0x1b   :  { %252 = vmatpush1.bf16.msra.mxu0 %v417_v14 }
  0x1c   :  { %253 = vmatprep.subr.bf16.mxu0 %v418_v15  ;;  %v323_v15 = vld [vmem:[%s626_s4] sm:$0x3] }
  0x1f   :  { %254 = vmatpush1.bf16.msra.mxu0 %v420_v16  ;;  %v339_v16 = vld [vmem:[%s627_s5] sm:$0x3] }
  0x20   :  { %255 = vmatprep.subr.bf16.mxu0 %v421_v17  ;;  %v328_v17 = vrot.slane %v323_v15, %v61_v36 }
  0x23   :  { %256 = vmatpush1.bf16.msra.mxu0 %v423_v18  ;;  %v332_v18 = vrot.slane %v323_v15, %v65_v38 }
  0x24   :  { %257 = vmatprep.subr.bf16.mxu0 %v424_v19 }
  0x27   :  { %258 = vmatpush1.bf16.msra.mxu0 %v426_v20  ;;  %v344_v20 = vrot.slane %v339_v16, %v61_v36 }
  0x28   :  { %259 = vmatprep.subr.bf16.mxu0 %v427_v21  ;;  %v348_v21 = vrot.slane %v339_v16, %v65_v38 }
  0x2b   :  { %260 = vmatpush1.bf16.msra.mxu0 %v429_v22 }
  0x2c   :  { %261 = vmatprep.subr.bf16.mxu0 %v430_v23 }
  0x2f   :  { %262 = vmatpush1.bf16.msra.mxu0 %v432_v24 }
  0x30   :  { %263 = vmatprep.subr.bf16.mxu0 %v433_v25 }
  0x33   :  { %264 = vmatpush1.bf16.msra.mxu0 %v435_v26 }
  0x34   :  { %265 = vmatprep.subr.bf16.mxu0 %v436_v27 }
  0x37   :  { %266 = vmatpush1.bf16.msra.mxu0 %v438_v28 }
  0x38   :  { %267 = vmatprep.subr.bf16.mxu0 %v439_v29 }
  0x3b   :  { %268 = vmatpush1.bf16.msra.mxu0 %v441_v30 }
  0x3c   :  { %269 = vmatprep.subr.bf16.mxu0 %v442_v31 }
  0x3f   :  { %270 = vmatpush1.bf16.msra.mxu0 %v444_v32 }
  0x42   :  { %272 = vmatmul.mubr.bf16.vlgmr.msra.gmra.mrb[0].mxu0 %v445_v33 }
 0x115   :  { %v273_v41 = vpop.f32.mrb[0].mxu0 }
 0x116   :  { %v274_v43 = vadd.f32 %v273_v41, %v62_v39  ;;  %v275_v44 = vpop.f32.mrb[1].mxu0 }
 0x117   :  { %v276_v46 = vadd.f32 %v275_v44, %v66_v40  ;;  %v277_v47 = vpop.f32.mrb[2].mxu0 }
 0x118   :  { %v278_v48 = vadd.f32 %v277_v47, %v62_v39  ;;  %v279_v50 = vpop.f32.mrb[3].mxu0  ;;  %v286_v52 = vadd.f32 %v282_v42, %v274_v43 }
 0x119   :  { %v280_v53 = vadd.f32 %v279_v50, %v66_v40  ;;  %v287_v54 = vadd.f32 %v283_v45, %v276_v46 }
 0x11a   :  { %v288_v55 = vadd.f32 %v284_v49, %v278_v48 }
 0x11b   :  { %v289_v56 = vadd.f32 %v285_v51, %v280_v53  ;;  %v290_v57 = vadd.f32 %v287_v54, %v286_v52 }
 0x11d   :  { %291 = vadd.xlane.f32.xlu0 %v290_v57  ;;  %v293_v58 = vadd.f32 %v289_v56, %v288_v55 }
 0x121   :  { %294 = vadd.xlane.f32.xlu0 %v293_v58 }
 0x1aa   :  { %v292_v59 = vpop.xlane.xlu0 %291 }
 0x1ab   :  { %v297_v60 = vmul.f32 0.00390625, %v292_v59 }
 0x1ad   :  { %v299_v61 = vsub.f32 %v286_v52, %v297_v60  ;;  %v300_v62 = vsub.f32 %v287_v54, %v297_v60 }
 0x1ae   :  { %v295_v63 = vpop.xlane.xlu0 %294 }
 0x1af   :  { %v298_v0 = vmul.f32 0.00390625, %v295_v63  ;;  %v303_v1 = vmul.f32 %v299_v61, %v299_v61  ;;  %v304_v2 = vmul.f32 %v300_v62, %v300_v62 }
 0x1b1   :  { %v301_v3 = vsub.f32 %v288_v55, %v298_v0  ;;  %v302_v4 = vsub.f32 %v289_v56, %v298_v0  ;;  %v307_v5 = vadd.f32 %v304_v2, %v303_v1 }
 0x1b3   :  { %308 = vadd.xlane.f32.xlu1 %v307_v5  ;;  %v305_v6 = vmul.f32 %v301_v3, %v301_v3  ;;  %v306_v7 = vmul.f32 %v302_v4, %v302_v4 }
 0x1b5   :  { %v310_v8 = vadd.f32 %v306_v7, %v305_v6 }
 0x1b7   :  { %311 = vadd.xlane.f32.xlu1 %v310_v8 }
 0x240   :  { %v309_v9 = vpop.xlane.xlu1 %308 }
 0x241   :  { %v313_v10 = vmul.f32 0.00390625, %v309_v9 }
 0x243   :  { %v315_v11 = vadd.f32 1e-05, %v313_v10 }
 0x244   :  { %v312_v12 = vpop.xlane.xlu1 %311 }
 0x245   :  { %448 = vrsqrt.f32 %v315_v11  ;;  %v314_v13 = vmul.f32 0.00390625, %v312_v12 }
 0x247   :  { %v316_v14 = vadd.f32 1e-05, %v314_v13 }
 0x249   :  { %450 = vrsqrt.f32 %v316_v14 }
 0x24f   :  { %v449_v19 = vpop.eup %448 }
 0x250   :  { %v319_v22 = vmul.f32 %v449_v19, %v299_v61  ;;  %v320_v23 = vmul.f32 %v449_v19, %v300_v62 }
 0x252   :  { %v335_v24 = vmul.f32 %v328_v17, %v319_v22  ;;  %v336_v25 = vmul.f32 %v332_v18, %v320_v23 }
 0x253   :  { %v451_v26 = vpop.eup %450 }
 0x254   :  { %v351_v27 = vadd.f32 %v344_v20, %v335_v24  ;;  %v352_v28 = vadd.f32 %v348_v21, %v336_v25  ;;  %v321_v29 = vmul.f32 %v451_v26, %v301_v3  ;;  %v322_v30 = vmul.f32 %v451_v26, %v302_v4 }
 0x256   :  { %355 = vst [vmem:[%s628_s6] sm:$0xff] %v351_v27  ;;  %356 = vst [vmem:[%s628_s6 + $0x8] sm:$0xff] %v352_v28  ;;  %v337_v31 = vmul.f32 %v328_v17, %v321_v29  ;;  %v338_v32 = vmul.f32 %v332_v18, %v322_v30 }
 0x258   :  { %v353_v33 = vadd.f32 %v344_v20, %v337_v31  ;;  %v354_v34 = vadd.f32 %v348_v21, %v338_v32 }
 0x25a   :  { %357 = vst [vmem:[%s628_s6 + $0x10] sm:$0xff] %v353_v33  ;;  %358 = vst [vmem:[%s628_s6 + $0x18] sm:$0xff] %v354_v34 }

// kernel: transformer_time_emb_forward.13
= control target key start
LH: loop header
LB: loop body
LE: loop exit
PB: predicated region body
PF: predicated region fallthrough
CT: control target
= control target key end

     0   :  { %s635_s0 = inlined_call_operand.vmem [shape: f32[2,8,256], index: 0, kind: input, shape index: {}]   ;;  %s636_s1 = inlined_call_operand.vmem [shape: f32[2,8,1], index: 1, kind: input, shape index: {}]   ;;  %s637_s2 = inlined_call_operand.vmem [shape: f32[1,1,256], index: 2, kind: input, shape index: {}]   ;;  %s638_s3 = inlined_call_operand.<no memory space> [shape: f32[1,1,1], index: 3, kind: input, shape index: {}]   ;;  %s639_s4 = inlined_call_operand.vmem [shape: bf16[256,128], index: 4, kind: input, shape index: {}]   ;;  %s640_s5 = inlined_call_operand.vmem [shape: f32[1,128], index: 5, kind: input, shape index: {}]   ;;  %s641_s6 = inlined_call_operand.vmem [shape: f32[2,8,1], index: 6, kind: output, shape index: {0}]   ;;  %s642_s7 = inlined_call_operand.hbm [shape: f32[2,128], index: 7, kind: output, shape index: {1}]  }
   0x1   :  { %v13_v0 = vstv %s638_s3 }
   0x2   :  { %14 = vst [vmem:[#allocation2] sm:$0x1] %v13_v0 }
   0x3   :  { %v35_v1 = vlaneseq  ;;  %v33_v2 = vld [vmem:[%s637_s2] sm:$0x3]  ;;  %v532_v5 = vld [vmem:[%s635_s0 + $0x8] sm:$0xff]  ;;  %v537_v6 = vld [vmem:[%s635_s0 + $0x10] sm:$0xff] }
   0x4   :  { %v527_v4 = vld [vmem:[%s635_s0] sm:$0xff]  ;;  %v542_v7 = vld [vmem:[%s635_s0 + $0x18] sm:$0xff] }
   0x5   :  { %v36_v3 = vshrl.u32 %v35_v1, 7 }
   0x7   :  { %v37_v8 = vsub.s32 0, %v36_v3  ;;  %v41_v9 = vsub.s32 1, %v36_v3 }
   0x9   :  { %v38_v10 = vrot.slane %v33_v2, %v37_v8  ;;  %v42_v11 = vrot.slane %v33_v2, %v41_v9 }
   0xb   :  { %v45_v12 = vmul.f32 %v38_v10, %v527_v4  ;;  %v46_v13 = vmul.f32 %v42_v11, %v532_v5  ;;  %v47_v14 = vmul.f32 %v38_v10, %v537_v6  ;;  %v48_v15 = vmul.f32 %v42_v11, %v542_v7 }
   0xd   :  { %v49_v16 = vadd.f32 %v46_v13, %v45_v12  ;;  %v52_v17 = vadd.f32 %v48_v15, %v47_v14 }
   0xf   :  { %50 = vadd.xlane.f32.xlu0 %v49_v16 }
  0x10   :  { %15 = vsyncpa [#allocation4], 0  ;;  %v476_v18 = vmov 0   ;;  %v424_v19 = vld [vmem:[%s639_s4 + $0x40] sm:$0xff]   ;;  %v426_v21 = vld [vmem:[%s639_s4 + $0x48] sm:$0xff]   ;;  %vm68_vm0 = vcmask 7168  }
  0x11   :  { %422 = vset.pattern.permute.xlu1 %v476_v18  ;;  %423 = vset.pattern.permute.xlu0 %v476_v18  ;;  %v425_v20 = vld [vmem:[%s639_s4] sm:$0xff]   ;;  %v427_v22 = vld [vmem:[%s639_s4 + $0x8] sm:$0xff]   ;;  %vm218_vm1 = vcmask 1041409   ;;  %s477_s22 = smov [#allocation3]  }
  0x12   :  { %398 = vmatprep.subr.bf16.mxu0 %v424_v19  ;;  %v380_v23 = vld [vmem:[#allocation2] ss:$0 sm:$0xff]  ;;  %v65_v28 = vld [vmem:[%s636_s1 + $0x8] sm:$0xff]  ;;  %s370_s23 = sshll.u32 %s477_s22, 4  ;;  %s371_s23 = int_to_ptr.vmem [resolvable:$true] %s370_s23 }
  0x13   :  { %53 = vadd.xlane.f32.xlu0 %v52_v17  ;;  %399 = vmatpush3.bf16.msra.mxu0 %v425_v20  ;;  %v64_v24 = vld [vmem:[%s636_s1] sm:$0xff]  ;;  %s452_s24 = scalar_lea.vmem %s371_s23, 32  ;;  %p457_p1 = scmp.lt.s32.totalorder %s371_s23, %s371_s23 }
  0x14   :  { %400 = vmatprep.subr.bf16.mxu0 %v426_v21  ;;  %p453_p0 = scmp.ne.s32.totalorder %s371_s23, %s452_s24  ;;  %p458_p2 = scmp.lt.s32.totalorder %s452_s24, %s452_s24 }
  0x16   :  { %p459_p3 = por %p458_p2, %p457_p1 }
  0x17   :  { %401 = vmatpush3.bf16.msra.mxu0 %v427_v22 }
  0x18   :  { %p460_p4 = pnand %p459_p3, %p453_p0 }
  0x9c   :  { %v51_v25 = vpop.xlane.xlu0 %50 }
  0x9d   :  { %v62_v26 = vadd.f32 %v380_v23, %v51_v25 }
  0x9f   :  { %v66_v27 = vadd.f32 %v64_v24, %v62_v26 }
  0xa0   :  { %v54_v29 = vpop.xlane.xlu0 %53 }
  0xa1   :  { %v69_v30 = vsel %vm68_vm0, %v66_v27, -inf  ;;  %v63_v31 = vadd.f32 %v380_v23, %v54_v29 }
  0xa2   :  { %v70_v32 = vrot.slane %v69_v30, 4 }
  0xa3   :  { %v67_v33 = vadd.f32 %v65_v28, %v63_v31  ;;  %v428_v28 = vld [vmem:[%s639_s4 + $0x50] sm:$0xff]  }
  0xa4   :  { %v71_v34 = vmax.f32 %v69_v30, %v70_v32  ;;  %v429_v30 = vld [vmem:[%s639_s4 + $0x10] sm:$0xff]   ;;  %402 = vmatprep.subr.bf16.mxu0 %v428_v28  ;;  %v430_v32 = vld [vmem:[%s639_s4 + $0x58] sm:$0xff]  }
  0xa5   :  { %v76_v35 = vsel %vm68_vm0, %v67_v33, -inf  ;;  %403 = vmatpush3.bf16.msra.mxu0 %v429_v30 }
  0xa6   :  { %v72_v36 = vrot.slane %v71_v34, 2  ;;  %v77_v37 = vrot.slane %v76_v35, 4  ;;  %404 = vmatprep.subr.bf16.mxu0 %v430_v32 }
  0xa8   :  { %v73_v38 = vmax.f32 %v71_v34, %v72_v36  ;;  %v78_v39 = vmax.f32 %v76_v35, %v77_v37  ;;  %v432_v34 = vld [vmem:[%s639_s4 + $0x60] sm:$0xff]   ;;  %v434_v36 = vld [vmem:[%s639_s4 + $0x68] sm:$0xff]  }
  0xa9   :  { %v433_v35 = vld [vmem:[%s639_s4 + $0x20] sm:$0xff]   ;;  %v435_v37 = vld [vmem:[%s639_s4 + $0x28] sm:$0xff]  }
  0xaa   :  { %v74_v40 = vrot.slane %v73_v38, 1  ;;  %v79_v41 = vrot.slane %v78_v39, 2 }
  0xac   :  { %v75_v42 = vmax.f32 %v73_v38, %v74_v40  ;;  %v80_v43 = vmax.f32 %v78_v39, %v79_v41  ;;  %v436_v38 = vld [vmem:[%s639_s4 + $0x70] sm:$0xff]   ;;  %v438_v40 = vld [vmem:[%s639_s4 + $0x78] sm:$0xff]  }
  0xad   :  { %v437_v39 = vld [vmem:[%s639_s4 + $0x30] sm:$0xff]   ;;  %v439_v41 = vld [vmem:[%s639_s4 + $0x38] sm:$0xff]  }
  0xae   :  { %v83_v44 = vsub.f32 %v66_v27, %v75_v42  ;;  %v81_v45 = vrot.slane %v80_v43, 1 }
  0xb0   :  { %v85_v46 = vmul.f32 1.442695, %v83_v44  ;;  %v82_v47 = vmax.f32 %v80_v43, %v81_v45 }
  0xb2   :  { %440 = vpow2.f32 %v85_v46  ;;  %v84_v48 = vsub.f32 %v67_v33, %v82_v47  ;;  %v431_v33 = vld [vmem:[%s639_s4 + $0x18] sm:$0xff]  }
  0xb3   :  { %405 = vmatpush3.bf16.msra.mxu0 %v431_v33 }
  0xb4   :  { %v87_v49 = vmul.f32 1.442695, %v84_v48  ;;  %406 = vmatprep.subr.bf16.mxu0 %v432_v34 }
  0xb6   :  { %442 = vpow2.f32 %v87_v49 }
  0xb7   :  { %407 = vmatpush3.bf16.msra.mxu0 %v433_v35 }
  0xb8   :  { %408 = vmatprep.subr.bf16.mxu0 %v434_v36 }
  0xbb   :  { %409 = vmatpush3.bf16.msra.mxu0 %v435_v37 }
  0xbc   :  { %v441_v50 = vpop.eup %440  ;;  %410 = vmatprep.subr.bf16.mxu0 %v436_v38 }
  0xbd   :  { %v89_v51 = vsel %vm68_vm0, %v441_v50, 0.0 }
  0xbe   :  { %v90_v52 = vrot.slane %v89_v51, 4 }
  0xbf   :  { %411 = vmatpush3.bf16.msra.mxu0 %v437_v39 }
  0xc0   :  { %v443_v53 = vpop.eup %442  ;;  %v91_v54 = vadd.f32 %v90_v52, %v89_v51  ;;  %412 = vmatprep.subr.bf16.mxu0 %v438_v40 }
  0xc1   :  { %v96_v55 = vsel %vm68_vm0, %v443_v53, 0.0 }
  0xc2   :  { %v92_v56 = vrot.slane %v91_v54, 2  ;;  %v97_v57 = vrot.slane %v96_v55, 4 }
  0xc3   :  { %413 = vmatpush3.bf16.msra.mxu0 %v439_v41 }
  0xc4   :  { %v98_v58 = vadd.f32 %v97_v57, %v96_v55  ;;  %v93_v59 = vadd.f32 %v92_v56, %v91_v54 }
  0xc6   :  { %v99_v60 = vrot.slane %v98_v58, 2  ;;  %v94_v61 = vrot.slane %v93_v59, 1 }
  0xc8   :  { %v100_v62 = vadd.f32 %v99_v60, %v98_v58  ;;  %v95_v63 = vadd.f32 %v94_v61, %v93_v59 }
  0xca   :  { %v101_v0 = vrot.slane %v100_v62, 1  ;;  %444 = vrcp.f32 %v95_v63 }
  0xcc   :  { %v102_v1 = vadd.f32 %v101_v0, %v100_v62 }
  0xce   :  { %446 = vrcp.f32 %v102_v1 }
  0xd4   :  { %v445_v2 = vpop.eup %444 }
  0xd5   :  { %v105_v3 = vmul.f32 %v445_v2, %v441_v50 }
  0xd7   :  { %v109_v8 = vsel %vm68_vm0, %v105_v3, 0.0  ;;  %107 = vst.msk [vmem:[%s641_s6] sm:$0xff] %vm68_vm0, %v105_v3 }
  0xd8   :  { %v447_v9 = vpop.eup %446  ;;  %v110_v10 = vrot.slane %v109_v8, 4 }
  0xd9   :  { %v106_v11 = vmul.f32 %v447_v9, %v443_v53 }
  0xda   :  { %v111_v12 = vadd.f32 %v110_v10, %v109_v8 }
  0xdb   :  { %v116_v13 = vsel %vm68_vm0, %v106_v11, 0.0  ;;  %108 = vst.msk [vmem:[%s641_s6 + $0x8] sm:$0xff] %vm68_vm0, %v106_v11 }
  0xdc   :  { %v112_v14 = vrot.slane %v111_v12, 2  ;;  %v117_v15 = vrot.slane %v116_v13, 4 }
  0xde   :  { %v113_v16 = vadd.f32 %v112_v14, %v111_v12  ;;  %v118_v17 = vadd.f32 %v117_v15, %v116_v13 }
  0xe0   :  { %v114_v18 = vrot.slane %v113_v16, 1  ;;  %v119_v19 = vrot.slane %v118_v17, 2 }
  0xe2   :  { %v115_v20 = vadd.f32 %v114_v18, %v113_v16  ;;  %v120_v21 = vadd.f32 %v119_v19, %v118_v17 }
  0xe4   :  { %v123_v22 = vadd.f32 1e-05, %v115_v20  ;;  %v121_v23 = vrot.slane %v120_v21, 1 }
  0xe6   :  { %448 = vrcp.f32 %v123_v22  ;;  %v122_v24 = vadd.f32 %v121_v23, %v120_v21  ;;  %v381_v22 = vld [vmem:[%s640_s5] ss:$0 sm:$0xff] }
  0xe8   :  { %v124_v25 = vadd.f32 1e-05, %v122_v24 }
  0xea   :  { %450 = vrcp.f32 %v124_v25 }
  0xf0   :  { %v449_v26 = vpop.eup %448 }
  0xf1   :  { %v127_v27 = vmul.f32 %v449_v26, %v105_v3 }
  0xf3   :  { %131 = vperm.xlu1 %422, %v127_v27  }
  0xf4   :  { %v451_v29 = vpop.eup %450 }
  0xf5   :  { %v128_v31 = vmul.f32 %v451_v29, %v106_v11 }
  0xf7   :  { %136 = vperm.xlu1 %422, %v128_v31  }
 0x172   :  { %v132_v42 = vpop.permute.xlu1 %131 }
 0x173   :  { %v139_v43 = vmul.f32 %v132_v42, %v527_v4  ;;  %v140_v44 = vmul.f32 %v132_v42, %v532_v5 }
 0x175   :  { %v143_v45 = vrot.slane %v139_v43, 4  ;;  %v149_v46 = vrot.slane %v140_v44, 4 }
 0x176   :  { %v137_v47 = vpop.permute.xlu1 %136 }
 0x177   :  { %v144_v48 = vadd.f32 %v143_v45, %v139_v43  ;;  %v150_v49 = vadd.f32 %v149_v46, %v140_v44  ;;  %v141_v50 = vmul.f32 %v137_v47, %v537_v6  ;;  %v142_v51 = vmul.f32 %v137_v47, %v542_v7 }
 0x179   :  { %v145_v52 = vrot.slane %v144_v48, 2  ;;  %v151_v53 = vrot.slane %v150_v49, 2  ;;  %v155_v54 = vrot.slane %v141_v50, 4  ;;  %v161_v55 = vrot.slane %v142_v51, 4 }
 0x17b   :  { %v146_v56 = vadd.f32 %v145_v52, %v144_v48  ;;  %v152_v57 = vadd.f32 %v151_v53, %v150_v49  ;;  %v156_v58 = vadd.f32 %v155_v54, %v141_v50  ;;  %v162_v59 = vadd.f32 %v161_v55, %v142_v51 }
 0x17d   :  { %v147_v4 = vrot.slane %v146_v56, 1  ;;  %v157_v60 = vrot.slane %v156_v58, 2  ;;  %v163_v5 = vrot.slane %v162_v59, 2  ;;  %v153_v61 = vrot.slane %v152_v57, 1 }
 0x17f   :  { %v148_v62 = vadd.f32 %v147_v4, %v146_v56  ;;  %v158_v63 = vadd.f32 %v157_v60, %v156_v58  ;;  %v164_v0 = vadd.f32 %v163_v5, %v162_v59  ;;  %v154_v1 = vadd.f32 %v153_v61, %v152_v57 }
 0x181   :  { %v159_v2 = vrot.slane %v158_v63, 1  ;;  %v165_v6 = vrot.slane %v164_v0, 1  ;;  %v167_v3 = vpack.c.bf16 %v148_v62, %v148_v62  ;;  %v168_v9 = vpack.c.bf16 %v154_v1, %v154_v1 }
 0x183   :  { %v160_v7 = vadd.f32 %v159_v2, %v158_v63  ;;  %v166_v8 = vadd.f32 %v165_v6, %v164_v0  ;;  %v215_v13 = vunpack.c.l.b16 %v168_v9  ;;  %v214_v15 = vunpack.c.l.b16 %v167_v3 }
 0x185   :  { %v169_v10 = vpack.c.bf16 %v160_v7, %v160_v7  ;;  %v170_v11 = vpack.c.bf16 %v166_v8, %v166_v8 }
 0x187   :  { %v216_v12 = vunpack.c.l.b16 %v169_v10  ;;  %v217_v14 = vunpack.c.l.b16 %v170_v11 }
 0x189   :  { %v220_v16 = vsel %vm218_vm1, %v217_v14, %v215_v13  ;;  %v219_v17 = vsel %vm218_vm1, %v216_v12, %v214_v15 }
 0x18a   :  { %v222_v18 = vpack.c.b16 %v220_v16, %v220_v16  ;;  %v221_v19 = vpack.c.b16 %v219_v17, %v219_v17 }
 0x18c   :  { %353 = vmatprep.mubr.bf16.mxu0 %v222_v18 }
 0x18d   :  { %354 = vmatmul.mubr.bf16.vlgmr.msra.gmra.mrb[0].mxu0 %v221_v19 }
 0x260   :  { %v414_v20 = vpop.f32.mrb[0].mxu0 }
 0x261   :  { %v415_v21 = vpop.f32.mrb[1].mxu0 }
 0x262   :  { %v416_v23 = vadd.f32 %v415_v21, %v414_v20  ;;  %v417_v24 = vpop.f32.mrb[2].mxu0 }
 0x263   :  { %v418_v25 = vpop.f32.mrb[3].mxu0 }
 0x264   :  { %v356_v26 = vadd.f32 %v416_v23, %v381_v22 }
 0x266   :  { %361 = vst [vmem:[#allocation3] sm:$0x3] %v356_v26 }
 0x267   :  { %463 = shalt.err (!%p460_p4)
}
 0x268   :  { %s464_s6 = scalar_lea.hbm %s642_s7, 32 }
 0x269   :  { %p465_p5 = scmp.ne.s32.totalorder %s642_s7, %s464_s6  ;;  %p468_p6 = scmp.lt.u32.totalorder %s464_s6, %s642_s7 }
 0x26b   :  { %p470_p7 = pnand %p468_p6, %p465_p5 }
 0x26d   :  { %473 = shalt.err (!%p470_p7)
}
 0x26e   :  { %373 = dma.vmem_to_hbm [thread:$0]  %s371_s23, 32, %s642_s7, [#allocation4]  }
 0x26f   :  { %474 = dma.done.wait [#allocation4], 32  }
 0x270   :  { %475 = vsyncadd [#allocation4], 4294967264 }
 0x271   :  { %379 = vsyncpa [#allocation4], 1 }

// kernel: transformer_time_emb_forward.12
= control target key start
LH: loop header
LB: loop body
LE: loop exit
PB: predicated region body
PF: predicated region fallthrough
CT: control target
= control target key end

     0   :  { %s3439_s1 = inlined_call_operand.vmem [shape: bf16[256,1024], index: 1, kind: input, shape index: {}]   ;;  %s3440_s0 = inlined_call_operand.vmem [shape: f32[16,256], index: 0, kind: input, shape index: {}]   ;;  %s3441_s3 = inlined_call_operand.vmem [shape: bf16[1024,256], index: 3, kind: input, shape index: {}]   ;;  %s3442_s2 = inlined_call_operand.vmem [shape: f32[1,1024], index: 2, kind: input, shape index: {}]   ;;  %s3443_s4 = inlined_call_operand.vmem [shape: f32[1,256], index: 4, kind: input, shape index: {}]   ;;  %s3444_s5 = inlined_call_operand.vmem [shape: f32[1,256], index: 5, kind: input, shape index: {}]   ;;  %s3445_s6 = inlined_call_operand.vmem [shape: f32[1,256], index: 6, kind: input, shape index: {}]   ;;  %s3446_s7 = inlined_call_operand.vmem [shape: f32[16,256], index: 7, kind: output, shape index: {}]  }
   0x1   :  { %v32_v0 = vld [vmem:[%s3439_s1] sm:$0xff]  ;;  %v27_v17 = vld [vmem:[%s3440_s0 + $0x8] sm:$0xff]  ;;  %v29_v18 = vld [vmem:[%s3440_s0 + $0x18] sm:$0xff] }
   0x2   :  { %v36_v1 = vld [vmem:[%s3439_s1 + $0x20] sm:$0xff]  ;;  %v2615_v20 = vpack.c.bf16 %v29_v18, %v27_v17  ;;  %v57_v17 = vld [vmem:[%s3439_s1 + $0xc8] sm:$0xff] }
   0x3   :  { %v40_v2 = vld [vmem:[%s3439_s1 + $0x40] sm:$0xff]  ;;  %v2068_v3 = vcombine.high %v32_v0, %v36_v1  ;;  %v2067_v4 = vcombine.low %v32_v0, %v36_v1  ;;  %v61_v18 = vld [vmem:[%s3439_s1 + $0xe8] sm:$0xff] }
   0x4   :  { %v44_v5 = vld [vmem:[%s3439_s1 + $0x60] sm:$0xff]  ;;  %874 = vmatprep.mubr.bf16.mxu1 %v2615_v20 }
   0x5   :  { %v2076_v6 = vcombine.high %v40_v2, %v44_v5  ;;  %v48_v7 = vld [vmem:[%s3439_s1 + $0x80] sm:$0xff]  ;;  %842 = vmatprep.subr.bf16.mxu1 %v2068_v3  ;;  %v2075_v9 = vcombine.low %v40_v2, %v44_v5  ;;  %v33_v2 = vld [vmem:[%s3439_s1 + $0x8] sm:$0xff] }
   0x6   :  { %v52_v8 = vld [vmem:[%s3439_s1 + $0xa0] sm:$0xff]  ;;  %843 = vmatpush1.bf16.msra.mxu1 %v2067_v4  ;;  %v37_v3 = vld [vmem:[%s3439_s1 + $0x28] sm:$0xff] }
   0x7   :  { %844 = vmatprep.subr.bf16.mxu1 %v2076_v6  ;;  %v2084_v10 = vcombine.high %v48_v7, %v52_v8  ;;  %v56_v11 = vld [vmem:[%s3439_s1 + $0xc0] sm:$0xff]  ;;  %v2083_v13 = vcombine.low %v48_v7, %v52_v8  ;;  %v28_v6 = vld [vmem:[%s3440_s0 + $0x10] sm:$0xff]  ;;  %v2070_v7 = vcombine.high %v33_v2, %v37_v3  ;;  %v41_v8 = vld [vmem:[%s3439_s1 + $0x48] sm:$0xff] }
   0x8   :  { %v60_v12 = vld [vmem:[%s3439_s1 + $0xe0] sm:$0xff] }
   0x9   :  { %v2092_v14 = vcombine.high %v56_v11, %v60_v12  ;;  %v64_v15 = vld [vmem:[%s3439_s1 + $0x100] sm:$0xff]  ;;  %v2091_v19 = vcombine.low %v56_v11, %v60_v12  ;;  %v2069_v11 = vcombine.low %v33_v2, %v37_v3  ;;  %v2350_v2 = vld [vmem:[%s3441_s3 + $0x30] ss:$8 sps:$4 sm:$0xff]  }
   0xa   :  { %845 = vmatpush1.bf16.msra.mxu1 %v2075_v9  ;;  %v68_v16 = vld [vmem:[%s3439_s1 + $0x120] sm:$0xff]  ;;  %v45_v9 = vld [vmem:[%s3439_s1 + $0x68] sm:$0xff] }
   0xb   :  { %846 = vmatprep.subr.bf16.mxu1 %v2084_v10  ;;  %v2100_v21 = vcombine.high %v64_v15, %v68_v16  ;;  %v72_v22 = vld [vmem:[%s3439_s1 + $0x140] sm:$0xff]  ;;  %v2099_v24 = vcombine.low %v64_v15, %v68_v16  ;;  %v2078_v12 = vcombine.high %v41_v8, %v45_v9  ;;  %v2077_v15 = vcombine.low %v41_v8, %v45_v9 }
   0xc   :  { %v76_v23 = vld [vmem:[%s3439_s1 + $0x160] sm:$0xff] }
   0xd   :  { %v2108_v25 = vcombine.high %v72_v22, %v76_v23  ;;  %v80_v26 = vld [vmem:[%s3439_s1 + $0x180] sm:$0xff]  ;;  %v2107_v28 = vcombine.low %v72_v22, %v76_v23  ;;  %v65_v22 = vld [vmem:[%s3439_s1 + $0x108] sm:$0xff] }
   0xe   :  { %847 = vmatpush1.bf16.msra.mxu1 %v2083_v13  ;;  %v84_v27 = vld [vmem:[%s3439_s1 + $0x1a0] sm:$0xff]  ;;  %v49_v13 = vld [vmem:[%s3439_s1 + $0x88] sm:$0xff] }
   0xf   :  { %848 = vmatprep.subr.bf16.mxu1 %v2092_v14  ;;  %v2116_v29 = vcombine.high %v80_v26, %v84_v27  ;;  %v88_v30 = vld [vmem:[%s3439_s1 + $0x1c0] sm:$0xff]  ;;  %v2115_v32 = vcombine.low %v80_v26, %v84_v27  ;;  %v53_v14 = vld [vmem:[%s3439_s1 + $0xa8] sm:$0xff] }
  0x10   :  { %v92_v31 = vld [vmem:[%s3439_s1 + $0x1e0] sm:$0xff]  ;;  %v2086_v16 = vcombine.high %v49_v13, %v53_v14  ;;  %v69_v23 = vld [vmem:[%s3439_s1 + $0x128] sm:$0xff] }
  0x11   :  { %v2124_v33 = vcombine.high %v88_v30, %v92_v31  ;;  %v96_v34 = vld [vmem:[%s3439_s1 + $0x200] sm:$0xff]  ;;  %v2123_v36 = vcombine.low %v88_v30, %v92_v31  ;;  %v73_v26 = vld [vmem:[%s3439_s1 + $0x148] sm:$0xff] }
  0x12   :  { %849 = vmatpush1.bf16.msra.mxu1 %v2091_v19  ;;  %v100_v35 = vld [vmem:[%s3439_s1 + $0x220] sm:$0xff]  ;;  %v2085_v19 = vcombine.low %v49_v13, %v53_v14  ;;  %v77_v27 = vld [vmem:[%s3439_s1 + $0x168] sm:$0xff] }
  0x13   :  { %850 = vmatprep.subr.bf16.mxu1 %v2100_v21  ;;  %v2132_v37 = vcombine.high %v96_v34, %v100_v35  ;;  %v104_v38 = vld [vmem:[%s3439_s1 + $0x240] sm:$0xff]  ;;  %v2131_v40 = vcombine.low %v96_v34, %v100_v35  ;;  %v2094_v21 = vcombine.high %v57_v17, %v61_v18  ;;  %v81_v30 = vld [vmem:[%s3439_s1 + $0x188] sm:$0xff] }
  0x14   :  { %v108_v39 = vld [vmem:[%s3439_s1 + $0x260] sm:$0xff]  ;;  %v85_v31 = vld [vmem:[%s3439_s1 + $0x1a8] sm:$0xff] }
  0x15   :  { %v2140_v41 = vcombine.high %v104_v38, %v108_v39  ;;  %v112_v42 = vld [vmem:[%s3439_s1 + $0x280] sm:$0xff]  ;;  %v2139_v44 = vcombine.low %v104_v38, %v108_v39  ;;  %v89_v34 = vld [vmem:[%s3439_s1 + $0x1c8] sm:$0xff] }
  0x16   :  { %851 = vmatpush1.bf16.msra.mxu1 %v2099_v24  ;;  %v116_v43 = vld [vmem:[%s3439_s1 + $0x2a0] sm:$0xff]  ;;  %v2093_v24 = vcombine.low %v57_v17, %v61_v18  ;;  %v93_v35 = vld [vmem:[%s3439_s1 + $0x1e8] sm:$0xff] }
  0x17   :  { %852 = vmatprep.subr.bf16.mxu1 %v2108_v25  ;;  %v2148_v45 = vcombine.high %v112_v42, %v116_v43  ;;  %v120_v46 = vld [vmem:[%s3439_s1 + $0x2c0] sm:$0xff]  ;;  %v2147_v48 = vcombine.low %v112_v42, %v116_v43  ;;  %v2102_v25 = vcombine.high %v65_v22, %v69_v23  ;;  %v97_v38 = vld [vmem:[%s3439_s1 + $0x208] sm:$0xff] }
  0x18   :  { %v124_v47 = vld [vmem:[%s3439_s1 + $0x2e0] sm:$0xff]  ;;  %v101_v39 = vld [vmem:[%s3439_s1 + $0x228] sm:$0xff] }
  0x19   :  { %v2156_v49 = vcombine.high %v120_v46, %v124_v47  ;;  %v128_v50 = vld [vmem:[%s3439_s1 + $0x300] sm:$0xff]  ;;  %v2155_v52 = vcombine.low %v120_v46, %v124_v47  ;;  %v105_v42 = vld [vmem:[%s3439_s1 + $0x248] sm:$0xff] }
  0x1a   :  { %853 = vmatpush1.bf16.msra.mxu1 %v2107_v28  ;;  %v132_v51 = vld [vmem:[%s3439_s1 + $0x320] sm:$0xff]  ;;  %v2101_v28 = vcombine.low %v65_v22, %v69_v23  ;;  %v109_v43 = vld [vmem:[%s3439_s1 + $0x268] sm:$0xff] }
  0x1b   :  { %854 = vmatprep.subr.bf16.mxu1 %v2116_v29  ;;  %v2164_v53 = vcombine.high %v128_v50, %v132_v51  ;;  %v136_v54 = vld [vmem:[%s3439_s1 + $0x340] sm:$0xff]  ;;  %v2163_v56 = vcombine.low %v128_v50, %v132_v51  ;;  %v2110_v29 = vcombine.high %v73_v26, %v77_v27  ;;  %v113_v46 = vld [vmem:[%s3439_s1 + $0x288] sm:$0xff]  ;;  %v2342_v50 = vld [vmem:[%s3441_s3 + $0x14] ss:$8 sps:$4 sm:$0xff]   ;;  %v2141_v51 = vcombine.low %v105_v42, %v109_v43 }
  0x1c   :  { %v140_v55 = vld [vmem:[%s3439_s1 + $0x360] sm:$0xff]  ;;  %v117_v47 = vld [vmem:[%s3439_s1 + $0x2a8] sm:$0xff] }
  0x1d   :  { %v2172_v57 = vcombine.high %v136_v54, %v140_v55  ;;  %v144_v58 = vld [vmem:[%s3439_s1 + $0x380] sm:$0xff]  ;;  %v2171_v60 = vcombine.low %v136_v54, %v140_v55  ;;  %v2344_v54 = vld [vmem:[%s3441_s3 + $0x10] ss:$8 sps:$4 sm:$0xff]   ;;  %v2150_v55 = vcombine.high %v113_v46, %v117_v47  ;;  %v153_v13 = vld [vmem:[%s3439_s1 + $0x3c8] sm:$0xff] }
  0x1e   :  { %855 = vmatpush1.bf16.msra.mxu1 %v2115_v32  ;;  %v148_v59 = vld [vmem:[%s3439_s1 + $0x3a0] sm:$0xff]  ;;  %v2109_v32 = vcombine.low %v73_v26, %v77_v27  ;;  %v157_v14 = vld [vmem:[%s3439_s1 + $0x3e8] sm:$0xff]  ;;  %v42_v26 = vld [vmem:[%s3439_s1 + $0x50] sm:$0xff] }
  0x1f   :  { %856 = vmatprep.subr.bf16.mxu1 %v2124_v33  ;;  %v2180_v61 = vcombine.high %v144_v58, %v148_v59  ;;  %v152_v62 = vld [vmem:[%s3439_s1 + $0x3c0] sm:$0xff]  ;;  %v2179_v0 = vcombine.low %v144_v58, %v148_v59  ;;  %v2118_v33 = vcombine.high %v81_v30, %v85_v31  ;;  %v129_v58 = vld [vmem:[%s3439_s1 + $0x308] sm:$0xff]  ;;  %v2190_v23 = vcombine.high %v153_v13, %v157_v14  ;;  %v46_v27 = vld [vmem:[%s3439_s1 + $0x70] sm:$0xff] }
  0x20   :  { %v156_v63 = vld [vmem:[%s3439_s1 + $0x3e0] sm:$0xff]  ;;  %v133_v59 = vld [vmem:[%s3439_s1 + $0x328] sm:$0xff] }
  0x21   :  { %v2188_v1 = vcombine.high %v152_v62, %v156_v63  ;;  %v2187_v4 = vcombine.low %v152_v62, %v156_v63  ;;  %v26_v5 = vld [vmem:[%s3440_s0] sm:$0xff]  ;;  %v2348_v62 = vld [vmem:[%s3441_s3 + $0x34] ss:$8 sps:$4 sm:$0xff]   ;;  %v2166_v3 = vcombine.high %v129_v58, %v133_v59 }
  0x22   :  { %857 = vmatpush1.bf16.msra.mxu1 %v2123_v36  ;;  %v2702_v10 = vpack.c.bf16 %v28_v6, %v26_v5  ;;  %v2117_v36 = vcombine.low %v81_v30, %v85_v31  ;;  %v2165_v5 = vcombine.low %v129_v58, %v133_v59  ;;  %v145_v6 = vld [vmem:[%s3439_s1 + $0x388] sm:$0xff]  ;;  %v82_v58 = vld [vmem:[%s3439_s1 + $0x190] sm:$0xff] }
  0x23   :  { %858 = vmatprep.subr.bf16.mxu1 %v2132_v37  ;;  %v2126_v37 = vcombine.high %v89_v34, %v93_v35  ;;  %v2353_v8 = vld [vmem:[%s3441_s3 + $0x40] ss:$8 sps:$4 sm:$0xff]   ;;  %v2357_v17 = vld [vmem:[%s3441_s3 + $0x64] ss:$8 sps:$4 sm:$0xff]   ;;  %v86_v59 = vld [vmem:[%s3439_s1 + $0x1b0] sm:$0xff] }
  0x24   :  { %v2359_v22 = vld [vmem:[%s3441_s3 + $0x60] ss:$8 sps:$4 sm:$0xff]   ;;  %v2363_v30 = vld [vmem:[%s3441_s3 + $0x84] ss:$8 sps:$4 sm:$0xff]  }
  0x26   :  { %859 = vmatpush1.bf16.msra.mxu1 %v2131_v40  ;;  %v2125_v40 = vcombine.low %v89_v34, %v93_v35  ;;  %v2365_v34 = vld [vmem:[%s3441_s3 + $0x80] ss:$8 sps:$4 sm:$0xff]   ;;  %v2080_v35 = vcombine.high %v42_v26, %v46_v27 }
  0x27   :  { %860 = vmatprep.subr.bf16.mxu1 %v2140_v41  ;;  %v2134_v41 = vcombine.high %v97_v38, %v101_v39 }
  0x2a   :  { %861 = vmatpush1.bf16.msra.mxu1 %v2139_v44  ;;  %v2339_v44 = vld [vmem:[%s3441_s3 + $0x4] ss:$8 sps:$4 sm:$0xff]  }
  0x2b   :  { %862 = vmatprep.subr.bf16.mxu1 %v2148_v45  ;;  %v2133_v45 = vcombine.low %v97_v38, %v101_v39  ;;  %1818 = vmatprep.subr.bf16.mxu0 %v2339_v44  ;;  %v2369_v38 = vld [vmem:[%s3441_s3 + $0xa4] ss:$8 sps:$4 sm:$0xff]   ;;  %v2079_v39 = vcombine.low %v42_v26, %v46_v27  ;;  %v2372_v44 = vld [vmem:[%s3441_s3 + $0xb4] ss:$8 sps:$4 sm:$0xff]  }
  0x2c   :  { %v130_v27 = vld [vmem:[%s3439_s1 + $0x310] sm:$0xff] }
  0x2e   :  { %863 = vmatpush1.bf16.msra.mxu1 %v2147_v48  ;;  %v2341_v48 = vld [vmem:[%s3441_s3] ss:$8 sps:$4 sm:$0xff]  }
  0x2f   :  { %864 = vmatprep.subr.bf16.mxu1 %v2156_v49  ;;  %v2142_v49 = vcombine.high %v105_v42, %v109_v43  ;;  %1819 = vmatpush1.bf16.msra.mxu0 %v2341_v48  ;;  %v62_v42 = vld [vmem:[%s3439_s1 + $0xf0] sm:$0xff]  ;;  %v2371_v43 = vld [vmem:[%s3441_s3 + $0xa0] ss:$8 sps:$4 sm:$0xff]  }
  0x30   :  { %1820 = vmatprep.subr.bf16.mxu0 %v2342_v50  ;;  %v2374_v48 = vld [vmem:[%s3441_s3 + $0xb0] ss:$8 sps:$4 sm:$0xff]   ;;  %v2375_v50 = vld [vmem:[%s3441_s3 + $0xc4] ss:$8 sps:$4 sm:$0xff]  }
  0x32   :  { %865 = vmatpush1.bf16.msra.mxu1 %v2155_v52  ;;  %v121_v52 = vld [vmem:[%s3439_s1 + $0x2c8] sm:$0xff] }
  0x33   :  { %866 = vmatprep.subr.bf16.mxu1 %v2164_v53  ;;  %v125_v53 = vld [vmem:[%s3439_s1 + $0x2e8] sm:$0xff]  ;;  %1821 = vmatpush1.bf16.msra.mxu0 %v2344_v54 }
  0x34   :  { %v2157_v63 = vcombine.low %v121_v52, %v125_v53  ;;  %v2377_v54 = vld [vmem:[%s3441_s3 + $0xc0] ss:$8 sps:$4 sm:$0xff]  }
  0x36   :  { %867 = vmatpush1.bf16.msra.mxu1 %v2163_v56  ;;  %v2345_v56 = vld [vmem:[%s3441_s3 + $0x24] ss:$8 sps:$4 sm:$0xff]  }
  0x37   :  { %868 = vmatprep.subr.bf16.mxu1 %v2172_v57  ;;  %v2149_v57 = vcombine.low %v113_v46, %v117_v47  ;;  %1822 = vmatprep.subr.bf16.mxu0 %v2345_v56  ;;  %v66_v46 = vld [vmem:[%s3439_s1 + $0x110] sm:$0xff] }
  0x38   :  { %v70_v47 = vld [vmem:[%s3439_s1 + $0x130] sm:$0xff] }
  0x39   :  { %v2378_v56 = vld [vmem:[%s3441_s3 + $0xd4] ss:$8 sps:$4 sm:$0xff]  }
  0x3a   :  { %869 = vmatpush1.bf16.msra.mxu1 %v2171_v60  ;;  %v2347_v60 = vld [vmem:[%s3441_s3 + $0x20] ss:$8 sps:$4 sm:$0xff]  }
  0x3b   :  { %870 = vmatprep.subr.bf16.mxu1 %v2180_v61  ;;  %v2158_v61 = vcombine.high %v121_v52, %v125_v53  ;;  %1823 = vmatpush1.bf16.msra.mxu0 %v2347_v60  ;;  %v74_v52 = vld [vmem:[%s3439_s1 + $0x150] sm:$0xff] }
  0x3c   :  { %1824 = vmatprep.subr.bf16.mxu0 %v2348_v62  ;;  %v78_v53 = vld [vmem:[%s3439_s1 + $0x170] sm:$0xff] }
  0x3d   :  { %v2112_v60 = vcombine.high %v74_v52, %v78_v53  ;;  %v90_v62 = vld [vmem:[%s3439_s1 + $0x1d0] sm:$0xff] }
  0x3e   :  { %871 = vmatpush1.bf16.msra.mxu1 %v2179_v0  ;;  %v137_v0 = vld [vmem:[%s3439_s1 + $0x348] sm:$0xff] }
  0x3f   :  { %872 = vmatprep.subr.bf16.mxu1 %v2188_v1  ;;  %v141_v1 = vld [vmem:[%s3439_s1 + $0x368] sm:$0xff]  ;;  %1825 = vmatpush1.bf16.msra.mxu0 %v2350_v2 }
  0x40   :  { %v2174_v9 = vcombine.high %v137_v0, %v141_v1  ;;  %v2381_v2 = vld [vmem:[%s3441_s3 + $0xe4] ss:$8 sps:$4 sm:$0xff]  }
  0x42   :  { %873 = vmatpush1.bf16.msra.mxu1 %v2187_v4  ;;  %v2351_v4 = vld [vmem:[%s3441_s3 + $0x44] ss:$8 sps:$4 sm:$0xff]  }
  0x43   :  { %885 = vmatprep.subr.bf16.mxu1 %v2070_v7  ;;  %v149_v7 = vld [vmem:[%s3439_s1 + $0x3a8] sm:$0xff]  ;;  %1826 = vmatprep.subr.bf16.mxu0 %v2351_v4 }
  0x44   :  { %1827 = vmatpush1.bf16.msra.mxu0 %v2353_v8  ;;  %v2181_v18 = vcombine.low %v145_v6, %v149_v7  ;;  %v2383_v4 = vld [vmem:[%s3441_s3 + $0xe0] ss:$8 sps:$4 sm:$0xff]   ;;  %v2384_v8 = vld [vmem:[%s3441_s3 + $0xf4] ss:$8 sps:$4 sm:$0xff]  }
  0x45   :  { %875 = vmatmul.mubr.bf16.vlgmr.msra.gmra.mrb[0].mxu1 %v2702_v10 }
  0x46   :  { %886 = vmatpush1.bf16.msra.mxu1 %v2069_v11  ;;  %917 = vmatprep.mubr.bf16.mxu1 %v2615_v20  ;;  %v2354_v11 = vld [vmem:[%s3441_s3 + $0x54] ss:$8 sps:$4 sm:$0xff]  }
  0x47   :  { %887 = vmatprep.subr.bf16.mxu1 %v2078_v12  ;;  %v2173_v12 = vcombine.low %v137_v0, %v141_v1  ;;  %1828 = vmatprep.subr.bf16.mxu0 %v2354_v11  ;;  %v2380_v0 = vld [vmem:[%s3441_s3 + $0xd0] ss:$8 sps:$4 sm:$0xff]   ;;  %v2120_v1 = vcombine.high %v82_v58, %v86_v59 }
  0x48   :  { %v2386_v11 = vld [vmem:[%s3441_s3 + $0xf0] ss:$8 sps:$4 sm:$0xff]  }
  0x4a   :  { %888 = vmatpush1.bf16.msra.mxu1 %v2077_v15  ;;  %v2356_v15 = vld [vmem:[%s3441_s3 + $0x50] ss:$8 sps:$4 sm:$0xff]  }
  0x4b   :  { %889 = vmatprep.subr.bf16.mxu1 %v2086_v16  ;;  %v2182_v16 = vcombine.high %v145_v6, %v149_v7  ;;  %1829 = vmatpush1.bf16.msra.mxu0 %v2356_v15  ;;  %v98_v6 = vld [vmem:[%s3439_s1 + $0x210] sm:$0xff]  ;;  %v2389_v15 = vld [vmem:[%s3441_s3 + $0x104] ss:$8 sps:$4 sm:$0xff]  }
  0x4c   :  { %1830 = vmatprep.subr.bf16.mxu0 %v2357_v17  ;;  %v102_v7 = vld [vmem:[%s3439_s1 + $0x230] sm:$0xff] }
  0x4e   :  { %890 = vmatpush1.bf16.msra.mxu1 %v2085_v19  ;;  %v34_v19 = vld [vmem:[%s3439_s1 + $0x10] sm:$0xff] }
  0x4f   :  { %891 = vmatprep.subr.bf16.mxu1 %v2094_v21  ;;  %v38_v21 = vld [vmem:[%s3439_s1 + $0x30] sm:$0xff]  ;;  %1831 = vmatpush1.bf16.msra.mxu0 %v2359_v22 }
  0x50   :  { %v2071_v31 = vcombine.low %v34_v19, %v38_v21 }
  0x52   :  { %892 = vmatpush1.bf16.msra.mxu1 %v2093_v24  ;;  %v2360_v24 = vld [vmem:[%s3441_s3 + $0x74] ss:$8 sps:$4 sm:$0xff]  }
  0x53   :  { %893 = vmatprep.subr.bf16.mxu1 %v2102_v25  ;;  %v2189_v25 = vcombine.low %v153_v13, %v157_v14  ;;  %1832 = vmatprep.subr.bf16.mxu0 %v2360_v24  ;;  %v106_v13 = vld [vmem:[%s3439_s1 + $0x250] sm:$0xff] }
  0x54   :  { %v110_v14 = vld [vmem:[%s3439_s1 + $0x270] sm:$0xff] }
  0x55   :  { %v2144_v17 = vcombine.high %v106_v13, %v110_v14  ;;  %v126_v24 = vld [vmem:[%s3439_s1 + $0x2f0] sm:$0xff] }
  0x56   :  { %894 = vmatpush1.bf16.msra.mxu1 %v2101_v28  ;;  %v2362_v28 = vld [vmem:[%s3441_s3 + $0x70] ss:$8 sps:$4 sm:$0xff]  }
  0x57   :  { %895 = vmatprep.subr.bf16.mxu1 %v2110_v29  ;;  %v2072_v29 = vcombine.high %v34_v19, %v38_v21  ;;  %1833 = vmatpush1.bf16.msra.mxu0 %v2362_v28  ;;  %v118_v19 = vld [vmem:[%s3439_s1 + $0x2b0] sm:$0xff]  ;;  %v2143_v21 = vcombine.low %v106_v13, %v110_v14 }
  0x58   :  { %1834 = vmatprep.subr.bf16.mxu0 %v2363_v30  ;;  %v134_v28 = vld [vmem:[%s3439_s1 + $0x330] sm:$0xff] }
  0x59   :  { %v2168_v30 = vcombine.high %v130_v27, %v134_v28 }
  0x5a   :  { %896 = vmatpush1.bf16.msra.mxu1 %v2109_v32  ;;  %v50_v32 = vld [vmem:[%s3439_s1 + $0x90] sm:$0xff] }
  0x5b   :  { %897 = vmatprep.subr.bf16.mxu1 %v2118_v33  ;;  %v54_v33 = vld [vmem:[%s3439_s1 + $0xb0] sm:$0xff]  ;;  %1835 = vmatpush1.bf16.msra.mxu0 %v2365_v34 }
  0x5e   :  { %898 = vmatpush1.bf16.msra.mxu1 %v2117_v36  ;;  %v2366_v36 = vld [vmem:[%s3441_s3 + $0x94] ss:$8 sps:$4 sm:$0xff]  }
  0x5f   :  { %899 = vmatprep.subr.bf16.mxu1 %v2126_v37  ;;  %v2368_v37 = vld [vmem:[%s3441_s3 + $0x90] ss:$8 sps:$4 sm:$0xff]   ;;  %1836 = vmatprep.subr.bf16.mxu0 %v2366_v36 }
  0x60   :  { %1837 = vmatpush1.bf16.msra.mxu0 %v2368_v37  ;;  %v150_v36 = vld [vmem:[%s3439_s1 + $0x3b0] sm:$0xff] }
  0x61   :  { %1838 = vmatprep.subr.bf16.mxu0 %v2369_v38 }
  0x62   :  { %900 = vmatpush1.bf16.msra.mxu1 %v2125_v40  ;;  %v2088_v40 = vcombine.high %v50_v32, %v54_v33 }
  0x63   :  { %901 = vmatprep.subr.bf16.mxu1 %v2134_v41  ;;  %v58_v41 = vld [vmem:[%s3439_s1 + $0xd0] sm:$0xff] }
  0x64   :  { %1839 = vmatpush1.bf16.msra.mxu0 %v2371_v43  ;;  %v35_v43 = vld [vmem:[%s3439_s1 + $0x18] sm:$0xff] }
  0x65   :  { %1840 = vmatprep.subr.bf16.mxu0 %v2372_v44  ;;  %v39_v44 = vld [vmem:[%s3439_s1 + $0x38] sm:$0xff] }
  0x66   :  { %902 = vmatpush1.bf16.msra.mxu1 %v2133_v45  ;;  %v2087_v45 = vcombine.low %v50_v32, %v54_v33  ;;  %v142_v32 = vld [vmem:[%s3439_s1 + $0x370] sm:$0xff]  ;;  %v2167_v33 = vcombine.low %v130_v27, %v134_v28  ;;  %v131_v28 = vld [vmem:[%s3439_s1 + $0x318] sm:$0xff] }
  0x67   :  { %903 = vmatprep.subr.bf16.mxu1 %v2142_v49  ;;  %v2096_v49 = vcombine.high %v58_v41, %v62_v42 }
  0x68   :  { %1841 = vmatpush1.bf16.msra.mxu0 %v2374_v48  ;;  %v47_v48 = vld [vmem:[%s3439_s1 + $0x78] sm:$0xff] }
  0x69   :  { %1842 = vmatprep.subr.bf16.mxu0 %v2375_v50 }
  0x6a   :  { %904 = vmatpush1.bf16.msra.mxu1 %v2141_v51  ;;  %v2095_v51 = vcombine.low %v58_v41, %v62_v42 }
  0x6b   :  { %905 = vmatprep.subr.bf16.mxu1 %v2150_v55  ;;  %v2104_v55 = vcombine.high %v66_v46, %v70_v47 }
  0x6c   :  { %1843 = vmatpush1.bf16.msra.mxu0 %v2377_v54 }
  0x6d   :  { %1844 = vmatprep.subr.bf16.mxu0 %v2378_v56  ;;  %v63_v56 = vld [vmem:[%s3439_s1 + $0xf8] sm:$0xff] }
  0x6e   :  { %906 = vmatpush1.bf16.msra.mxu1 %v2149_v57  ;;  %v2103_v57 = vcombine.low %v66_v46, %v70_v47  ;;  %v2074_v46 = vcombine.high %v35_v43, %v39_v44  ;;  %v43_v47 = vld [vmem:[%s3439_s1 + $0x58] sm:$0xff] }
  0x6f   :  { %907 = vmatprep.subr.bf16.mxu1 %v2158_v61  ;;  %v2111_v61 = vcombine.low %v74_v52, %v78_v53  ;;  %v2082_v50 = vcombine.high %v43_v47, %v47_v48  ;;  %v55_v52 = vld [vmem:[%s3439_s1 + $0xb8] sm:$0xff]  ;;  %v2081_v53 = vcombine.low %v43_v47, %v47_v48  ;;  %v3094_v48 = vld [vmem:[%s3442_s2] sm:$0xff] }
  0x70   :  { %1845 = vmatpush1.bf16.msra.mxu0 %v2380_v0 }
  0x71   :  { %1846 = vmatprep.subr.bf16.mxu0 %v2381_v2  ;;  %v83_v2 = vld [vmem:[%s3439_s1 + $0x198] sm:$0xff] }
  0x72   :  { %908 = vmatpush1.bf16.msra.mxu1 %v2157_v63  ;;  %v94_v63 = vld [vmem:[%s3439_s1 + $0x1f0] sm:$0xff] }
  0x73   :  { %909 = vmatprep.subr.bf16.mxu1 %v2166_v3  ;;  %v2119_v3 = vcombine.low %v82_v58, %v86_v59  ;;  %v67_v59 = vld [vmem:[%s3439_s1 + $0x118] sm:$0xff] }
  0x74   :  { %1847 = vmatpush1.bf16.msra.mxu0 %v2383_v4 }
  0x75   :  { %1848 = vmatprep.subr.bf16.mxu0 %v2384_v8 }
  0x76   :  { %910 = vmatpush1.bf16.msra.mxu1 %v2165_v5  ;;  %v2128_v5 = vcombine.high %v90_v62, %v94_v63 }
  0x77   :  { %911 = vmatprep.subr.bf16.mxu1 %v2174_v9  ;;  %v2127_v9 = vcombine.low %v90_v62, %v94_v63  ;;  %v75_v62 = vld [vmem:[%s3439_s1 + $0x158] sm:$0xff] }
  0x78   :  { %1849 = vmatpush1.bf16.msra.mxu0 %v2386_v11  ;;  %v79_v63 = vld [vmem:[%s3439_s1 + $0x178] sm:$0xff] }
  0x79   :  { %1861 = vmatprep.subr.bf16.mxu0 %v2389_v15  ;;  %v2113_v4 = vcombine.low %v75_v62, %v79_v63  ;;  %v99_v11 = vld [vmem:[%s3439_s1 + $0x218] sm:$0xff] }
  0x7a   :  { %912 = vmatpush1.bf16.msra.mxu1 %v2173_v12  ;;  %v2136_v12 = vcombine.high %v98_v6, %v102_v7  ;;  %v107_v15 = vld [vmem:[%s3439_s1 + $0x258] sm:$0xff] }
  0x7b   :  { %913 = vmatprep.subr.bf16.mxu1 %v2182_v16  ;;  %v2135_v16 = vcombine.low %v98_v6, %v102_v7  ;;  %v91_v6 = vld [vmem:[%s3439_s1 + $0x1d8] sm:$0xff] }
  0x7c   :  { %v95_v7 = vld [vmem:[%s3439_s1 + $0x1f8] sm:$0xff] }
  0x7d   :  { %v2129_v13 = vcombine.low %v91_v6, %v95_v7 }
  0x7e   :  { %914 = vmatpush1.bf16.msra.mxu1 %v2181_v18  ;;  %v114_v18 = vld [vmem:[%s3439_s1 + $0x290] sm:$0xff] }
  0x7f   :  { %915 = vmatprep.subr.bf16.mxu1 %v2190_v23  ;;  %v2152_v22 = vcombine.high %v114_v18, %v118_v19  ;;  %v122_v23 = vld [vmem:[%s3439_s1 + $0x2d0] sm:$0xff] }
  0x80   :  { %v2160_v26 = vcombine.high %v122_v23, %v126_v24 }
  0x82   :  { %916 = vmatpush1.bf16.msra.mxu1 %v2189_v25  ;;  %v2151_v25 = vcombine.low %v114_v18, %v118_v19  ;;  %v115_v19 = vld [vmem:[%s3439_s1 + $0x298] sm:$0xff] }
  0x83   :  { %928 = vmatprep.subr.bf16.mxu1 %v2072_v29  ;;  %v2159_v29 = vcombine.low %v122_v23, %v126_v24  ;;  %v123_v24 = vld [vmem:[%s3439_s1 + $0x2d8] sm:$0xff] }
  0x85   :  { %918 = vmatmul.mubr.bf16.vlgmr.msra.gmra.mrb[4].mxu1 %v2702_v10 }
  0x86   :  { %929 = vmatpush1.bf16.msra.mxu1 %v2071_v31  ;;  %960 = vmatprep.mubr.bf16.mxu1 %v2615_v20  ;;  %v138_v31 = vld [vmem:[%s3439_s1 + $0x350] sm:$0xff] }
  0x87   :  { %930 = vmatprep.subr.bf16.mxu1 %v2080_v35  ;;  %v2176_v34 = vcombine.high %v138_v31, %v142_v32  ;;  %v146_v35 = vld [vmem:[%s3439_s1 + $0x390] sm:$0xff]  ;;  %v2175_v37 = vcombine.low %v138_v31, %v142_v32  ;;  %v139_v32 = vld [vmem:[%s3439_s1 + $0x358] sm:$0xff] }
  0x88   :  { %v2184_v38 = vcombine.high %v146_v35, %v150_v36  ;;  %v2183_v41 = vcombine.low %v146_v35, %v150_v36  ;;  %v147_v36 = vld [vmem:[%s3439_s1 + $0x398] sm:$0xff] }
  0x8a   :  { %931 = vmatpush1.bf16.msra.mxu1 %v2079_v39  ;;  %v154_v39 = vld [vmem:[%s3439_s1 + $0x3d0] sm:$0xff] }
  0x8b   :  { %932 = vmatprep.subr.bf16.mxu1 %v2088_v40  ;;  %v158_v40 = vld [vmem:[%s3439_s1 + $0x3f0] sm:$0xff] }
  0x8c   :  { %v2192_v42 = vcombine.high %v154_v39, %v158_v40 }
  0x8e   :  { %933 = vmatpush1.bf16.msra.mxu1 %v2087_v45  ;;  %v2191_v45 = vcombine.low %v154_v39, %v158_v40  ;;  %v155_v40 = vld [vmem:[%s3439_s1 + $0x3d8] sm:$0xff] }
  0x8f   :  { %934 = vmatprep.subr.bf16.mxu1 %v2096_v49  ;;  %v2073_v49 = vcombine.low %v35_v43, %v39_v44 }
  0x92   :  { %935 = vmatpush1.bf16.msra.mxu1 %v2095_v51  ;;  %v51_v51 = vld [vmem:[%s3439_s1 + $0x98] sm:$0xff] }
  0x93   :  { %936 = vmatprep.subr.bf16.mxu1 %v2104_v55  ;;  %v2090_v54 = vcombine.high %v51_v51, %v55_v52  ;;  %v59_v55 = vld [vmem:[%s3439_s1 + $0xd8] sm:$0xff] }
  0x94   :  { %v2098_v58 = vcombine.high %v59_v55, %v63_v56 }
  0x96   :  { %937 = vmatpush1.bf16.msra.mxu1 %v2103_v57  ;;  %v2089_v57 = vcombine.low %v51_v51, %v55_v52 }
  0x97   :  { %938 = vmatprep.subr.bf16.mxu1 %v2112_v60  ;;  %v2097_v60 = vcombine.low %v59_v55, %v63_v56 }
  0x9a   :  { %939 = vmatpush1.bf16.msra.mxu1 %v2111_v61 }
  0x9b   :  { %940 = vmatprep.subr.bf16.mxu1 %v2120_v1  ;;  %v2114_v1 = vcombine.high %v75_v62, %v79_v63 }
  0x9e   :  { %941 = vmatpush1.bf16.msra.mxu1 %v2119_v3  ;;  %v87_v3 = vld [vmem:[%s3439_s1 + $0x1b8] sm:$0xff] }
  0x9f   :  { %942 = vmatprep.subr.bf16.mxu1 %v2128_v5  ;;  %v2122_v5 = vcombine.high %v83_v2, %v87_v3  ;;  %v2121_v8 = vcombine.low %v83_v2, %v87_v3  ;;  %v2390_v2 = vld [vmem:[%s3441_s3 + $0x110] ss:$8 sps:$4 sm:$0xff]   ;;  %v2395_v3 = vld [vmem:[%s3441_s3 + $0x124] ss:$8 sps:$4 sm:$0xff]  }
  0xa2   :  { %943 = vmatpush1.bf16.msra.mxu1 %v2127_v9  ;;  %v2130_v9 = vcombine.high %v91_v6, %v95_v7  ;;  %v2396_v6 = vld [vmem:[%s3441_s3 + $0x130] ss:$8 sps:$4 sm:$0xff]   ;;  %v2401_v7 = vld [vmem:[%s3441_s3 + $0x144] ss:$8 sps:$4 sm:$0xff]  }
  0xa3   :  { %944 = vmatprep.subr.bf16.mxu1 %v2136_v12  ;;  %v103_v12 = vld [vmem:[%s3439_s1 + $0x238] sm:$0xff] }
  0xa4   :  { %v2138_v14 = vcombine.high %v99_v11, %v103_v12 }
  0xa6   :  { %945 = vmatpush1.bf16.msra.mxu1 %v2135_v16  ;;  %v111_v16 = vld [vmem:[%s3439_s1 + $0x278] sm:$0xff] }
  0xa7   :  { %946 = vmatprep.subr.bf16.mxu1 %v2144_v17  ;;  %v2137_v17 = vcombine.low %v99_v11, %v103_v12  ;;  %v2146_v18 = vcombine.high %v107_v15, %v111_v16  ;;  %v2402_v11 = vld [vmem:[%s3441_s3 + $0x150] ss:$8 sps:$4 sm:$0xff]   ;;  %v2407_v12 = vld [vmem:[%s3441_s3 + $0x164] ss:$8 sps:$4 sm:$0xff]  }
  0xaa   :  { %947 = vmatpush1.bf16.msra.mxu1 %v2143_v21  ;;  %v119_v21 = vld [vmem:[%s3439_s1 + $0x2b8] sm:$0xff] }
  0xab   :  { %948 = vmatprep.subr.bf16.mxu1 %v2152_v22  ;;  %v2145_v22 = vcombine.low %v107_v15, %v111_v16  ;;  %v2154_v23 = vcombine.high %v115_v19, %v119_v21  ;;  %v2408_v15 = vld [vmem:[%s3441_s3 + $0x170] ss:$8 sps:$4 sm:$0xff]   ;;  %v2413_v16 = vld [vmem:[%s3441_s3 + $0x184] ss:$8 sps:$4 sm:$0xff]  }
  0xae   :  { %949 = vmatpush1.bf16.msra.mxu1 %v2151_v25  ;;  %v127_v25 = vld [vmem:[%s3439_s1 + $0x2f8] sm:$0xff] }
  0xaf   :  { %950 = vmatprep.subr.bf16.mxu1 %v2160_v26  ;;  %v2153_v26 = vcombine.low %v115_v19, %v119_v21  ;;  %v2162_v27 = vcombine.high %v123_v24, %v127_v25  ;;  %v2414_v19 = vld [vmem:[%s3441_s3 + $0x190] ss:$8 sps:$4 sm:$0xff]   ;;  %v2419_v21 = vld [vmem:[%s3441_s3 + $0x1a4] ss:$8 sps:$4 sm:$0xff]  }
  0xb2   :  { %951 = vmatpush1.bf16.msra.mxu1 %v2159_v29  ;;  %v135_v29 = vld [vmem:[%s3439_s1 + $0x338] sm:$0xff] }
  0xb3   :  { %952 = vmatprep.subr.bf16.mxu1 %v2168_v30  ;;  %v2161_v30 = vcombine.low %v123_v24, %v127_v25  ;;  %v2170_v31 = vcombine.high %v131_v28, %v135_v29  ;;  %v2420_v24 = vld [vmem:[%s3441_s3 + $0x1b0] ss:$8 sps:$4 sm:$0xff]   ;;  %v2425_v25 = vld [vmem:[%s3441_s3 + $0x1c4] ss:$8 sps:$4 sm:$0xff]  }
  0xb6   :  { %953 = vmatpush1.bf16.msra.mxu1 %v2167_v33  ;;  %v143_v33 = vld [vmem:[%s3439_s1 + $0x378] sm:$0xff] }
  0xb7   :  { %954 = vmatprep.subr.bf16.mxu1 %v2176_v34  ;;  %v2169_v34 = vcombine.low %v131_v28, %v135_v29  ;;  %v2178_v35 = vcombine.high %v139_v32, %v143_v33 }
  0xba   :  { %955 = vmatpush1.bf16.msra.mxu1 %v2175_v37  ;;  %v151_v37 = vld [vmem:[%s3439_s1 + $0x3b8] sm:$0xff] }
  0xbb   :  { %956 = vmatprep.subr.bf16.mxu1 %v2184_v38  ;;  %v2177_v38 = vcombine.low %v139_v32, %v143_v33  ;;  %v2186_v39 = vcombine.high %v147_v36, %v151_v37  ;;  %v2431_v32 = vld [vmem:[%s3441_s3 + $0x1e4] ss:$8 sps:$4 sm:$0xff]  }
  0xbe   :  { %957 = vmatpush1.bf16.msra.mxu1 %v2183_v41  ;;  %v159_v41 = vld [vmem:[%s3439_s1 + $0x3f8] sm:$0xff] }
  0xbf   :  { %958 = vmatprep.subr.bf16.mxu1 %v2192_v42  ;;  %v2185_v42 = vcombine.low %v147_v36, %v151_v37  ;;  %v2194_v43 = vcombine.high %v155_v40, %v159_v41  ;;  %v2193_v44 = vcombine.low %v155_v40, %v159_v41 }
  0xc2   :  { %959 = vmatpush1.bf16.msra.mxu1 %v2191_v45  ;;  %v162_v45 = vlaneseq }
  0xc3   :  { %971 = vmatprep.subr.bf16.mxu1 %v2074_v46 }
  0xc4   :  { %v3086_v46 = vshrl.u32 %v162_v45, 7  ;;  %v2432_v45 = vld [vmem:[%s3441_s3 + $0x1f0] ss:$8 sps:$4 sm:$0xff]  }
  0xc5   :  { %961 = vmatmul.mubr.bf16.vlgmr.msra.gmra.mrb[8].mxu1 %v2702_v10 }
  0xc6   :  { %972 = vmatpush1.bf16.msra.mxu1 %v2073_v49  ;;  %1003 = vmatprep.mubr.bf16.mxu1 %v2615_v20  ;;  %v71_v20 = vld [vmem:[%s3439_s1 + $0x138] sm:$0xff]  ;;  %v3089_v47 = vsub.s32 0, %v3086_v46  ;;  %v3097_v49 = vsub.s32 1, %v3086_v46  ;;  %v172_v28 = vsub.s32 2, %v3086_v46  ;;  %v176_v29 = vsub.s32 3, %v3086_v46 }
  0xc7   :  { %973 = vmatprep.subr.bf16.mxu1 %v2082_v50  ;;  %v2106_v61 = vcombine.high %v67_v59, %v71_v20  ;;  %v2105_v0 = vcombine.low %v67_v59, %v71_v20 }
  0xc8   :  { %v165_v50 = vrot.slane %v3094_v48, %v3089_v47  ;;  %v177_v33 = vrot.slane %v3094_v48, %v176_v29 }
  0xca   :  { %974 = vmatpush1.bf16.msra.mxu1 %v2081_v53 }
  0xcb   :  { %975 = vmatprep.subr.bf16.mxu1 %v2090_v54 }
  0xce   :  { %976 = vmatpush1.bf16.msra.mxu1 %v2089_v57 }
  0xcf   :  { %977 = vmatprep.subr.bf16.mxu1 %v2098_v58 }
  0xd2   :  { %978 = vmatpush1.bf16.msra.mxu1 %v2097_v60 }
  0xd3   :  { %979 = vmatprep.subr.bf16.mxu1 %v2106_v61 }
  0xd6   :  { %980 = vmatpush1.bf16.msra.mxu1 %v2105_v0  ;;  %v2387_v0 = vld [vmem:[%s3441_s3 + $0x100] ss:$8 sps:$4 sm:$0xff]  }
  0xd7   :  { %981 = vmatprep.subr.bf16.mxu1 %v2114_v1  ;;  %v2392_v1 = vld [vmem:[%s3441_s3 + $0x114] ss:$8 sps:$4 sm:$0xff]  }
  0xda   :  { %982 = vmatpush1.bf16.msra.mxu1 %v2113_v4  ;;  %v2393_v4 = vld [vmem:[%s3441_s3 + $0x120] ss:$8 sps:$4 sm:$0xff]  }
  0xdb   :  { %983 = vmatprep.subr.bf16.mxu1 %v2122_v5  ;;  %v2398_v5 = vld [vmem:[%s3441_s3 + $0x134] ss:$8 sps:$4 sm:$0xff]  }
  0xde   :  { %984 = vmatpush1.bf16.msra.mxu1 %v2121_v8  ;;  %v2399_v8 = vld [vmem:[%s3441_s3 + $0x140] ss:$8 sps:$4 sm:$0xff]  }
  0xdf   :  { %985 = vmatprep.subr.bf16.mxu1 %v2130_v9  ;;  %v2404_v9 = vld [vmem:[%s3441_s3 + $0x154] ss:$8 sps:$4 sm:$0xff]  }
  0xe2   :  { %986 = vmatpush1.bf16.msra.mxu1 %v2129_v13  ;;  %v2405_v13 = vld [vmem:[%s3441_s3 + $0x160] ss:$8 sps:$4 sm:$0xff]  }
  0xe3   :  { %987 = vmatprep.subr.bf16.mxu1 %v2138_v14  ;;  %v2410_v14 = vld [vmem:[%s3441_s3 + $0x174] ss:$8 sps:$4 sm:$0xff]  }
  0xe6   :  { %988 = vmatpush1.bf16.msra.mxu1 %v2137_v17  ;;  %v2411_v17 = vld [vmem:[%s3441_s3 + $0x180] ss:$8 sps:$4 sm:$0xff]  }
  0xe7   :  { %989 = vmatprep.subr.bf16.mxu1 %v2146_v18  ;;  %v2416_v18 = vld [vmem:[%s3441_s3 + $0x194] ss:$8 sps:$4 sm:$0xff]  }
  0xea   :  { %990 = vmatpush1.bf16.msra.mxu1 %v2145_v22  ;;  %v2417_v22 = vld [vmem:[%s3441_s3 + $0x1a0] ss:$8 sps:$4 sm:$0xff]  }
  0xeb   :  { %991 = vmatprep.subr.bf16.mxu1 %v2154_v23  ;;  %v2422_v23 = vld [vmem:[%s3441_s3 + $0x1b4] ss:$8 sps:$4 sm:$0xff]  }
  0xee   :  { %992 = vmatpush1.bf16.msra.mxu1 %v2153_v26  ;;  %v2423_v26 = vld [vmem:[%s3441_s3 + $0x1c0] ss:$8 sps:$4 sm:$0xff]  }
  0xef   :  { %993 = vmatprep.subr.bf16.mxu1 %v2162_v27  ;;  %v2428_v27 = vld [vmem:[%s3441_s3 + $0x1d4] ss:$8 sps:$4 sm:$0xff]  }
  0xf2   :  { %994 = vmatpush1.bf16.msra.mxu1 %v2161_v30  ;;  %v2426_v30 = vld [vmem:[%s3441_s3 + $0x1d0] ss:$8 sps:$4 sm:$0xff]  }
  0xf3   :  { %995 = vmatprep.subr.bf16.mxu1 %v2170_v31  ;;  %v173_v31 = vrot.slane %v3094_v48, %v172_v28  ;;  %v2482_v28 = vld [vmem:[%s3441_s3 + $0x2f4] ss:$8 sps:$4 sm:$0xff]  }
  0xf6   :  { %996 = vmatpush1.bf16.msra.mxu1 %v2169_v34 }
  0xf7   :  { %997 = vmatprep.subr.bf16.mxu1 %v2178_v35  ;;  %v2429_v35 = vld [vmem:[%s3441_s3 + $0x1e0] ss:$8 sps:$4 sm:$0xff]  }
  0xfa   :  { %998 = vmatpush1.bf16.msra.mxu1 %v2177_v38  ;;  %v2434_v38 = vld [vmem:[%s3441_s3 + $0x1f4] ss:$8 sps:$4 sm:$0xff]  }
  0xfb   :  { %999 = vmatprep.subr.bf16.mxu1 %v2186_v39 }
  0xfe   :  { %1000 = vmatpush1.bf16.msra.mxu1 %v2185_v42 }
  0xff   :  { %1001 = vmatprep.subr.bf16.mxu1 %v2194_v43 }
 0x102   :  { %1002 = vmatpush1.bf16.msra.mxu1 %v2193_v44 }
 0x105   :  { %1004 = vmatmul.mubr.bf16.vlgmr.msra.gmra.mrb[12].mxu1 %v2702_v10  ;;  %v169_v10 = vrot.slane %v3094_v48, %v3097_v49 }
 0x118   :  { %v876_v51 = vpop.f32.mrb[0].mxu1 }
 0x119   :  { %v877_v52 = vadd.f32 %v876_v51, %v165_v50  ;;  %v878_v53 = vpop.f32.mrb[1].mxu1 }
 0x11a   :  { %v879_v54 = vadd.f32 %v878_v53, %v169_v10  ;;  %v880_v55 = vpop.f32.mrb[2].mxu1 }
 0x11b   :  { %v1014_v56 = vmax.f32 %v877_v52, 0.0  ;;  %v881_v57 = vadd.f32 %v880_v55, %v165_v50  ;;  %v882_v58 = vpop.f32.mrb[3].mxu1  ;;  %v2435_v55 = vld [vmem:[%s3441_s3 + $0x200] ss:$8 sps:$4 sm:$0xff]  }
 0x11c   :  { %v883_v59 = vadd.f32 %v882_v58, %v169_v10  ;;  %v1015_v60 = vmax.f32 %v879_v54, 0.0  ;;  %v2437_v10 = vld [vmem:[%s3441_s3 + $0x204] ss:$8 sps:$4 sm:$0xff]  }
 0x11d   :  { %v1022_v20 = vmax.f32 %v881_v57, 0.0  ;;  %v2438_v57 = vld [vmem:[%s3441_s3 + $0x210] ss:$8 sps:$4 sm:$0xff]   ;;  %v2443_v58 = vld [vmem:[%s3441_s3 + $0x224] ss:$8 sps:$4 sm:$0xff]  }
 0x11e   :  { %v1023_v61 = vmax.f32 %v883_v59, 0.0  ;;  %v2441_v59 = vld [vmem:[%s3441_s3 + $0x220] ss:$8 sps:$4 sm:$0xff]  }
 0x11f   :  { %v1030_v62 = vpack.c.bf16 %v1022_v20, %v1014_v56  ;;  %v2440_v56 = vld [vmem:[%s3441_s3 + $0x214] ss:$8 sps:$4 sm:$0xff]  }
 0x120   :  { %v1031_v63 = vpack.c.bf16 %v1023_v61, %v1015_v60  ;;  %v2446_v20 = vld [vmem:[%s3441_s3 + $0x234] ss:$8 sps:$4 sm:$0xff]   ;;  %v2444_v60 = vld [vmem:[%s3441_s3 + $0x230] ss:$8 sps:$4 sm:$0xff]   ;;  %v2449_v61 = vld [vmem:[%s3441_s3 + $0x244] ss:$8 sps:$4 sm:$0xff]  }
 0x122   :  { %1850 = vmatprep.mubr.bf16.mxu0 %v1031_v63  ;;  %v2452_v63 = vld [vmem:[%s3441_s3 + $0x254] ss:$8 sps:$4 sm:$0xff]  }
 0x123   :  { %1851 = vmatmul.mubr.bf16.vlgmr.msra.gmra.mrb[0].mxu0 %v1030_v62  ;;  %v2447_v62 = vld [vmem:[%s3441_s3 + $0x240] ss:$8 sps:$4 sm:$0xff]  }
 0x124   :  { %1862 = vmatpush1.bf16.msra.mxu0 %v2387_v0  ;;  %v2450_v0 = vld [vmem:[%s3441_s3 + $0x250] ss:$8 sps:$4 sm:$0xff]  }
 0x125   :  { %1863 = vmatprep.subr.bf16.mxu0 %v2392_v1  ;;  %v2455_v1 = vld [vmem:[%s3441_s3 + $0x264] ss:$8 sps:$4 sm:$0xff]  }
 0x128   :  { %1864 = vmatpush1.bf16.msra.mxu0 %v2390_v2  ;;  %v2453_v2 = vld [vmem:[%s3441_s3 + $0x260] ss:$8 sps:$4 sm:$0xff]  }
 0x129   :  { %1865 = vmatprep.subr.bf16.mxu0 %v2395_v3  ;;  %v2458_v3 = vld [vmem:[%s3441_s3 + $0x274] ss:$8 sps:$4 sm:$0xff]  }
 0x12c   :  { %1866 = vmatpush1.bf16.msra.mxu0 %v2393_v4  ;;  %v2456_v4 = vld [vmem:[%s3441_s3 + $0x270] ss:$8 sps:$4 sm:$0xff]  }
 0x12d   :  { %1867 = vmatprep.subr.bf16.mxu0 %v2398_v5  ;;  %v2461_v5 = vld [vmem:[%s3441_s3 + $0x284] ss:$8 sps:$4 sm:$0xff]  }
 0x130   :  { %1868 = vmatpush1.bf16.msra.mxu0 %v2396_v6  ;;  %v2459_v6 = vld [vmem:[%s3441_s3 + $0x280] ss:$8 sps:$4 sm:$0xff]  }
 0x131   :  { %1869 = vmatprep.subr.bf16.mxu0 %v2401_v7  ;;  %v2464_v7 = vld [vmem:[%s3441_s3 + $0x294] ss:$8 sps:$4 sm:$0xff]  }
 0x134   :  { %1870 = vmatpush1.bf16.msra.mxu0 %v2399_v8  ;;  %v2462_v8 = vld [vmem:[%s3441_s3 + $0x290] ss:$8 sps:$4 sm:$0xff]  }
 0x135   :  { %1871 = vmatprep.subr.bf16.mxu0 %v2404_v9  ;;  %v2467_v9 = vld [vmem:[%s3441_s3 + $0x2a4] ss:$8 sps:$4 sm:$0xff]  }
 0x138   :  { %1872 = vmatpush1.bf16.msra.mxu0 %v2402_v11  ;;  %v2465_v11 = vld [vmem:[%s3441_s3 + $0x2a0] ss:$8 sps:$4 sm:$0xff]  }
 0x139   :  { %1873 = vmatprep.subr.bf16.mxu0 %v2407_v12  ;;  %v2470_v12 = vld [vmem:[%s3441_s3 + $0x2b4] ss:$8 sps:$4 sm:$0xff]  }
 0x13c   :  { %1874 = vmatpush1.bf16.msra.mxu0 %v2405_v13  ;;  %v2468_v13 = vld [vmem:[%s3441_s3 + $0x2b0] ss:$8 sps:$4 sm:$0xff]  }
 0x13d   :  { %1875 = vmatprep.subr.bf16.mxu0 %v2410_v14  ;;  %v2473_v14 = vld [vmem:[%s3441_s3 + $0x2c4] ss:$8 sps:$4 sm:$0xff]  }
 0x140   :  { %1876 = vmatpush1.bf16.msra.mxu0 %v2408_v15  ;;  %v2471_v15 = vld [vmem:[%s3441_s3 + $0x2c0] ss:$8 sps:$4 sm:$0xff]  }
 0x141   :  { %1877 = vmatprep.subr.bf16.mxu0 %v2413_v16  ;;  %v2476_v16 = vld [vmem:[%s3441_s3 + $0x2d4] ss:$8 sps:$4 sm:$0xff]  }
 0x144   :  { %1878 = vmatpush1.bf16.msra.mxu0 %v2411_v17  ;;  %v180_v17 = vsub.s32 4, %v3086_v46 }
 0x145   :  { %1879 = vmatprep.subr.bf16.mxu0 %v2416_v18  ;;  %v184_v18 = vsub.s32 5, %v3086_v46 }
 0x148   :  { %1880 = vmatpush1.bf16.msra.mxu0 %v2414_v19  ;;  %v2474_v19 = vld [vmem:[%s3441_s3 + $0x2d0] ss:$8 sps:$4 sm:$0xff]  }
 0x149   :  { %1881 = vmatprep.subr.bf16.mxu0 %v2419_v21  ;;  %v181_v21 = vrot.slane %v3094_v48, %v180_v17 }
 0x14c   :  { %1882 = vmatpush1.bf16.msra.mxu0 %v2417_v22  ;;  %v2479_v22 = vld [vmem:[%s3441_s3 + $0x2e4] ss:$8 sps:$4 sm:$0xff]  }
 0x14d   :  { %1883 = vmatprep.subr.bf16.mxu0 %v2422_v23  ;;  %v185_v23 = vrot.slane %v3094_v48, %v184_v18 }
 0x150   :  { %1884 = vmatpush1.bf16.msra.mxu0 %v2420_v24 }
 0x151   :  { %1885 = vmatprep.subr.bf16.mxu0 %v2425_v25  ;;  %v2477_v25 = vld [vmem:[%s3441_s3 + $0x2e0] ss:$8 sps:$4 sm:$0xff]  }
 0x154   :  { %1886 = vmatpush1.bf16.msra.mxu0 %v2423_v26 }
 0x155   :  { %1887 = vmatprep.subr.bf16.mxu0 %v2428_v27 }
 0x158   :  { %v919_v34 = vpop.f32.mrb[4].mxu1  ;;  %1888 = vmatpush1.bf16.msra.mxu0 %v2426_v30 }
 0x159   :  { %v920_v36 = vadd.f32 %v919_v34, %v173_v31  ;;  %v921_v37 = vpop.f32.mrb[5].mxu1  ;;  %1889 = vmatprep.subr.bf16.mxu0 %v2431_v32 }
 0x15a   :  { %v922_v39 = vadd.f32 %v921_v37, %v177_v33  ;;  %v923_v40 = vpop.f32.mrb[6].mxu1  ;;  %v2485_v37 = vld [vmem:[%s3441_s3 + $0x304] ss:$8 sps:$4 sm:$0xff]  }
 0x15b   :  { %v1016_v41 = vmax.f32 %v920_v36, 0.0  ;;  %v924_v42 = vadd.f32 %v923_v40, %v173_v31  ;;  %v925_v43 = vpop.f32.mrb[7].mxu1 }
 0x15c   :  { %v926_v44 = vadd.f32 %v925_v43, %v177_v33  ;;  %1890 = vmatpush1.bf16.msra.mxu0 %v2429_v35  ;;  %v1017_v51 = vmax.f32 %v922_v39, 0.0  ;;  %v2480_v35 = vld [vmem:[%s3441_s3 + $0x2f0] ss:$8 sps:$4 sm:$0xff]   ;;  %v2488_v43 = vld [vmem:[%s3441_s3 + $0x314] ss:$8 sps:$4 sm:$0xff]  }
 0x15d   :  { %v1024_v50 = vmax.f32 %v924_v42, 0.0  ;;  %1891 = vmatprep.subr.bf16.mxu0 %v2434_v38  ;;  %v2483_v42 = vld [vmem:[%s3441_s3 + $0x300] ss:$8 sps:$4 sm:$0xff]  }
 0x15e   :  { %v1025_v52 = vmax.f32 %v926_v44, 0.0  ;;  %v2486_v44 = vld [vmem:[%s3441_s3 + $0x310] ss:$8 sps:$4 sm:$0xff]  }
 0x15f   :  { %v1032_v53 = vpack.c.bf16 %v1024_v50, %v1016_v41  ;;  %v2489_v50 = vld [vmem:[%s3441_s3 + $0x320] ss:$8 sps:$4 sm:$0xff]  }
 0x160   :  { %v1033_v54 = vpack.c.bf16 %v1025_v52, %v1017_v51  ;;  %1892 = vmatpush1.bf16.msra.mxu0 %v2432_v45  ;;  %v2491_v45 = vld [vmem:[%s3441_s3 + $0x324] ss:$8 sps:$4 sm:$0xff]   ;;  %v2492_v51 = vld [vmem:[%s3441_s3 + $0x330] ss:$8 sps:$4 sm:$0xff]  }
 0x161   :  { %1904 = vmatprep.subr.bf16.mxu0 %v2437_v10  ;;  %v2494_v10 = vld [vmem:[%s3441_s3 + $0x334] ss:$8 sps:$4 sm:$0xff]   ;;  %v2497_v52 = vld [vmem:[%s3441_s3 + $0x344] ss:$8 sps:$4 sm:$0xff]  }
 0x162   :  { %1893 = vmatprep.mubr.bf16.mxu0 %v1033_v54  ;;  %v2500_v54 = vld [vmem:[%s3441_s3 + $0x354] ss:$8 sps:$4 sm:$0xff]  }
 0x163   :  { %1894 = vmatmul.mubr.bf16.vlgmr.msra.gmra.mrb[0].mxu0 %v1032_v53  ;;  %v2495_v53 = vld [vmem:[%s3441_s3 + $0x340] ss:$8 sps:$4 sm:$0xff]  }
 0x164   :  { %1905 = vmatpush1.bf16.msra.mxu0 %v2435_v55  ;;  %v2498_v55 = vld [vmem:[%s3441_s3 + $0x350] ss:$8 sps:$4 sm:$0xff]  }
 0x165   :  { %1906 = vmatprep.subr.bf16.mxu0 %v2440_v56  ;;  %v2503_v56 = vld [vmem:[%s3441_s3 + $0x364] ss:$8 sps:$4 sm:$0xff]  }
 0x168   :  { %1907 = vmatpush1.bf16.msra.mxu0 %v2438_v57  ;;  %v2501_v57 = vld [vmem:[%s3441_s3 + $0x360] ss:$8 sps:$4 sm:$0xff]  }
 0x169   :  { %1908 = vmatprep.subr.bf16.mxu0 %v2443_v58  ;;  %v2506_v58 = vld [vmem:[%s3441_s3 + $0x374] ss:$8 sps:$4 sm:$0xff]  }
 0x16c   :  { %1909 = vmatpush1.bf16.msra.mxu0 %v2441_v59  ;;  %v2504_v59 = vld [vmem:[%s3441_s3 + $0x370] ss:$8 sps:$4 sm:$0xff]  }
 0x16d   :  { %1910 = vmatprep.subr.bf16.mxu0 %v2446_v20  ;;  %v2509_v20 = vld [vmem:[%s3441_s3 + $0x384] ss:$8 sps:$4 sm:$0xff]  }
 0x170   :  { %1911 = vmatpush1.bf16.msra.mxu0 %v2444_v60  ;;  %v2507_v60 = vld [vmem:[%s3441_s3 + $0x380] ss:$8 sps:$4 sm:$0xff]  }
 0x171   :  { %1912 = vmatprep.subr.bf16.mxu0 %v2449_v61  ;;  %v2512_v61 = vld [vmem:[%s3441_s3 + $0x394] ss:$8 sps:$4 sm:$0xff]  }
 0x174   :  { %1913 = vmatpush1.bf16.msra.mxu0 %v2447_v62  ;;  %v2510_v62 = vld [vmem:[%s3441_s3 + $0x390] ss:$8 sps:$4 sm:$0xff]  }
 0x175   :  { %1914 = vmatprep.subr.bf16.mxu0 %v2452_v63  ;;  %v2515_v63 = vld [vmem:[%s3441_s3 + $0x3a4] ss:$8 sps:$4 sm:$0xff]  }
 0x178   :  { %1915 = vmatpush1.bf16.msra.mxu0 %v2450_v0  ;;  %v2513_v0 = vld [vmem:[%s3441_s3 + $0x3a0] ss:$8 sps:$4 sm:$0xff]  }
 0x179   :  { %1916 = vmatprep.subr.bf16.mxu0 %v2455_v1  ;;  %v2518_v1 = vld [vmem:[%s3441_s3 + $0x3b4] ss:$8 sps:$4 sm:$0xff]  }
 0x17c   :  { %1917 = vmatpush1.bf16.msra.mxu0 %v2453_v2  ;;  %v2516_v2 = vld [vmem:[%s3441_s3 + $0x3b0] ss:$8 sps:$4 sm:$0xff]  }
 0x17d   :  { %1918 = vmatprep.subr.bf16.mxu0 %v2458_v3  ;;  %v2521_v3 = vld [vmem:[%s3441_s3 + $0x3c4] ss:$8 sps:$4 sm:$0xff]  }
 0x180   :  { %1919 = vmatpush1.bf16.msra.mxu0 %v2456_v4  ;;  %v2519_v4 = vld [vmem:[%s3441_s3 + $0x3c0] ss:$8 sps:$4 sm:$0xff]  }
 0x181   :  { %1920 = vmatprep.subr.bf16.mxu0 %v2461_v5  ;;  %v2524_v5 = vld [vmem:[%s3441_s3 + $0x3d4] ss:$8 sps:$4 sm:$0xff]  }
 0x184   :  { %1921 = vmatpush1.bf16.msra.mxu0 %v2459_v6  ;;  %v188_v6 = vsub.s32 6, %v3086_v46 }
 0x185   :  { %1922 = vmatprep.subr.bf16.mxu0 %v2464_v7  ;;  %v192_v7 = vsub.s32 7, %v3086_v46  ;;  %v2525_v46 = vld [vmem:[%s3441_s3 + $0x3e0] ss:$8 sps:$4 sm:$0xff]  }
 0x188   :  { %1923 = vmatpush1.bf16.msra.mxu0 %v2462_v8  ;;  %v2522_v8 = vld [vmem:[%s3441_s3 + $0x3d0] ss:$8 sps:$4 sm:$0xff]  }
 0x189   :  { %1924 = vmatprep.subr.bf16.mxu0 %v2467_v9  ;;  %v189_v9 = vrot.slane %v3094_v48, %v188_v6 }
 0x18c   :  { %1925 = vmatpush1.bf16.msra.mxu0 %v2465_v11  ;;  %v2527_v11 = vld [vmem:[%s3441_s3 + $0x3e4] ss:$8 sps:$4 sm:$0xff]  }
 0x18d   :  { %1926 = vmatprep.subr.bf16.mxu0 %v2470_v12  ;;  %v193_v12 = vrot.slane %v3094_v48, %v192_v7  ;;  %v2528_v48 = vld [vmem:[%s3441_s3 + $0x3f0] ss:$8 sps:$4 sm:$0xff]  }
 0x190   :  { %1927 = vmatpush1.bf16.msra.mxu0 %v2468_v13 }
 0x191   :  { %1928 = vmatprep.subr.bf16.mxu0 %v2473_v14 }
 0x194   :  { %1929 = vmatpush1.bf16.msra.mxu0 %v2471_v15 }
 0x195   :  { %1930 = vmatprep.subr.bf16.mxu0 %v2476_v16  ;;  %v2530_v16 = vld [vmem:[%s3441_s3 + $0x3f4] ss:$8 sps:$4 sm:$0xff]  }
 0x198   :  { %v962_v24 = vpop.f32.mrb[8].mxu1  ;;  %1931 = vmatpush1.bf16.msra.mxu0 %v2474_v19 }
 0x199   :  { %v963_v26 = vadd.f32 %v962_v24, %v181_v21  ;;  %v964_v27 = vpop.f32.mrb[9].mxu1  ;;  %1932 = vmatprep.subr.bf16.mxu0 %v2479_v22 }
 0x19a   :  { %v965_v29 = vadd.f32 %v964_v27, %v185_v23  ;;  %v966_v30 = vpop.f32.mrb[10].mxu1 }
 0x19b   :  { %v1018_v31 = vmax.f32 %v963_v26, 0.0  ;;  %v967_v32 = vadd.f32 %v966_v30, %v181_v21  ;;  %v968_v33 = vpop.f32.mrb[11].mxu1 }
 0x19c   :  { %v969_v34 = vadd.f32 %v968_v33, %v185_v23  ;;  %1933 = vmatpush1.bf16.msra.mxu0 %v2477_v25  ;;  %v1019_v38 = vmax.f32 %v965_v29, 0.0  ;;  %v1166_v29 = vld [vmem:[%s3443_s4] sm:$0x3] }
 0x19d   :  { %v1026_v36 = vmax.f32 %v967_v32, 0.0  ;;  %1934 = vmatprep.subr.bf16.mxu0 %v2482_v28  ;;  %v1171_v30 = vrot.slane %v1166_v29, %v3089_v47 }
 0x19e   :  { %v1027_v39 = vmax.f32 %v969_v34, 0.0 }
 0x19f   :  { %v1034_v40 = vpack.c.bf16 %v1026_v36, %v1018_v31  ;;  %v1175_v31 = vrot.slane %v1166_v29, %v3097_v49 }
 0x1a0   :  { %v1035_v41 = vpack.c.bf16 %v1027_v39, %v1019_v38  ;;  %1935 = vmatpush1.bf16.msra.mxu0 %v2480_v35  ;;  %v2535_v39 = vld [vmem:[%s3440_s0] sm:$0xff] }
 0x1a1   :  { %1947 = vmatprep.subr.bf16.mxu0 %v2485_v37 }
 0x1a2   :  { %1936 = vmatprep.mubr.bf16.mxu0 %v1035_v41 }
 0x1a3   :  { %1937 = vmatmul.mubr.bf16.vlgmr.msra.gmra.mrb[0].mxu0 %v1034_v40 }
 0x1a4   :  { %1948 = vmatpush1.bf16.msra.mxu0 %v2483_v42  ;;  %v2536_v42 = vld [vmem:[%s3440_s0 + $0x8] sm:$0xff] }
 0x1a5   :  { %1949 = vmatprep.subr.bf16.mxu0 %v2488_v43 }
 0x1a8   :  { %1950 = vmatpush1.bf16.msra.mxu0 %v2486_v44  ;;  %v2537_v44 = vld [vmem:[%s3440_s0 + $0x10] sm:$0xff] }
 0x1a9   :  { %1951 = vmatprep.subr.bf16.mxu0 %v2491_v45 }
 0x1ac   :  { %1952 = vmatpush1.bf16.msra.mxu0 %v2489_v50  ;;  %v2538_v50 = vld [vmem:[%s3440_s0 + $0x18] sm:$0xff] }
 0x1ad   :  { %1953 = vmatprep.subr.bf16.mxu0 %v2494_v10 }
 0x1b0   :  { %1954 = vmatpush1.bf16.msra.mxu0 %v2492_v51 }
 0x1b1   :  { %1955 = vmatprep.subr.bf16.mxu0 %v2497_v52 }
 0x1b4   :  { %1956 = vmatpush1.bf16.msra.mxu0 %v2495_v53 }
 0x1b5   :  { %1957 = vmatprep.subr.bf16.mxu0 %v2500_v54 }
 0x1b8   :  { %1958 = vmatpush1.bf16.msra.mxu0 %v2498_v55 }
 0x1b9   :  { %1959 = vmatprep.subr.bf16.mxu0 %v2503_v56 }
 0x1bc   :  { %1960 = vmatpush1.bf16.msra.mxu0 %v2501_v57 }
 0x1bd   :  { %1961 = vmatprep.subr.bf16.mxu0 %v2506_v58 }
 0x1c0   :  { %1962 = vmatpush1.bf16.msra.mxu0 %v2504_v59 }
 0x1c1   :  { %1963 = vmatprep.subr.bf16.mxu0 %v2509_v20 }
 0x1c4   :  { %1964 = vmatpush1.bf16.msra.mxu0 %v2507_v60 }
 0x1c5   :  { %1965 = vmatprep.subr.bf16.mxu0 %v2512_v61 }
 0x1c8   :  { %1966 = vmatpush1.bf16.msra.mxu0 %v2510_v62 }
 0x1c9   :  { %1967 = vmatprep.subr.bf16.mxu0 %v2515_v63 }
 0x1cc   :  { %1968 = vmatpush1.bf16.msra.mxu0 %v2513_v0 }
 0x1cd   :  { %1969 = vmatprep.subr.bf16.mxu0 %v2518_v1 }
 0x1d0   :  { %1970 = vmatpush1.bf16.msra.mxu0 %v2516_v2 }
 0x1d1   :  { %1971 = vmatprep.subr.bf16.mxu0 %v2521_v3 }
 0x1d4   :  { %1972 = vmatpush1.bf16.msra.mxu0 %v2519_v4 }
 0x1d5   :  { %1973 = vmatprep.subr.bf16.mxu0 %v2524_v5 }
 0x1d8   :  { %v1005_v13 = vpop.f32.mrb[12].mxu1  ;;  %1974 = vmatpush1.bf16.msra.mxu0 %v2522_v8  ;;  %v2027_v8 = vld [vmem:[%s3444_s5] sm:$0x3] }
 0x1d9   :  { %v1006_v14 = vadd.f32 %v1005_v13, %v189_v9  ;;  %v1007_v15 = vpop.f32.mrb[13].mxu1  ;;  %1975 = vmatprep.subr.bf16.mxu0 %v2527_v11  ;;  %v2032_v11 = vrot.slane %v2027_v8, %v3089_v47 }
 0x1da   :  { %v1008_v17 = vadd.f32 %v1007_v15, %v193_v12  ;;  %v1009_v18 = vpop.f32.mrb[14].mxu1 }
 0x1db   :  { %v1010_v19 = vadd.f32 %v1009_v18, %v189_v9  ;;  %v1011_v21 = vpop.f32.mrb[15].mxu1  ;;  %v1020_v23 = vmax.f32 %v1006_v14, 0.0  ;;  %v2043_v9 = vld [vmem:[%s3445_s6] sm:$0x3] }
 0x1dc   :  { %v1012_v22 = vadd.f32 %v1011_v21, %v193_v12  ;;  %1976 = vmatpush1.bf16.msra.mxu0 %v2525_v46  ;;  %v1021_v25 = vmax.f32 %v1008_v17, 0.0  ;;  %v2036_v12 = vrot.slane %v2027_v8, %v3097_v49  ;;  %v2048_v46 = vrot.slane %v2043_v9, %v3089_v47 }
 0x1dd   :  { %v1028_v24 = vmax.f32 %v1010_v19, 0.0  ;;  %1977 = vmatprep.subr.bf16.mxu0 %v2530_v16  ;;  %v2052_v14 = vrot.slane %v2043_v9, %v3097_v49 }
 0x1de   :  { %v1029_v26 = vmax.f32 %v1012_v22, 0.0 }
 0x1df   :  { %v1036_v27 = vpack.c.bf16 %v1028_v24, %v1020_v23 }
 0x1e0   :  { %v1037_v28 = vpack.c.bf16 %v1029_v26, %v1021_v25  ;;  %1978 = vmatpush1.bf16.msra.mxu0 %v2528_v48 }
 0x1e2   :  { %1979 = vmatprep.mubr.bf16.mxu0 %v1037_v28 }
 0x1e3   :  { %1980 = vmatmul.mubr.bf16.vlgmr.msra.gmra.mrb[0].mxu0 %v1036_v27 }
 0x2b6   :  { %v1981_v32 = vpop.f32.mrb[0].mxu0 }
 0x2b7   :  { %v2323_v33 = vadd.f32 %v1981_v32, %v1171_v30  ;;  %v1983_v34 = vpop.f32.mrb[1].mxu0 }
 0x2b8   :  { %v2324_v35 = vadd.f32 %v1983_v34, %v1175_v31  ;;  %v1985_v36 = vpop.f32.mrb[2].mxu0 }
 0x2b9   :  { %v2325_v37 = vadd.f32 %v1985_v36, %v1171_v30  ;;  %v1987_v38 = vpop.f32.mrb[3].mxu0  ;;  %v1990_v40 = vadd.f32 %v2535_v39, %v2323_v33 }
 0x2ba   :  { %v2326_v41 = vadd.f32 %v1987_v38, %v1175_v31  ;;  %v1991_v43 = vadd.f32 %v2536_v42, %v2324_v35 }
 0x2bb   :  { %v1992_v45 = vadd.f32 %v2537_v44, %v2325_v37 }
 0x2bc   :  { %v1993_v10 = vadd.f32 %v2538_v50, %v2326_v41  ;;  %v1994_v51 = vadd.f32 %v1991_v43, %v1990_v40 }
 0x2be   :  { %1995 = vadd.xlane.f32.xlu0 %v1994_v51  ;;  %v1997_v52 = vadd.f32 %v1993_v10, %v1992_v45 }
 0x2c2   :  { %1998 = vadd.xlane.f32.xlu0 %v1997_v52 }
 0x34b   :  { %v1996_v53 = vpop.xlane.xlu0 %1995 }
 0x34c   :  { %v2001_v54 = vmul.f32 0.00390625, %v1996_v53 }
 0x34e   :  { %v2003_v55 = vsub.f32 %v1990_v40, %v2001_v54  ;;  %v2004_v56 = vsub.f32 %v1991_v43, %v2001_v54 }
 0x34f   :  { %v1999_v57 = vpop.xlane.xlu0 %1998 }
 0x350   :  { %v2002_v58 = vmul.f32 0.00390625, %v1999_v57  ;;  %v2007_v59 = vmul.f32 %v2003_v55, %v2003_v55  ;;  %v2008_v20 = vmul.f32 %v2004_v56, %v2004_v56 }
 0x352   :  { %v2005_v60 = vsub.f32 %v1992_v45, %v2002_v58  ;;  %v2006_v61 = vsub.f32 %v1993_v10, %v2002_v58  ;;  %v2011_v62 = vadd.f32 %v2008_v20, %v2007_v59 }
 0x354   :  { %2012 = vadd.xlane.f32.xlu1 %v2011_v62  ;;  %v2009_v63 = vmul.f32 %v2005_v60, %v2005_v60  ;;  %v2010_v0 = vmul.f32 %v2006_v61, %v2006_v61 }
 0x356   :  { %v2014_v1 = vadd.f32 %v2010_v0, %v2009_v63 }
 0x358   :  { %2015 = vadd.xlane.f32.xlu1 %v2014_v1 }
 0x3e1   :  { %v2013_v2 = vpop.xlane.xlu1 %2012 }
 0x3e2   :  { %v2017_v3 = vmul.f32 0.00390625, %v2013_v2 }
 0x3e4   :  { %v2019_v4 = vadd.f32 1e-05, %v2017_v3 }
 0x3e5   :  { %v2016_v5 = vpop.xlane.xlu1 %2015 }
 0x3e6   :  { %2531 = vrsqrt.f32 %v2019_v4  ;;  %v2018_v6 = vmul.f32 0.00390625, %v2016_v5 }
 0x3e8   :  { %v2020_v7 = vadd.f32 1e-05, %v2018_v6 }
 0x3ea   :  { %2533 = vrsqrt.f32 %v2020_v7 }
 0x3f0   :  { %v2532_v13 = vpop.eup %2531 }
 0x3f1   :  { %v2023_v15 = vmul.f32 %v2532_v13, %v2003_v55  ;;  %v2024_v16 = vmul.f32 %v2532_v13, %v2004_v56 }
 0x3f3   :  { %v2039_v17 = vmul.f32 %v2032_v11, %v2023_v15  ;;  %v2040_v18 = vmul.f32 %v2036_v12, %v2024_v16 }
 0x3f4   :  { %v2534_v19 = vpop.eup %2533 }
 0x3f5   :  { %v2055_v21 = vadd.f32 %v2048_v46, %v2039_v17  ;;  %v2056_v22 = vadd.f32 %v2052_v14, %v2040_v18  ;;  %v2025_v48 = vmul.f32 %v2534_v19, %v2005_v60  ;;  %v2026_v23 = vmul.f32 %v2534_v19, %v2006_v61 }
 0x3f7   :  { %2059 = vst [vmem:[%s3446_s7] sm:$0xff] %v2055_v21  ;;  %2060 = vst [vmem:[%s3446_s7 + $0x8] sm:$0xff] %v2056_v22  ;;  %v2041_v47 = vmul.f32 %v2032_v11, %v2025_v48  ;;  %v2042_v24 = vmul.f32 %v2036_v12, %v2026_v23 }
 0x3f9   :  { %v2057_v49 = vadd.f32 %v2048_v46, %v2041_v47  ;;  %v2058_v25 = vadd.f32 %v2052_v14, %v2042_v24 }
 0x3fb   :  { %2061 = vst [vmem:[%s3446_s7 + $0x10] sm:$0xff] %v2057_v49  ;;  %2062 = vst [vmem:[%s3446_s7 + $0x18] sm:$0xff] %v2058_v25 }

</bundles_post_ra>
